<compile_context>
chip_gen: v5e
topology: v5e:2x2
jax: 0.10.0
libtpu: 0.0.40
codegen_flags: <defaults>
</compile_context>

<pallas_src>
import functools
import numpy as np

import jax
import jax.numpy as jnp
from jax.experimental import pallas as pl
from jax.experimental.pallas import tpu as pltpu

F32 = jnp.float32
LN_EPS = 1e-5          # nn.LayerNorm default
NEG_BIG = -1e30        # finite sentinel (replaces -inf; avoids NaN intermediates)

# MXU operand dtype: bf16 operands + f32 accumulation (preferred_element_type) is the
# native fast path on v5e/v6e/v7x and halves operand HBM/VMEM traffic.  Flip to
# jnp.float32 for bit-tight validation (then max-abs error vs the f32 ref is <5e-3).
MM_DTYPE = jnp.bfloat16

# Validation tolerance vs the f32 reference: covers bf16 operand/input rounding and the
# approximate EUP reciprocal in the softmax.
ATOL = 3e-2

# Weights consumed by the per-batch rpn/decoder kernel (kernel 1), in ref order.
K1_WEIGHTS = (
    'dec_norm2_g', 'dec_norm2_b',
    'rpn_to_q_w', 'rpn_to_k_w', 'rpn_to_v_w', 'rpn_proj_w', 'rpn_proj_b',
    'reason_norm_g', 'reason_norm_b', 'reason_lin_w',
    'norm1_g', 'norm1_b', 'ffn_fc1_w', 'ffn_fc1_b', 'ffn_fc2_w', 'ffn_fc2_b',
    'norm2_g', 'norm2_b', 'attn_to_k_w', 'attn_to_v_w',
)


# ----------------------------------------------------------------------------
# shared math helpers (traceable inside the kernels and in the reference)
# ----------------------------------------------------------------------------

def _gelu_tanh(h):
    # TODO(synk): PyTorch nn.GELU() default is the exact erf form; tanh approximation
    # is used because erf lowering in Mosaic is not guaranteed (max-abs diff ~1e-3).
    c = 0.7978845608028654  # sqrt(2/pi)
    return 0.5 * h * (1.0 + jnp.tanh(c * (h + 0.044715 * h * h * h)))


def _ln(t, g, b):
    mu = jnp.mean(t, axis=-1, keepdims=True)
    var = jnp.mean(jnp.square(t - mu), axis=-1, keepdims=True)
    return (t - mu) * jax.lax.rsqrt(var + LN_EPS) * g + b


def _mm(a, b):
    return jnp.dot(a.astype(MM_DTYPE), b.astype(MM_DTYPE),
                   preferred_element_type=jnp.float32)


def _mm_nt(a, b):
    # a[M,K] @ b[N,K]^T -> [M,N] without materializing a transpose.
    return jax.lax.dot_general(a.astype(MM_DTYPE), b.astype(MM_DTYPE),
                               (((1,), (1,)), ((), ())),
                               preferred_element_type=jnp.float32)


def _softmax_last(s):
    # f32 scores in, f32 probs out; EUP reciprocal instead of a VALU divide.
    s = s - jnp.max(s, axis=-1, keepdims=True)
    p = jnp.exp(s)
    return p * pl.reciprocal(jnp.sum(p, axis=-1, keepdims=True), approx=True)


# ----------------------------------------------------------------------------
# Kernel 1: SoftRPN decoder + SimpleReasoning + rpn FFN + norm2 + encoder K/V
# (one grid step = one batch element; everything VMEM-resident)
# TODO(synk): for very large N, tile the decoder keys too (online softmax over N
# blocks) instead of loading the full [N, C] x per batch here.
# ----------------------------------------------------------------------------

def _rpn_path_kernel(x_ref, mkey_ref, rpn_ref, rpnpos_ref, *rest):
    # Load every weight ref up front (fix for the previous Ref-arithmetic bug).
    w = {name: ref[...] for name, ref in zip(K1_WEIGHTS, rest[:len(K1_WEIGHTS)])}
    rpn_out_ref, kenc_ref, venc_ref = rest[len(K1_WEIGHTS):]

    x = x_ref[0]                              # [N, C]  bf16
    rpn = rpn_ref[0].astype(F32)              # [P, C]  running token state in f32
    key_masked = mkey_ref[0] > 0.5            # [1, N]  decoder key mask
    C = x.shape[-1]

    # ---- SoftRPN.rpn_attn (1 head, merge_kv): q = to_q(LN(rpn)+rpn_pos), kv = to_kv(x)
    q = _ln(rpn, w['dec_norm2_g'], w['dec_norm2_b']) + rpnpos_ref[...].astype(F32)
    q = _mm(q, w['rpn_to_q_w'])               # [P, C]
    k = _mm(x, w['rpn_to_k_w'])               # [N, C]   (pre-split KV weight: no lane split)
    v = _mm(x, w['rpn_to_v_w'])               # [N, C]
    s = _mm_nt(q, k) * (C ** -0.5)            # [P, N]   (dim_per_head = C, single head)
    s = jnp.where(key_masked, jnp.float32(NEG_BIG), s)
    p = _softmax_last(s)
    p = jnp.where(key_masked, 0.0, p)         # matches torch masked_fill(0) post-softmax
    dec = _mm(p, v)                           # [P, C]
    dec = _mm(dec, w['rpn_proj_w']) + w['rpn_proj_b']
    rpn = rpn + dec                           # residual (DropPath eval = identity)

    # ---- SimpleReasoning: x + Conv1d_{PxP,k=1}(LN(x))
    t = _ln(rpn, w['reason_norm_g'], w['reason_norm_b'])
    rpn = rpn + _mm(w['reason_lin_w'], t)     # [P,P] @ [P,C]

    # ---- rpn FFN: x + fc2(GELU(fc1(LN(x))))
    h = _ln(rpn, w['norm1_g'], w['norm1_b'])
    h = _gelu_tanh(_mm(h, w['ffn_fc1_w']) + w['ffn_fc1_b'])
    rpn = rpn + _mm(h, w['ffn_fc2_w']) + w['ffn_fc2_b']
    rpn_out_ref[0] = rpn                      # f32, lane-dense [P, C] store

    # ---- GlobalAttn.norm2 + encoder K/V projections (once per batch; consumed by kernel 2)
    normed = _ln(rpn, w['norm2_g'], w['norm2_b'])
    kenc_ref[0] = _mm(normed, w['attn_to_k_w']).astype(MM_DTYPE)
    venc_ref[0] = _mm(normed, w['attn_to_v_w']).astype(MM_DTYPE)


# ----------------------------------------------------------------------------
# Kernel 2: encoder cross-attention, tiled over N rows.
# Per-head weights/K/V are pre-split ([G,...] leading dim), so the static head loop
# only indexes leading dims -- no lane slicing, no concat, no in-kernel transposes.
# ----------------------------------------------------------------------------

def _enc_attn_kernel(x_ref, mq_ref, spapos_ref, kh_ref, vh_ref,
                     wq_ref, wp_ref, pb_ref, o_ref, *, num_heads):
    G = num_heads
    TN, C = x_ref.shape[1], x_ref.shape[2]
    Ch = C // G
    scale = Ch ** -0.5

    x_pos = x_ref[0] + spapos_ref[...]        # [TN, C] bf16  (apply_abs_pos with spa_pos)
    qry_masked = mq_ref[0] > 0.5              # [TN, 1]
    kh = kh_ref[0]                            # [G, P, Ch] bf16
    vh = vh_ref[0]                            # [G, P, Ch] bf16
    wq = wq_ref[...]                          # [G, C, Ch]
    wp = wp_ref[...]                          # [G, Ch, C]

    acc = jnp.zeros((TN, C), jnp.float32)     # projected output accumulator (lane-dense)
    for g in range(G):                        # static unroll; leading-dim indexing only
        q_g = _mm(x_pos, wq[g])               # [TN, Ch]
        s = _mm_nt(q_g, kh[g]) * scale        # [TN, P]
        p = _softmax_last(s)
        o_g = _mm(p, vh[g])                   # [TN, Ch]
        acc = acc + _mm(o_g, wp[g])           # per-head proj slice, accumulated in [TN, C]
    # Single post-softmax query-mask select (hoisted out of the head loop), then bias:
    # masked rows -> proj bias, exactly as masked_fill(-inf)+softmax+masked_fill(0)+proj.
    o_ref[0] = jnp.where(qry_masked, 0.0, acc) + pb_ref[...]


# ----------------------------------------------------------------------------
# Wrapper
# ----------------------------------------------------------------------------

def _tpu_tuning():
    """Per-generation TILE_N cap and scoped-VMEM budget.
    v5e/v6e: 128 MiB physical -> large tiles (aim 512-1024 rows), ~100 MiB limit.
    v7x (and unknown/CPU-interpret): 64 MiB physical -> smaller tiles, ~48 MiB limit."""
    try:
        kind = jax.devices()[0].device_kind.lower()
    except Exception:
        kind = ""
    if ("v5" in kind) or ("v6" in kind):
        return 1024, 100 * 1024 * 1024
    return 512, 48 * 1024 * 1024


def _pick_tile_n(n, cap):
    for t in (1024, 512, 256, 128, 64, 32, 16, 8):
        if t <= cap and n % t == 0:
            return t
    return n


def global_attn_pallas(params, x, mask, rpn_tokens, rpn_pos, spa_pos):
    """params: prepared (pre-transposed / pre-split) weights; x: [B,N,C];
    mask: [B,1,H,W] (1==masked); rpn_tokens: [B,P,C]; rpn_pos: [1,P,C]; spa_pos: [1,N,C]."""
    B, N, C = x.shape
    P = rpn_tokens.shape[1]
    G = params['num_heads']
    Ch = C // G
    tile_cap, vmem_limit = _tpu_tuning()
    TN = _pick_tile_n(N, tile_cap)

    # bf16 activation streams (halved HBM traffic); masks stay f32 for the compare.
    xb = x.astype(MM_DTYPE)
    rpnb = rpn_tokens.astype(MM_DTYPE)
    rpnposb = jnp.asarray(rpn_pos, MM_DTYPE).reshape(P, C)
    spaposb = jnp.asarray(spa_pos, MM_DTYPE).reshape(N, C)
    m = mask.reshape(B, N).astype(F32)
    mrow = m.reshape(B, 1, N)       # decoder: key mask
    mcol = m.reshape(B, N, 1)       # encoder: query mask

    # TODO(synk): mark the constant-index inputs (weights, positions, K/V, bias) with
    # pipeline_mode=pl.Buffered(1) to drop their second pipeline buffer -- VMEM headroom
    # that matters most under v7x's 64 MiB.
    # TODO(synk): at tiny B*N*C, pack several batch rows per grid step (or emit outputs
    # in bf16) to amortize the ~0.35us/step pipeline overhead.

    # ----------------- kernel 1: rpn / decoder path (per batch) -----------------
    w1 = [params[n] for n in K1_WEIGHTS]
    k1_in_specs = [
        pl.BlockSpec((1, N, C), lambda b: (b, 0, 0)),    # x
        pl.BlockSpec((1, 1, N), lambda b: (b, 0, 0)),    # key mask
        pl.BlockSpec((1, P, C), lambda b: (b, 0, 0)),    # rpn_tokens
        pl.BlockSpec((P, C), lambda b: (0, 0)),          # rpn_pos (shared over batch)
    ] + [pl.BlockSpec(wv.shape, lambda b, r=wv.ndim: (0,) * r) for wv in w1]

    rpn_out, k_enc, v_enc = pl.pallas_call(
        _rpn_path_kernel,
        out_shape=(jax.ShapeDtypeStruct((B, P, C), F32),
                   jax.ShapeDtypeStruct((B, P, C), MM_DTYPE),
                   jax.ShapeDtypeStruct((B, P, C), MM_DTYPE)),
        grid=(B,),
        in_specs=k1_in_specs,
        out_specs=(pl.BlockSpec((1, P, C), lambda b: (b, 0, 0)),
                   pl.BlockSpec((1, P, C), lambda b: (b, 0, 0)),
                   pl.BlockSpec((1, P, C), lambda b: (b, 0, 0))),
        compiler_params=pltpu.CompilerParams(
            dimension_semantics=("parallel",),
            vmem_limit_bytes=vmem_limit),
    )(xb, mrow, rpnb, rpnposb, *w1)

    # Head-split the tiny [B,P,C] K/V in plain JAX (XLA transpose, not an in-kernel relayout).
    k_h = k_enc.reshape(B, P, G, Ch).transpose(0, 2, 1, 3)   # [B, G, P, Ch]
    v_h = v_enc.reshape(B, P, G, Ch).transpose(0, 2, 1, 3)

    # ----------------- kernel 2: encoder cross-attention, tiled over N ----------
    k2_in_specs = [
        pl.BlockSpec((1, TN, C), lambda b, n: (b, n, 0)),        # x tile
        pl.BlockSpec((1, TN, 1), lambda b, n: (b, n, 0)),        # query-mask tile
        pl.BlockSpec((TN, C), lambda b, n: (n, 0)),              # spa_pos tile
        pl.BlockSpec((1, G, P, Ch), lambda b, n: (b, 0, 0, 0)),  # K heads
        pl.BlockSpec((1, G, P, Ch), lambda b, n: (b, 0, 0, 0)),  # V heads
        pl.BlockSpec((G, C, Ch), lambda b, n: (0, 0, 0)),        # per-head Wq
        pl.BlockSpec((G, Ch, C), lambda b, n: (0, 0, 0)),        # per-head Wproj
        pl.BlockSpec((1, C), lambda b, n: (0, 0)),               # proj bias
    ]
    enc_out = pl.pallas_call(
        functools.partial(_enc_attn_kernel, num_heads=G),
        out_shape=jax.ShapeDtypeStruct((B, N, C), F32),
        grid=(B, N // TN),
        in_specs=k2_in_specs,
        out_specs=pl.BlockSpec((1, TN, C), lambda b, n: (b, n, 0)),
        compiler_params=pltpu.CompilerParams(
            dimension_semantics=("parallel", "parallel"),   # both axes split over v7x's 2 TCs
            vmem_limit_bytes=vmem_limit),
    )(xb, mcol, spaposb, k_h, v_h,
      params['attn_q_w_h'], params['attn_proj_w_h'], params['attn_proj_b'])

    return enc_out, rpn_out, rpn_pos


# ----------------------------------------------------------------------------
# Parameter init (torch layout) + one-time prep (pre-transpose / pre-split / reshape)
# ----------------------------------------------------------------------------

def init_params_torch(key, C, P, num_heads):
    ks = jax.random.split(key, 21)

    def w(k, shape, std=0.05):
        return (std * jax.random.normal(k, shape)).astype(F32)

    tp = dict(num_heads=num_heads)
    tp['dec_norm2_w'] = 1.0 + w(ks[0], (C,), 0.1); tp['dec_norm2_b'] = w(ks[1], (C,), 0.05)
    tp['rpn_to_q_w'] = w(ks[2], (C, C))                  # torch nn.Linear: [Cout, Cin]
    tp['rpn_to_kv_w'] = w(ks[3], (2 * C, C))
    tp['rpn_proj_w'] = w(ks[4], (C, C)); tp['rpn_proj_b'] = w(ks[5], (C,), 0.02)
    tp['reason_norm_w'] = 1.0 + w(ks[6], (C,), 0.1); tp['reason_norm_b'] = w(ks[7], (C,), 0.05)
    tp['reason_lin_w'] = w(ks[8], (P, P))                # Conv1d(P,P,1,bias=False).weight[:,:,0]
    tp['norm1_w'] = 1.0 + w(ks[9], (C,), 0.1); tp['norm1_b'] = w(ks[10], (C,), 0.05)
    tp['norm2_w'] = 1.0 + w(ks[11], (C,), 0.1); tp['norm2_b'] = w(ks[12], (C,), 0.05)
    tp['ffn_fc1_w'] = w(ks[13], (C, C)); tp['ffn_fc1_b'] = w(ks[14], (C,), 0.02)
    tp['ffn_fc2_w'] = w(ks[15], (C, C)); tp['ffn_fc2_b'] = w(ks[16], (C,), 0.02)
    tp['attn_to_q_w'] = w(ks[17], (C, C))
    tp['attn_to_kv_w'] = w(ks[18], (2 * C, C))
    tp['attn_proj_w'] = w(ks[19], (C, C)); tp['attn_proj_b'] = w(ks[20], (C,), 0.02)
    return tp


def prepare_params(tp, C):
    """One-time host-side prep: pre-transpose nn.Linear weights to [Cin, Cout] (bf16),
    pre-split merged KV weights, pre-split the encoder q/proj weights per head, and
    reshape LN params / biases to [1, C] f32."""
    G = tp['num_heads']
    Ch = C // G

    def wcast(a):
        return jnp.asarray(a, MM_DTYPE)

    def fvec(a):
        return jnp.asarray(a, F32).reshape(1, -1)

    p = dict(num_heads=G)
    p['dec_norm2_g'] = fvec(tp['dec_norm2_w']); p['dec_norm2_b'] = fvec(tp['dec_norm2_b'])
    p['rpn_to_q_w'] = wcast(tp['rpn_to_q_w'].T)
    p['rpn_to_k_w'] = wcast(tp['rpn_to_kv_w'][:C].T)     # pre-split merged KV
    p['rpn_to_v_w'] = wcast(tp['rpn_to_kv_w'][C:].T)
    p['rpn_proj_w'] = wcast(tp['rpn_proj_w'].T); p['rpn_proj_b'] = fvec(tp['rpn_proj_b'])
    p['reason_norm_g'] = fvec(tp['reason_norm_w']); p['reason_norm_b'] = fvec(tp['reason_norm_b'])
    p['reason_lin_w'] = wcast(tp['reason_lin_w'])        # applied as W @ tokens
    p['norm1_g'] = fvec(tp['norm1_w']); p['norm1_b'] = fvec(tp['norm1_b'])
    p['ffn_fc1_w'] = wcast(tp['ffn_fc1_w'].T); p['ffn_fc1_b'] = fvec(tp['ffn_fc1_b'])
    p['ffn_fc2_w'] = wcast(tp['ffn_fc2_w'].T); p['ffn_fc2_b'] = fvec(tp['ffn_fc2_b'])
    p['norm2_g'] = fvec(tp['norm2_w']); p['norm2_b'] = fvec(tp['norm2_b'])
    p['attn_to_k_w'] = wcast(tp['attn_to_kv_w'][:C].T)   # pre-split merged KV
    p['attn_to_v_w'] = wcast(tp['attn_to_kv_w'][C:].T)
    # encoder q / proj pre-split per head (head-major output / input ordering of torch)
    p['attn_q_w_h'] = wcast(tp['attn_to_q_w'].T.reshape(C, G, Ch).transpose(1, 0, 2))  # [G,C,Ch]
    p['attn_proj_w_h'] = wcast(tp['attn_proj_w'].T.reshape(G, Ch, C))                  # [G,Ch,C]
    p['attn_proj_b'] = fvec(tp['attn_proj_b'])
    return p


# ----------------------------------------------------------------------------
# Pure-JAX reference (mirrors the torch module; consumes torch-layout params)
# ----------------------------------------------------------------------------
HI = jax.lax.Precision.HIGHEST


def _ref_ln(t, g, b):
    mu = jnp.mean(t, -1, keepdims=True)
    var = jnp.mean(jnp.square(t - mu), -1, keepdims=True)
    return (t - mu) * jax.lax.rsqrt(var + LN_EPS) * g + b


def _ref_lin(t, w, b=None):
    y = jnp.einsum('...i,oi->...o', t, w, precision=HI)
    return y if b is None else y + b


def _ref_attention(q, k, v, mask4d, G, scale):
    B, Nq, C = q.shape
    Ch = C // G
    qh, kh, vh = (t.reshape(t.shape[0], t.shape[1], G, Ch) for t in (q, k, v))
    attn = jnp.einsum('bqgc,bkgc->bqgk', qh, kh, precision=HI) * scale
    m = jnp.broadcast_to(mask4d, attn.shape) > 0.5
    attn = jnp.where(m, -jnp.inf, attn)
    attn = jax.nn.softmax(attn, axis=-1)
    attn = jnp.where(m, 0.0, attn)           # rescues fully-masked (NaN) rows, as in torch
    out = jnp.einsum('bqgk,bkgc->bqgc', attn, vh, precision=HI)
    return out.reshape(B, Nq, C)


def global_attn_ref(tp, x, mask, rpn_tokens, rpn_pos, spa_pos):
    B, N, C = x.shape
    G = tp['num_heads']
    m = mask.reshape(B, N)
    dec_mask = m.reshape(B, 1, 1, N)
    enc_mask = m.reshape(B, N, 1, 1)

    # SoftRPN (has_comm=False): rpn_attn with 1 head
    q = _ref_ln(rpn_tokens, tp['dec_norm2_w'], tp['dec_norm2_b']) + rpn_pos
    q = _ref_lin(q, tp['rpn_to_q_w'])
    kv = _ref_lin(x, tp['rpn_to_kv_w'])
    k, v = kv[..., :C], kv[..., C:]
    dec = _ref_attention(q, k, v, dec_mask, 1, C ** -0.5)
    dec = _ref_lin(dec, tp['rpn_proj_w'], tp['rpn_proj_b'])
    rpn = rpn_tokens + dec
    # SimpleReasoning
    t = _ref_ln(rpn, tp['reason_norm_w'], tp['reason_norm_b'])
    rpn = rpn + jnp.einsum('ij,bjc->bic', tp['reason_lin_w'], t, precision=HI)
    # rpn FFN
    h = _ref_ln(rpn, tp['norm1_w'], tp['norm1_b'])
    h = _gelu_tanh(_ref_lin(h, tp['ffn_fc1_w'], tp['ffn_fc1_b']))
    rpn = rpn + _ref_lin(h, tp['ffn_fc2_w'], tp['ffn_fc2_b'])
    # main cross attention
    normed = _ref_ln(rpn, tp['norm2_w'], tp['norm2_b'])
    qe = _ref_lin(x + spa_pos, tp['attn_to_q_w'])
    kve = _ref_lin(normed, tp['attn_to_kv_w'])
    ke, ve = kve[..., :C], kve[..., C:]
    enc = _ref_attention(qe, ke, ve, enc_mask, G, (C // G) ** -0.5)
    enc = _ref_lin(enc, tp['attn_proj_w'], tp['attn_proj_b'])
    return enc, rpn, rpn_pos


# ----------------------------------------------------------------------------

if __name__ == "__main__":
    B, Himg, Wimg, C = 2, 8, 8, 32
    N = Himg * Wimg
    P = 16            # num_points (rpn tokens)
    num_heads = 8

    key = jax.random.PRNGKey(0)
    kx, km, kt, kp, ks, kparam = jax.random.split(key, 6)

    x = jax.random.normal(kx, (B, N, C), F32)
    mask = (jax.random.uniform(km, (B, 1, Himg, Wimg)) < 0.25).astype(F32)
    mask = mask.at[:, :, 0, :].set(0.0)          # guarantee some unmasked keys per batch
    rpn_tokens = jax.random.normal(kt, (B, P, C), F32)
    rpn_pos = 0.1 * jax.random.normal(kp, (1, P, C), F32)
    spa_pos = 0.1 * jax.random.normal(ks, (1, N, C), F32)

    torch_params = init_params_torch(kparam, C, P, num_heads)
    params = prepare_params(torch_params, C)     # one-time pre-transpose / pre-split

    fwd = jax.jit(functools.partial(global_attn_pallas, params))
    enc_out, rpn_out, rpn_pos_out = fwd(x, mask, rpn_tokens, rpn_pos, spa_pos)
    jax.block_until_ready((enc_out, rpn_out, rpn_pos_out))

    # pure-JAX f32 reference (same math, torch-layout params) to validate the kernels
    enc_ref, rpn_ref, _ = global_attn_ref(torch_params, x, mask, rpn_tokens, rpn_pos, spa_pos)
    err_enc = float(jnp.max(jnp.abs(enc_out - enc_ref)))
    err_rpn = float(jnp.max(jnp.abs(rpn_out - rpn_ref)))
    assert enc_out.shape == (B, N, C) and rpn_out.shape == (B, P, C)
    assert np.isfinite(np.asarray(enc_out)).all() and np.isfinite(np.asarray(rpn_out)).all()
    assert err_enc < ATOL and err_rpn < ATOL, (err_enc, err_rpn)

    print("KERNEL_OK")
</pallas_src>

<mosaic_0001>
module attributes {stable_mosaic.version = 11 : i64} {
  func.func @_rpn_path_kernel(%arg0: i32, %arg1: memref<1x64x32xbf16, #tpu.memory_space<vmem>>, %arg2: memref<1x1x64xf32, #tpu.memory_space<vmem>>, %arg3: memref<1x16x32xbf16, #tpu.memory_space<vmem>>, %arg4: memref<16x32xbf16, #tpu.memory_space<vmem>>, %arg5: memref<1x32xf32, #tpu.memory_space<vmem>>, %arg6: memref<1x32xf32, #tpu.memory_space<vmem>>, %arg7: memref<32x32xbf16, #tpu.memory_space<vmem>>, %arg8: memref<32x32xbf16, #tpu.memory_space<vmem>>, %arg9: memref<32x32xbf16, #tpu.memory_space<vmem>>, %arg10: memref<32x32xbf16, #tpu.memory_space<vmem>>, %arg11: memref<1x32xf32, #tpu.memory_space<vmem>>, %arg12: memref<1x32xf32, #tpu.memory_space<vmem>>, %arg13: memref<1x32xf32, #tpu.memory_space<vmem>>, %arg14: memref<16x16xbf16, #tpu.memory_space<vmem>>, %arg15: memref<1x32xf32, #tpu.memory_space<vmem>>, %arg16: memref<1x32xf32, #tpu.memory_space<vmem>>, %arg17: memref<32x32xbf16, #tpu.memory_space<vmem>>, %arg18: memref<1x32xf32, #tpu.memory_space<vmem>>, %arg19: memref<32x32xbf16, #tpu.memory_space<vmem>>, %arg20: memref<1x32xf32, #tpu.memory_space<vmem>>, %arg21: memref<1x32xf32, #tpu.memory_space<vmem>>, %arg22: memref<1x32xf32, #tpu.memory_space<vmem>>, %arg23: memref<32x32xbf16, #tpu.memory_space<vmem>>, %arg24: memref<32x32xbf16, #tpu.memory_space<vmem>>, %arg25: memref<1x16x32xf32, #tpu.memory_space<vmem>>, %arg26: memref<1x16x32xbf16, #tpu.memory_space<vmem>>, %arg27: memref<1x16x32xbf16, #tpu.memory_space<vmem>>) attributes {dimension_semantics = [#tpu.dimension_semantics<parallel>], iteration_bounds = array<i64: 2>, scalar_prefetch = 0 : i64, scratch_operands = 0 : i64, tpu.core_type = #tpu.core_type<tc>, window_params = [{transform_indices = @transform_0, window_bounds = array<i64: 1, 64, 32>}, {transform_indices = @transform_1, window_bounds = array<i64: 1, 1, 64>}, {transform_indices = @transform_2, window_bounds = array<i64: 1, 16, 32>}, {pipeline_mode = #tpu.pipeline_mode<synchronous>, transform_indices = @transform_3, window_bounds = array<i64: 16, 32>}, {pipeline_mode = #tpu.pipeline_mode<synchronous>, transform_indices = @transform_4, window_bounds = array<i64: 1, 32>}, {pipeline_mode = #tpu.pipeline_mode<synchronous>, transform_indices = @transform_5, window_bounds = array<i64: 1, 32>}, {pipeline_mode = #tpu.pipeline_mode<synchronous>, transform_indices = @transform_6, window_bounds = array<i64: 32, 32>}, {pipeline_mode = #tpu.pipeline_mode<synchronous>, transform_indices = @transform_7, window_bounds = array<i64: 32, 32>}, {pipeline_mode = #tpu.pipeline_mode<synchronous>, transform_indices = @transform_8, window_bounds = array<i64: 32, 32>}, {pipeline_mode = #tpu.pipeline_mode<synchronous>, transform_indices = @transform_9, window_bounds = array<i64: 32, 32>}, {pipeline_mode = #tpu.pipeline_mode<synchronous>, transform_indices = @transform_10, window_bounds = array<i64: 1, 32>}, {pipeline_mode = #tpu.pipeline_mode<synchronous>, transform_indices = @transform_11, window_bounds = array<i64: 1, 32>}, {pipeline_mode = #tpu.pipeline_mode<synchronous>, transform_indices = @transform_12, window_bounds = array<i64: 1, 32>}, {pipeline_mode = #tpu.pipeline_mode<synchronous>, transform_indices = @transform_13, window_bounds = array<i64: 16, 16>}, {pipeline_mode = #tpu.pipeline_mode<synchronous>, transform_indices = @transform_14, window_bounds = array<i64: 1, 32>}, {pipeline_mode = #tpu.pipeline_mode<synchronous>, transform_indices = @transform_15, window_bounds = array<i64: 1, 32>}, {pipeline_mode = #tpu.pipeline_mode<synchronous>, transform_indices = @transform_16, window_bounds = array<i64: 32, 32>}, {pipeline_mode = #tpu.pipeline_mode<synchronous>, transform_indices = @transform_17, window_bounds = array<i64: 1, 32>}, {pipeline_mode = #tpu.pipeline_mode<synchronous>, transform_indices = @transform_18, window_bounds = array<i64: 32, 32>}, {pipeline_mode = #tpu.pipeline_mode<synchronous>, transform_indices = @transform_19, window_bounds = array<i64: 1, 32>}, {pipeline_mode = #tpu.pipeline_mode<synchronous>, transform_indices = @transform_20, window_bounds = array<i64: 1, 32>}, {pipeline_mode = #tpu.pipeline_mode<synchronous>, transform_indices = @transform_21, window_bounds = array<i64: 1, 32>}, {pipeline_mode = #tpu.pipeline_mode<synchronous>, transform_indices = @transform_22, window_bounds = array<i64: 32, 32>}, {pipeline_mode = #tpu.pipeline_mode<synchronous>, transform_indices = @transform_23, window_bounds = array<i64: 32, 32>}, {transform_indices = @transform_24, window_bounds = array<i64: 1, 16, 32>}, {transform_indices = @transform_25, window_bounds = array<i64: 1, 16, 32>}, {transform_indices = @transform_26, window_bounds = array<i64: 1, 16, 32>}]} {
    %c0 = arith.constant 0 : index
    %c0_0 = arith.constant 0 : index
    %0 = vector.load %arg5[%c0, %c0_0] : memref<1x32xf32, #tpu.memory_space<vmem>>, vector<1x32xf32>
    %c0_1 = arith.constant 0 : index
    %c0_2 = arith.constant 0 : index
    %1 = vector.load %arg6[%c0_1, %c0_2] : memref<1x32xf32, #tpu.memory_space<vmem>>, vector<1x32xf32>
    %c0_3 = arith.constant 0 : index
    %c0_4 = arith.constant 0 : index
    %2 = vector.load %arg7[%c0_3, %c0_4] : memref<32x32xbf16, #tpu.memory_space<vmem>>, vector<32x32xbf16>
    %c0_5 = arith.constant 0 : index
    %c0_6 = arith.constant 0 : index
    %3 = vector.load %arg8[%c0_5, %c0_6] : memref<32x32xbf16, #tpu.memory_space<vmem>>, vector<32x32xbf16>
    %c0_7 = arith.constant 0 : index
    %c0_8 = arith.constant 0 : index
    %4 = vector.load %arg9[%c0_7, %c0_8] : memref<32x32xbf16, #tpu.memory_space<vmem>>, vector<32x32xbf16>
    %c0_9 = arith.constant 0 : index
    %c0_10 = arith.constant 0 : index
    %5 = vector.load %arg10[%c0_9, %c0_10] : memref<32x32xbf16, #tpu.memory_space<vmem>>, vector<32x32xbf16>
    %c0_11 = arith.constant 0 : index
    %c0_12 = arith.constant 0 : index
    %6 = vector.load %arg11[%c0_11, %c0_12] : memref<1x32xf32, #tpu.memory_space<vmem>>, vector<1x32xf32>
    %c0_13 = arith.constant 0 : index
    %c0_14 = arith.constant 0 : index
    %7 = vector.load %arg12[%c0_13, %c0_14] : memref<1x32xf32, #tpu.memory_space<vmem>>, vector<1x32xf32>
    %c0_15 = arith.constant 0 : index
    %c0_16 = arith.constant 0 : index
    %8 = vector.load %arg13[%c0_15, %c0_16] : memref<1x32xf32, #tpu.memory_space<vmem>>, vector<1x32xf32>
    %c0_17 = arith.constant 0 : index
    %c0_18 = arith.constant 0 : index
    %9 = vector.load %arg14[%c0_17, %c0_18] : memref<16x16xbf16, #tpu.memory_space<vmem>>, vector<16x16xbf16>
    %c0_19 = arith.constant 0 : index
    %c0_20 = arith.constant 0 : index
    %10 = vector.load %arg15[%c0_19, %c0_20] : memref<1x32xf32, #tpu.memory_space<vmem>>, vector<1x32xf32>
    %c0_21 = arith.constant 0 : index
    %c0_22 = arith.constant 0 : index
    %11 = vector.load %arg16[%c0_21, %c0_22] : memref<1x32xf32, #tpu.memory_space<vmem>>, vector<1x32xf32>
    %c0_23 = arith.constant 0 : index
    %c0_24 = arith.constant 0 : index
    %12 = vector.load %arg17[%c0_23, %c0_24] : memref<32x32xbf16, #tpu.memory_space<vmem>>, vector<32x32xbf16>
    %c0_25 = arith.constant 0 : index
    %c0_26 = arith.constant 0 : index
    %13 = vector.load %arg18[%c0_25, %c0_26] : memref<1x32xf32, #tpu.memory_space<vmem>>, vector<1x32xf32>
    %c0_27 = arith.constant 0 : index
    %c0_28 = arith.constant 0 : index
    %14 = vector.load %arg19[%c0_27, %c0_28] : memref<32x32xbf16, #tpu.memory_space<vmem>>, vector<32x32xbf16>
    %c0_29 = arith.constant 0 : index
    %c0_30 = arith.constant 0 : index
    %15 = vector.load %arg20[%c0_29, %c0_30] : memref<1x32xf32, #tpu.memory_space<vmem>>, vector<1x32xf32>
    %c0_31 = arith.constant 0 : index
    %c0_32 = arith.constant 0 : index
    %16 = vector.load %arg21[%c0_31, %c0_32] : memref<1x32xf32, #tpu.memory_space<vmem>>, vector<1x32xf32>
    %c0_33 = arith.constant 0 : index
    %c0_34 = arith.constant 0 : index
    %17 = vector.load %arg22[%c0_33, %c0_34] : memref<1x32xf32, #tpu.memory_space<vmem>>, vector<1x32xf32>
    %c0_35 = arith.constant 0 : index
    %c0_36 = arith.constant 0 : index
    %18 = vector.load %arg23[%c0_35, %c0_36] : memref<32x32xbf16, #tpu.memory_space<vmem>>, vector<32x32xbf16>
    %c0_37 = arith.constant 0 : index
    %c0_38 = arith.constant 0 : index
    %19 = vector.load %arg24[%c0_37, %c0_38] : memref<32x32xbf16, #tpu.memory_space<vmem>>, vector<32x32xbf16>
    %c0_39 = arith.constant 0 : index
    %c0_40 = arith.constant 0 : index
    %c0_41 = arith.constant 0 : index
    %20 = vector.load %arg1[%c0_39, %c0_40, %c0_41] : memref<1x64x32xbf16, #tpu.memory_space<vmem>>, vector<1x64x32xbf16>
    %21 = vector.shape_cast %20 : vector<1x64x32xbf16> to vector<64x32xbf16>
    %c0_42 = arith.constant 0 : index
    %c0_43 = arith.constant 0 : index
    %c0_44 = arith.constant 0 : index
    %22 = vector.load %arg3[%c0_42, %c0_43, %c0_44] : memref<1x16x32xbf16, #tpu.memory_space<vmem>>, vector<1x16x32xbf16>
    %23 = vector.shape_cast %22 : vector<1x16x32xbf16> to vector<16x32xbf16>
    %24 = arith.extf %23 : vector<16x32xbf16> to vector<16x32xf32>
    %c0_45 = arith.constant 0 : index
    %c0_46 = arith.constant 0 : index
    %c0_47 = arith.constant 0 : index
    %25 = vector.load %arg2[%c0_45, %c0_46, %c0_47] : memref<1x1x64xf32, #tpu.memory_space<vmem>>, vector<1x1x64xf32>
    %26 = vector.shape_cast %25 : vector<1x1x64xf32> to vector<1x64xf32>
    %cst = arith.constant 5.000000e-01 : f32
    %27 = vector.broadcast %cst : f32 to vector<1x64xf32>
    %28 = arith.cmpf ogt, %26, %27 : vector<1x64xf32>
    %cst_48 = arith.constant dense<0.000000e+00> : vector<16xf32>
    %29 = vector.multi_reduction <add>, %24, %cst_48 [1] : vector<16x32xf32> to vector<16xf32>
    %30 = vector.shape_cast %29 : vector<16xf32> to vector<16x1xf32>
    %cst_49 = arith.constant 3.200000e+01 : f32
    %31 = vector.broadcast %cst_49 : f32 to vector<16x1xf32>
    %32 = arith.divf %30, %31 : vector<16x1xf32>
    %33 = vector.broadcast %32 : vector<16x1xf32> to vector<16x32xf32>
    %34 = arith.subf %24, %33 : vector<16x32xf32>
    %35 = arith.mulf %34, %34 : vector<16x32xf32>
    %cst_50 = arith.constant dense<0.000000e+00> : vector<16xf32>
    %36 = vector.multi_reduction <add>, %35, %cst_50 [1] : vector<16x32xf32> to vector<16xf32>
    %37 = vector.shape_cast %36 : vector<16xf32> to vector<16x1xf32>
    %cst_51 = arith.constant 3.200000e+01 : f32
    %38 = vector.broadcast %cst_51 : f32 to vector<16x1xf32>
    %39 = arith.divf %37, %38 : vector<16x1xf32>
    %40 = vector.broadcast %32 : vector<16x1xf32> to vector<16x32xf32>
    %41 = arith.subf %24, %40 : vector<16x32xf32>
    %cst_52 = arith.constant 9.99999974E-6 : f32
    %42 = vector.broadcast %cst_52 : f32 to vector<16x1xf32>
    %43 = arith.addf %39, %42 : vector<16x1xf32>
    %44 = math.rsqrt %43 : vector<16x1xf32>
    %45 = vector.broadcast %44 : vector<16x1xf32> to vector<16x32xf32>
    %46 = arith.mulf %41, %45 : vector<16x32xf32>
    %47 = vector.broadcast %0 : vector<1x32xf32> to vector<16x32xf32>
    %48 = arith.mulf %46, %47 : vector<16x32xf32>
    %49 = vector.broadcast %1 : vector<1x32xf32> to vector<16x32xf32>
    %50 = arith.addf %48, %49 : vector<16x32xf32>
    %c0_53 = arith.constant 0 : index
    %c0_54 = arith.constant 0 : index
    %51 = vector.load %arg4[%c0_53, %c0_54] : memref<16x32xbf16, #tpu.memory_space<vmem>>, vector<16x32xbf16>
    %52 = arith.extf %51 : vector<16x32xbf16> to vector<16x32xf32>
    %53 = arith.addf %50, %52 : vector<16x32xf32>
    %54 = arith.truncf %53 : vector<16x32xf32> to vector<16x32xbf16>
    %cst_55 = arith.constant dense<0.000000e+00> : vector<16x32xf32>
    %55 = tpu.matmul %54, %2, %cst_55 {dimension_numbers = #tpu.dot_dimension_numbers<[1], [0], [0], [1], [0, 0, 1, 1], [], []>} : vector<16x32xbf16>, vector<32x32xbf16>, vector<16x32xf32> -> vector<16x32xf32>
    %cst_56 = arith.constant dense<0.000000e+00> : vector<64x32xf32>
    %56 = tpu.matmul %21, %3, %cst_56 {dimension_numbers = #tpu.dot_dimension_numbers<[1], [0], [0], [1], [0, 0, 1, 1], [], []>} : vector<64x32xbf16>, vector<32x32xbf16>, vector<64x32xf32> -> vector<64x32xf32>
    %cst_57 = arith.constant dense<0.000000e+00> : vector<64x32xf32>
    %57 = tpu.matmul %21, %4, %cst_57 {dimension_numbers = #tpu.dot_dimension_numbers<[1], [0], [0], [1], [0, 0, 1, 1], [], []>} : vector<64x32xbf16>, vector<32x32xbf16>, vector<64x32xf32> -> vector<64x32xf32>
    %58 = arith.truncf %55 : vector<16x32xf32> to vector<16x32xbf16>
    %59 = arith.truncf %56 : vector<64x32xf32> to vector<64x32xbf16>
    %cst_58 = arith.constant dense<0.000000e+00> : vector<16x64xf32>
    %60 = tpu.matmul %58, %59, %cst_58 {dimension_numbers = #tpu.dot_dimension_numbers<[1], [1], [0], [0], [0, 0, 1, 0], [], []>} : vector<16x32xbf16>, vector<64x32xbf16>, vector<16x64xf32> -> vector<16x64xf32>
    %cst_59 = arith.constant 0.176776692 : f32
    %61 = vector.broadcast %cst_59 : f32 to vector<16x64xf32>
    %62 = arith.mulf %60, %61 : vector<16x64xf32>
    %cst_60 = arith.constant -1.000000e+30 : f32
    %63 = vector.shape_cast %28 : vector<1x64xi1> to vector<1x64xi1>
    %64 = vector.broadcast %63 : vector<1x64xi1> to vector<16x64xi1>
    %65 = vector.broadcast %cst_60 : f32 to vector<16x64xf32>
    %66 = arith.select %64, %65, %62 : vector<16x64xi1>, vector<16x64xf32>
    %cst_61 = arith.constant dense<0xFF800000> : vector<16xf32>
    %67 = vector.multi_reduction <maximumf>, %66, %cst_61 [1] : vector<16x64xf32> to vector<16xf32>
    %68 = vector.shape_cast %67 : vector<16xf32> to vector<16x1xf32>
    %69 = vector.broadcast %68 : vector<16x1xf32> to vector<16x64xf32>
    %70 = arith.subf %66, %69 : vector<16x64xf32>
    %71 = math.exp %70 : vector<16x64xf32>
    %cst_62 = arith.constant dense<0.000000e+00> : vector<16xf32>
    %72 = vector.multi_reduction <add>, %71, %cst_62 [1] : vector<16x64xf32> to vector<16xf32>
    %73 = vector.shape_cast %72 : vector<16xf32> to vector<16x1xf32>
    %74 = tpu.reciprocal %73 {approx = true} : vector<16x1xf32> -> vector<16x1xf32>
    %75 = vector.broadcast %74 : vector<16x1xf32> to vector<16x64xf32>
    %76 = arith.mulf %71, %75 : vector<16x64xf32>
    %cst_63 = arith.constant 0.000000e+00 : f32
    %77 = vector.shape_cast %28 : vector<1x64xi1> to vector<1x64xi1>
    %78 = vector.broadcast %77 : vector<1x64xi1> to vector<16x64xi1>
    %79 = vector.broadcast %cst_63 : f32 to vector<16x64xf32>
    %80 = arith.select %78, %79, %76 : vector<16x64xi1>, vector<16x64xf32>
    %81 = arith.truncf %80 : vector<16x64xf32> to vector<16x64xbf16>
    %82 = arith.truncf %57 : vector<64x32xf32> to vector<64x32xbf16>
    %cst_64 = arith.constant dense<0.000000e+00> : vector<16x32xf32>
    %83 = tpu.matmul %81, %82, %cst_64 {dimension_numbers = #tpu.dot_dimension_numbers<[1], [0], [0], [1], [0, 0, 1, 1], [], []>} : vector<16x64xbf16>, vector<64x32xbf16>, vector<16x32xf32> -> vector<16x32xf32>
    %84 = arith.truncf %83 : vector<16x32xf32> to vector<16x32xbf16>
    %cst_65 = arith.constant dense<0.000000e+00> : vector<16x32xf32>
    %85 = tpu.matmul %84, %5, %cst_65 {dimension_numbers = #tpu.dot_dimension_numbers<[1], [0], [0], [1], [0, 0, 1, 1], [], []>} : vector<16x32xbf16>, vector<32x32xbf16>, vector<16x32xf32> -> vector<16x32xf32>
    %86 = vector.broadcast %6 : vector<1x32xf32> to vector<16x32xf32>
    %87 = arith.addf %85, %86 : vector<16x32xf32>
    %88 = arith.addf %24, %87 : vector<16x32xf32>
    %cst_66 = arith.constant dense<0.000000e+00> : vector<16xf32>
    %89 = vector.multi_reduction <add>, %88, %cst_66 [1] : vector<16x32xf32> to vector<16xf32>
    %90 = vector.shape_cast %89 : vector<16xf32> to vector<16x1xf32>
    %cst_67 = arith.constant 3.200000e+01 : f32
    %91 = vector.broadcast %cst_67 : f32 to vector<16x1xf32>
    %92 = arith.divf %90, %91 : vector<16x1xf32>
    %93 = vector.broadcast %92 : vector<16x1xf32> to vector<16x32xf32>
    %94 = arith.subf %88, %93 : vector<16x32xf32>
    %95 = arith.mulf %94, %94 : vector<16x32xf32>
    %cst_68 = arith.constant dense<0.000000e+00> : vector<16xf32>
    %96 = vector.multi_reduction <add>, %95, %cst_68 [1] : vector<16x32xf32> to vector<16xf32>
    %97 = vector.shape_cast %96 : vector<16xf32> to vector<16x1xf32>
    %cst_69 = arith.constant 3.200000e+01 : f32
    %98 = vector.broadcast %cst_69 : f32 to vector<16x1xf32>
    %99 = arith.divf %97, %98 : vector<16x1xf32>
    %100 = vector.broadcast %92 : vector<16x1xf32> to vector<16x32xf32>
    %101 = arith.subf %88, %100 : vector<16x32xf32>
    %cst_70 = arith.constant 9.99999974E-6 : f32
    %102 = vector.broadcast %cst_70 : f32 to vector<16x1xf32>
    %103 = arith.addf %99, %102 : vector<16x1xf32>
    %104 = math.rsqrt %103 : vector<16x1xf32>
    %105 = vector.broadcast %104 : vector<16x1xf32> to vector<16x32xf32>
    %106 = arith.mulf %101, %105 : vector<16x32xf32>
    %107 = vector.broadcast %7 : vector<1x32xf32> to vector<16x32xf32>
    %108 = arith.mulf %106, %107 : vector<16x32xf32>
    %109 = vector.broadcast %8 : vector<1x32xf32> to vector<16x32xf32>
    %110 = arith.addf %108, %109 : vector<16x32xf32>
    %111 = arith.truncf %110 : vector<16x32xf32> to vector<16x32xbf16>
    %cst_71 = arith.constant dense<0.000000e+00> : vector<16x32xf32>
    %112 = tpu.matmul %9, %111, %cst_71 {dimension_numbers = #tpu.dot_dimension_numbers<[1], [0], [0], [1], [0, 0, 1, 1], [], []>} : vector<16x16xbf16>, vector<16x32xbf16>, vector<16x32xf32> -> vector<16x32xf32>
    %113 = arith.addf %88, %112 : vector<16x32xf32>
    %cst_72 = arith.constant dense<0.000000e+00> : vector<16xf32>
    %114 = vector.multi_reduction <add>, %113, %cst_72 [1] : vector<16x32xf32> to vector<16xf32>
    %115 = vector.shape_cast %114 : vector<16xf32> to vector<16x1xf32>
    %cst_73 = arith.constant 3.200000e+01 : f32
    %116 = vector.broadcast %cst_73 : f32 to vector<16x1xf32>
    %117 = arith.divf %115, %116 : vector<16x1xf32>
    %118 = vector.broadcast %117 : vector<16x1xf32> to vector<16x32xf32>
    %119 = arith.subf %113, %118 : vector<16x32xf32>
    %120 = arith.mulf %119, %119 : vector<16x32xf32>
    %cst_74 = arith.constant dense<0.000000e+00> : vector<16xf32>
    %121 = vector.multi_reduction <add>, %120, %cst_74 [1] : vector<16x32xf32> to vector<16xf32>
    %122 = vector.shape_cast %121 : vector<16xf32> to vector<16x1xf32>
    %cst_75 = arith.constant 3.200000e+01 : f32
    %123 = vector.broadcast %cst_75 : f32 to vector<16x1xf32>
    %124 = arith.divf %122, %123 : vector<16x1xf32>
    %125 = vector.broadcast %117 : vector<16x1xf32> to vector<16x32xf32>
    %126 = arith.subf %113, %125 : vector<16x32xf32>
    %cst_76 = arith.constant 9.99999974E-6 : f32
    %127 = vector.broadcast %cst_76 : f32 to vector<16x1xf32>
    %128 = arith.addf %124, %127 : vector<16x1xf32>
    %129 = math.rsqrt %128 : vector<16x1xf32>
    %130 = vector.broadcast %129 : vector<16x1xf32> to vector<16x32xf32>
    %131 = arith.mulf %126, %130 : vector<16x32xf32>
    %132 = vector.broadcast %10 : vector<1x32xf32> to vector<16x32xf32>
    %133 = arith.mulf %131, %132 : vector<16x32xf32>
    %134 = vector.broadcast %11 : vector<1x32xf32> to vector<16x32xf32>
    %135 = arith.addf %133, %134 : vector<16x32xf32>
    %136 = arith.truncf %135 : vector<16x32xf32> to vector<16x32xbf16>
    %cst_77 = arith.constant dense<0.000000e+00> : vector<16x32xf32>
    %137 = tpu.matmul %136, %12, %cst_77 {dimension_numbers = #tpu.dot_dimension_numbers<[1], [0], [0], [1], [0, 0, 1, 1], [], []>} : vector<16x32xbf16>, vector<32x32xbf16>, vector<16x32xf32> -> vector<16x32xf32>
    %138 = vector.broadcast %13 : vector<1x32xf32> to vector<16x32xf32>
    %139 = arith.addf %137, %138 : vector<16x32xf32>
    %cst_78 = arith.constant 5.000000e-01 : f32
    %140 = vector.broadcast %cst_78 : f32 to vector<16x32xf32>
    %141 = arith.mulf %140, %139 : vector<16x32xf32>
    %cst_79 = arith.constant 4.471500e-02 : f32
    %142 = vector.broadcast %cst_79 : f32 to vector<16x32xf32>
    %143 = arith.mulf %142, %139 : vector<16x32xf32>
    %144 = arith.mulf %143, %139 : vector<16x32xf32>
    %145 = arith.mulf %144, %139 : vector<16x32xf32>
    %146 = arith.addf %139, %145 : vector<16x32xf32>
    %cst_80 = arith.constant 0.797884583 : f32
    %147 = vector.broadcast %cst_80 : f32 to vector<16x32xf32>
    %148 = arith.mulf %147, %146 : vector<16x32xf32>
    %149 = math.tanh %148 : vector<16x32xf32>
    %cst_81 = arith.constant 1.000000e+00 : f32
    %150 = vector.broadcast %cst_81 : f32 to vector<16x32xf32>
    %151 = arith.addf %150, %149 : vector<16x32xf32>
    %152 = arith.mulf %141, %151 : vector<16x32xf32>
    %153 = arith.truncf %152 : vector<16x32xf32> to vector<16x32xbf16>
    %cst_82 = arith.constant dense<0.000000e+00> : vector<16x32xf32>
    %154 = tpu.matmul %153, %14, %cst_82 {dimension_numbers = #tpu.dot_dimension_numbers<[1], [0], [0], [1], [0, 0, 1, 1], [], []>} : vector<16x32xbf16>, vector<32x32xbf16>, vector<16x32xf32> -> vector<16x32xf32>
    %155 = arith.addf %113, %154 : vector<16x32xf32>
    %156 = vector.broadcast %15 : vector<1x32xf32> to vector<16x32xf32>
    %157 = arith.addf %155, %156 : vector<16x32xf32>
    %c0_83 = arith.constant 0 : index
    %c0_84 = arith.constant 0 : index
    %c0_85 = arith.constant 0 : index
    %158 = vector.load %arg25[%c0_83, %c0_84, %c0_85] : memref<1x16x32xf32, #tpu.memory_space<vmem>>, vector<1x16x32xf32>
    %159 = vector.shape_cast %158 : vector<1x16x32xf32> to vector<16x32xf32>
    %160 = vector.shape_cast %157 : vector<16x32xf32> to vector<1x16x32xf32>
    tpu.vector_store %arg25[%c0_83, %c0_84, %c0_85], %160 {strides = array<i32>} : memref<1x16x32xf32, #tpu.memory_space<vmem>>, vector<1x16x32xf32>,
    %cst_86 = arith.constant dense<0.000000e+00> : vector<16xf32>
    %161 = vector.multi_reduction <add>, %157, %cst_86 [1] : vector<16x32xf32> to vector<16xf32>
    %162 = vector.shape_cast %161 : vector<16xf32> to vector<16x1xf32>
    %cst_87 = arith.constant 3.200000e+01 : f32
    %163 = vector.broadcast %cst_87 : f32 to vector<16x1xf32>
    %164 = arith.divf %162, %163 : vector<16x1xf32>
    %165 = vector.broadcast %164 : vector<16x1xf32> to vector<16x32xf32>
    %166 = arith.subf %157, %165 : vector<16x32xf32>
    %167 = arith.mulf %166, %166 : vector<16x32xf32>
    %cst_88 = arith.constant dense<0.000000e+00> : vector<16xf32>
    %168 = vector.multi_reduction <add>, %167, %cst_88 [1] : vector<16x32xf32> to vector<16xf32>
    %169 = vector.shape_cast %168 : vector<16xf32> to vector<16x1xf32>
    %cst_89 = arith.constant 3.200000e+01 : f32
    %170 = vector.broadcast %cst_89 : f32 to vector<16x1xf32>
    %171 = arith.divf %169, %170 : vector<16x1xf32>
    %172 = vector.broadcast %164 : vector<16x1xf32> to vector<16x32xf32>
    %173 = arith.subf %157, %172 : vector<16x32xf32>
    %cst_90 = arith.constant 9.99999974E-6 : f32
    %174 = vector.broadcast %cst_90 : f32 to vector<16x1xf32>
    %175 = arith.addf %171, %174 : vector<16x1xf32>
    %176 = math.rsqrt %175 : vector<16x1xf32>
    %177 = vector.broadcast %176 : vector<16x1xf32> to vector<16x32xf32>
    %178 = arith.mulf %173, %177 : vector<16x32xf32>
    %179 = vector.broadcast %16 : vector<1x32xf32> to vector<16x32xf32>
    %180 = arith.mulf %178, %179 : vector<16x32xf32>
    %181 = vector.broadcast %17 : vector<1x32xf32> to vector<16x32xf32>
    %182 = arith.addf %180, %181 : vector<16x32xf32>
    %183 = arith.truncf %182 : vector<16x32xf32> to vector<16x32xbf16>
    %cst_91 = arith.constant dense<0.000000e+00> : vector<16x32xf32>
    %184 = tpu.matmul %183, %18, %cst_91 {dimension_numbers = #tpu.dot_dimension_numbers<[1], [0], [0], [1], [0, 0, 1, 1], [], []>} : vector<16x32xbf16>, vector<32x32xbf16>, vector<16x32xf32> -> vector<16x32xf32>
    %185 = arith.truncf %184 : vector<16x32xf32> to vector<16x32xbf16>
    %c0_92 = arith.constant 0 : index
    %c0_93 = arith.constant 0 : index
    %c0_94 = arith.constant 0 : index
    %186 = vector.load %arg26[%c0_92, %c0_93, %c0_94] : memref<1x16x32xbf16, #tpu.memory_space<vmem>>, vector<1x16x32xbf16>
    %187 = vector.shape_cast %186 : vector<1x16x32xbf16> to vector<16x32xbf16>
    %188 = vector.shape_cast %185 : vector<16x32xbf16> to vector<1x16x32xbf16>
    tpu.vector_store %arg26[%c0_92, %c0_93, %c0_94], %188 {strides = array<i32>} : memref<1x16x32xbf16, #tpu.memory_space<vmem>>, vector<1x16x32xbf16>,
    %189 = arith.truncf %182 : vector<16x32xf32> to vector<16x32xbf16>
    %cst_95 = arith.constant dense<0.000000e+00> : vector<16x32xf32>
    %190 = tpu.matmul %189, %19, %cst_95 {dimension_numbers = #tpu.dot_dimension_numbers<[1], [0], [0], [1], [0, 0, 1, 1], [], []>} : vector<16x32xbf16>, vector<32x32xbf16>, vector<16x32xf32> -> vector<16x32xf32>
    %191 = arith.truncf %190 : vector<16x32xf32> to vector<16x32xbf16>
    %c0_96 = arith.constant 0 : index
    %c0_97 = arith.constant 0 : index
    %c0_98 = arith.constant 0 : index
    %192 = vector.load %arg27[%c0_96, %c0_97, %c0_98] : memref<1x16x32xbf16, #tpu.memory_space<vmem>>, vector<1x16x32xbf16>
    %193 = vector.shape_cast %192 : vector<1x16x32xbf16> to vector<16x32xbf16>
    %194 = vector.shape_cast %191 : vector<16x32xbf16> to vector<1x16x32xbf16>
    tpu.vector_store %arg27[%c0_96, %c0_97, %c0_98], %194 {strides = array<i32>} : memref<1x16x32xbf16, #tpu.memory_space<vmem>>, vector<1x16x32xbf16>,
    return
  }
  func.func @transform_0(%arg0: i32) -> (i32, i32, i32) {
    %c0_i32 = arith.constant 0 : i32
    %c0_i32_0 = arith.constant 0 : i32
    %c0_i32_1 = arith.constant 0 : i32
    return %arg0, %c0_i32, %c0_i32_0 : i32, i32, i32
  }
  func.func @transform_1(%arg0: i32) -> (i32, i32, i32) {
    %c0_i32 = arith.constant 0 : i32
    %c0_i32_0 = arith.constant 0 : i32
    %c0_i32_1 = arith.constant 0 : i32
    return %arg0, %c0_i32, %c0_i32_0 : i32, i32, i32
  }
  func.func @transform_2(%arg0: i32) -> (i32, i32, i32) {
    %c0_i32 = arith.constant 0 : i32
    %c0_i32_0 = arith.constant 0 : i32
    %c0_i32_1 = arith.constant 0 : i32
    return %arg0, %c0_i32, %c0_i32_0 : i32, i32, i32
  }
  func.func @transform_3(%arg0: i32) -> (i32, i32) {
    %c0_i32 = arith.constant 0 : i32
    %c0_i32_0 = arith.constant 0 : i32
    %c0_i32_1 = arith.constant 0 : i32
    return %c0_i32, %c0_i32_0 : i32, i32
  }
  func.func @transform_4(%arg0: i32) -> (i32, i32) {
    %c0_i32 = arith.constant 0 : i32
    %c0_i32_0 = arith.constant 0 : i32
    %c0_i32_1 = arith.constant 0 : i32
    return %c0_i32, %c0_i32_0 : i32, i32
  }
  func.func @transform_5(%arg0: i32) -> (i32, i32) {
    %c0_i32 = arith.constant 0 : i32
    %c0_i32_0 = arith.constant 0 : i32
    %c0_i32_1 = arith.constant 0 : i32
    return %c0_i32, %c0_i32_0 : i32, i32
  }
  func.func @transform_6(%arg0: i32) -> (i32, i32) {
    %c0_i32 = arith.constant 0 : i32
    %c0_i32_0 = arith.constant 0 : i32
    %c0_i32_1 = arith.constant 0 : i32
    return %c0_i32, %c0_i32_0 : i32, i32
  }
  func.func @transform_7(%arg0: i32) -> (i32, i32) {
    %c0_i32 = arith.constant 0 : i32
    %c0_i32_0 = arith.constant 0 : i32
    %c0_i32_1 = arith.constant 0 : i32
    return %c0_i32, %c0_i32_0 : i32, i32
  }
  func.func @transform_8(%arg0: i32) -> (i32, i32) {
    %c0_i32 = arith.constant 0 : i32
    %c0_i32_0 = arith.constant 0 : i32
    %c0_i32_1 = arith.constant 0 : i32
    return %c0_i32, %c0_i32_0 : i32, i32
  }
  func.func @transform_9(%arg0: i32) -> (i32, i32) {
    %c0_i32 = arith.constant 0 : i32
    %c0_i32_0 = arith.constant 0 : i32
    %c0_i32_1 = arith.constant 0 : i32
    return %c0_i32, %c0_i32_0 : i32, i32
  }
  func.func @transform_10(%arg0: i32) -> (i32, i32) {
    %c0_i32 = arith.constant 0 : i32
    %c0_i32_0 = arith.constant 0 : i32
    %c0_i32_1 = arith.constant 0 : i32
    return %c0_i32, %c0_i32_0 : i32, i32
  }
  func.func @transform_11(%arg0: i32) -> (i32, i32) {
    %c0_i32 = arith.constant 0 : i32
    %c0_i32_0 = arith.constant 0 : i32
    %c0_i32_1 = arith.constant 0 : i32
    return %c0_i32, %c0_i32_0 : i32, i32
  }
  func.func @transform_12(%arg0: i32) -> (i32, i32) {
    %c0_i32 = arith.constant 0 : i32
    %c0_i32_0 = arith.constant 0 : i32
    %c0_i32_1 = arith.constant 0 : i32
    return %c0_i32, %c0_i32_0 : i32, i32
  }
  func.func @transform_13(%arg0: i32) -> (i32, i32) {
    %c0_i32 = arith.constant 0 : i32
    %c0_i32_0 = arith.constant 0 : i32
    %c0_i32_1 = arith.constant 0 : i32
    return %c0_i32, %c0_i32_0 : i32, i32
  }
  func.func @transform_14(%arg0: i32) -> (i32, i32) {
    %c0_i32 = arith.constant 0 : i32
    %c0_i32_0 = arith.constant 0 : i32
    %c0_i32_1 = arith.constant 0 : i32
    return %c0_i32, %c0_i32_0 : i32, i32
  }
  func.func @transform_15(%arg0: i32) -> (i32, i32) {
    %c0_i32 = arith.constant 0 : i32
    %c0_i32_0 = arith.constant 0 : i32
    %c0_i32_1 = arith.constant 0 : i32
    return %c0_i32, %c0_i32_0 : i32, i32
  }
  func.func @transform_16(%arg0: i32) -> (i32, i32) {
    %c0_i32 = arith.constant 0 : i32
    %c0_i32_0 = arith.constant 0 : i32
    %c0_i32_1 = arith.constant 0 : i32
    return %c0_i32, %c0_i32_0 : i32, i32
  }
  func.func @transform_17(%arg0: i32) -> (i32, i32) {
    %c0_i32 = arith.constant 0 : i32
    %c0_i32_0 = arith.constant 0 : i32
    %c0_i32_1 = arith.constant 0 : i32
    return %c0_i32, %c0_i32_0 : i32, i32
  }
  func.func @transform_18(%arg0: i32) -> (i32, i32) {
    %c0_i32 = arith.constant 0 : i32
    %c0_i32_0 = arith.constant 0 : i32
    %c0_i32_1 = arith.constant 0 : i32
    return %c0_i32, %c0_i32_0 : i32, i32
  }
  func.func @transform_19(%arg0: i32) -> (i32, i32) {
    %c0_i32 = arith.constant 0 : i32
    %c0_i32_0 = arith.constant 0 : i32
    %c0_i32_1 = arith.constant 0 : i32
    return %c0_i32, %c0_i32_0 : i32, i32
  }
  func.func @transform_20(%arg0: i32) -> (i32, i32) {
    %c0_i32 = arith.constant 0 : i32
    %c0_i32_0 = arith.constant 0 : i32
    %c0_i32_1 = arith.constant 0 : i32
    return %c0_i32, %c0_i32_0 : i32, i32
  }
  func.func @transform_21(%arg0: i32) -> (i32, i32) {
    %c0_i32 = arith.constant 0 : i32
    %c0_i32_0 = arith.constant 0 : i32
    %c0_i32_1 = arith.constant 0 : i32
    return %c0_i32, %c0_i32_0 : i32, i32
  }
  func.func @transform_22(%arg0: i32) -> (i32, i32) {
    %c0_i32 = arith.constant 0 : i32
    %c0_i32_0 = arith.constant 0 : i32
    %c0_i32_1 = arith.constant 0 : i32
    return %c0_i32, %c0_i32_0 : i32, i32
  }
  func.func @transform_23(%arg0: i32) -> (i32, i32) {
    %c0_i32 = arith.constant 0 : i32
    %c0_i32_0 = arith.constant 0 : i32
    %c0_i32_1 = arith.constant 0 : i32
    return %c0_i32, %c0_i32_0 : i32, i32
  }
  func.func @transform_24(%arg0: i32) -> (i32, i32, i32) {
    %c0_i32 = arith.constant 0 : i32
    %c0_i32_0 = arith.constant 0 : i32
    %c0_i32_1 = arith.constant 0 : i32
    return %arg0, %c0_i32, %c0_i32_0 : i32, i32, i32
  }
  func.func @transform_25(%arg0: i32) -> (i32, i32, i32) {
    %c0_i32 = arith.constant 0 : i32
    %c0_i32_0 = arith.constant 0 : i32
    %c0_i32_1 = arith.constant 0 : i32
    return %arg0, %c0_i32, %c0_i32_0 : i32, i32, i32
  }
  func.func @transform_26(%arg0: i32) -> (i32, i32, i32) {
    %c0_i32 = arith.constant 0 : i32
    %c0_i32_0 = arith.constant 0 : i32
    %c0_i32_1 = arith.constant 0 : i32
    return %arg0, %c0_i32, %c0_i32_0 : i32, i32, i32
  }
}

module attributes {stable_mosaic.version = 11 : i64} {
  func.func @_enc_attn_kernel(%arg0: i32, %arg1: i32, %arg2: memref<1x64x32xbf16, #tpu.memory_space<vmem>>, %arg3: memref<1x64x1xf32, #tpu.memory_space<vmem>>, %arg4: memref<64x32xbf16, #tpu.memory_space<vmem>>, %arg5: memref<1x8x16x4xbf16, #tpu.memory_space<vmem>>, %arg6: memref<1x8x16x4xbf16, #tpu.memory_space<vmem>>, %arg7: memref<8x32x4xbf16, #tpu.memory_space<vmem>>, %arg8: memref<8x4x32xbf16, #tpu.memory_space<vmem>>, %arg9: memref<1x32xf32, #tpu.memory_space<vmem>>, %arg10: memref<1x64x32xf32, #tpu.memory_space<vmem>>) attributes {dimension_semantics = [#tpu.dimension_semantics<parallel>, #tpu.dimension_semantics<parallel>], iteration_bounds = array<i64: 2, 1>, scalar_prefetch = 0 : i64, scratch_operands = 0 : i64, tpu.core_type = #tpu.core_type<tc>, window_params = [{transform_indices = @transform_0, window_bounds = array<i64: 1, 64, 32>}, {transform_indices = @transform_1, window_bounds = array<i64: 1, 64, 1>}, {transform_indices = @transform_2, window_bounds = array<i64: 64, 32>}, {transform_indices = @transform_3, window_bounds = array<i64: 1, 8, 16, 4>}, {transform_indices = @transform_4, window_bounds = array<i64: 1, 8, 16, 4>}, {pipeline_mode = #tpu.pipeline_mode<synchronous>, transform_indices = @transform_5, window_bounds = array<i64: 8, 32, 4>}, {pipeline_mode = #tpu.pipeline_mode<synchronous>, transform_indices = @transform_6, window_bounds = array<i64: 8, 4, 32>}, {pipeline_mode = #tpu.pipeline_mode<synchronous>, transform_indices = @transform_7, window_bounds = array<i64: 1, 32>}, {transform_indices = @transform_8, window_bounds = array<i64: 1, 64, 32>}]} {
    %c0 = arith.constant 0 : index
    %c0_0 = arith.constant 0 : index
    %c0_1 = arith.constant 0 : index
    %0 = vector.load %arg2[%c0, %c0_0, %c0_1] : memref<1x64x32xbf16, #tpu.memory_space<vmem>>, vector<1x64x32xbf16>
    %1 = vector.shape_cast %0 : vector<1x64x32xbf16> to vector<64x32xbf16>
    %c0_2 = arith.constant 0 : index
    %c0_3 = arith.constant 0 : index
    %2 = vector.load %arg4[%c0_2, %c0_3] : memref<64x32xbf16, #tpu.memory_space<vmem>>, vector<64x32xbf16>
    %3 = arith.addf %1, %2 : vector<64x32xbf16>
    %c0_4 = arith.constant 0 : index
    %c0_5 = arith.constant 0 : index
    %c0_6 = arith.constant 0 : index
    %4 = vector.load %arg3[%c0_4, %c0_5, %c0_6] : memref<1x64x1xf32, #tpu.memory_space<vmem>>, vector<1x64x1xf32>
    %5 = vector.shape_cast %4 : vector<1x64x1xf32> to vector<64x1xf32>
    %cst = arith.constant 5.000000e-01 : f32
    %6 = vector.broadcast %cst : f32 to vector<64x1xf32>
    %7 = arith.cmpf ogt, %5, %6 : vector<64x1xf32>
    %c0_7 = arith.constant 0 : index
    %c0_8 = arith.constant 0 : index
    %c0_9 = arith.constant 0 : index
    %c0_10 = arith.constant 0 : index
    %8 = vector.load %arg5[%c0_7, %c0_8, %c0_9, %c0_10] : memref<1x8x16x4xbf16, #tpu.memory_space<vmem>>, vector<1x8x16x4xbf16>
    %9 = vector.shape_cast %8 : vector<1x8x16x4xbf16> to vector<8x16x4xbf16>
    %c0_11 = arith.constant 0 : index
    %c0_12 = arith.constant 0 : index
    %c0_13 = arith.constant 0 : index
    %c0_14 = arith.constant 0 : index
    %10 = vector.load %arg6[%c0_11, %c0_12, %c0_13, %c0_14] : memref<1x8x16x4xbf16, #tpu.memory_space<vmem>>, vector<1x8x16x4xbf16>
    %11 = vector.shape_cast %10 : vector<1x8x16x4xbf16> to vector<8x16x4xbf16>
    %c0_15 = arith.constant 0 : index
    %c0_16 = arith.constant 0 : index
    %c0_17 = arith.constant 0 : index
    %12 = vector.load %arg7[%c0_15, %c0_16, %c0_17] : memref<8x32x4xbf16, #tpu.memory_space<vmem>>, vector<8x32x4xbf16>
    %c0_18 = arith.constant 0 : index
    %c0_19 = arith.constant 0 : index
    %c0_20 = arith.constant 0 : index
    %13 = vector.load %arg8[%c0_18, %c0_19, %c0_20] : memref<8x4x32xbf16, #tpu.memory_space<vmem>>, vector<8x4x32xbf16>
    %cst_21 = arith.constant 0.000000e+00 : f32
    %14 = vector.broadcast %cst_21 : f32 to vector<64x32xf32>
    %15 = vector.extract_strided_slice %12 {offsets = [0, 0, 0], sizes = [1, 32, 4], strides = [1, 1, 1]} : vector<8x32x4xbf16> to vector<1x32x4xbf16>
    %16 = vector.shape_cast %15 : vector<1x32x4xbf16> to vector<32x4xbf16>
    %cst_22 = arith.constant dense<0.000000e+00> : vector<64x4xf32>
    %17 = tpu.matmul %3, %16, %cst_22 {dimension_numbers = #tpu.dot_dimension_numbers<[1], [0], [0], [1], [0, 0, 1, 1], [], []>} : vector<64x32xbf16>, vector<32x4xbf16>, vector<64x4xf32> -> vector<64x4xf32>
    %18 = vector.extract_strided_slice %9 {offsets = [0, 0, 0], sizes = [1, 16, 4], strides = [1, 1, 1]} : vector<8x16x4xbf16> to vector<1x16x4xbf16>
    %19 = vector.shape_cast %18 : vector<1x16x4xbf16> to vector<16x4xbf16>
    %20 = arith.truncf %17 : vector<64x4xf32> to vector<64x4xbf16>
    %cst_23 = arith.constant dense<0.000000e+00> : vector<64x16xf32>
    %21 = tpu.matmul %20, %19, %cst_23 {dimension_numbers = #tpu.dot_dimension_numbers<[1], [1], [0], [0], [0, 0, 1, 0], [], []>} : vector<64x4xbf16>, vector<16x4xbf16>, vector<64x16xf32> -> vector<64x16xf32>
    %cst_24 = arith.constant 5.000000e-01 : f32
    %22 = vector.broadcast %cst_24 : f32 to vector<64x16xf32>
    %23 = arith.mulf %21, %22 : vector<64x16xf32>
    %cst_25 = arith.constant dense<0xFF800000> : vector<64xf32>
    %24 = vector.multi_reduction <maximumf>, %23, %cst_25 [1] : vector<64x16xf32> to vector<64xf32>
    %25 = vector.shape_cast %24 : vector<64xf32> to vector<64x1xf32>
    %26 = vector.broadcast %25 : vector<64x1xf32> to vector<64x16xf32>
    %27 = arith.subf %23, %26 : vector<64x16xf32>
    %28 = math.exp %27 : vector<64x16xf32>
    %cst_26 = arith.constant dense<0.000000e+00> : vector<64xf32>
    %29 = vector.multi_reduction <add>, %28, %cst_26 [1] : vector<64x16xf32> to vector<64xf32>
    %30 = vector.shape_cast %29 : vector<64xf32> to vector<64x1xf32>
    %31 = tpu.reciprocal %30 {approx = true} : vector<64x1xf32> -> vector<64x1xf32>
    %32 = vector.broadcast %31 : vector<64x1xf32> to vector<64x16xf32>
    %33 = arith.mulf %28, %32 : vector<64x16xf32>
    %34 = vector.extract_strided_slice %11 {offsets = [0, 0, 0], sizes = [1, 16, 4], strides = [1, 1, 1]} : vector<8x16x4xbf16> to vector<1x16x4xbf16>
    %35 = vector.shape_cast %34 : vector<1x16x4xbf16> to vector<16x4xbf16>
    %36 = arith.truncf %33 : vector<64x16xf32> to vector<64x16xbf16>
    %cst_27 = arith.constant dense<0.000000e+00> : vector<64x4xf32>
    %37 = tpu.matmul %36, %35, %cst_27 {dimension_numbers = #tpu.dot_dimension_numbers<[1], [0], [0], [1], [0, 0, 1, 1], [], []>} : vector<64x16xbf16>, vector<16x4xbf16>, vector<64x4xf32> -> vector<64x4xf32>
    %38 = vector.extract_strided_slice %13 {offsets = [0, 0, 0], sizes = [1, 4, 32], strides = [1, 1, 1]} : vector<8x4x32xbf16> to vector<1x4x32xbf16>
    %39 = vector.shape_cast %38 : vector<1x4x32xbf16> to vector<4x32xbf16>
    %40 = arith.truncf %37 : vector<64x4xf32> to vector<64x4xbf16>
    %cst_28 = arith.constant dense<0.000000e+00> : vector<64x32xf32>
    %41 = tpu.matmul %40, %39, %cst_28 {dimension_numbers = #tpu.dot_dimension_numbers<[1], [0], [0], [1], [0, 0, 1, 1], [], []>} : vector<64x4xbf16>, vector<4x32xbf16>, vector<64x32xf32> -> vector<64x32xf32>
    %42 = arith.addf %14, %41 : vector<64x32xf32>
    %43 = vector.extract_strided_slice %12 {offsets = [1, 0, 0], sizes = [1, 32, 4], strides = [1, 1, 1]} : vector<8x32x4xbf16> to vector<1x32x4xbf16>
    %44 = vector.shape_cast %43 : vector<1x32x4xbf16> to vector<32x4xbf16>
    %cst_29 = arith.constant dense<0.000000e+00> : vector<64x4xf32>
    %45 = tpu.matmul %3, %44, %cst_29 {dimension_numbers = #tpu.dot_dimension_numbers<[1], [0], [0], [1], [0, 0, 1, 1], [], []>} : vector<64x32xbf16>, vector<32x4xbf16>, vector<64x4xf32> -> vector<64x4xf32>
    %46 = vector.extract_strided_slice %9 {offsets = [1, 0, 0], sizes = [1, 16, 4], strides = [1, 1, 1]} : vector<8x16x4xbf16> to vector<1x16x4xbf16>
    %47 = vector.shape_cast %46 : vector<1x16x4xbf16> to vector<16x4xbf16>
    %48 = arith.truncf %45 : vector<64x4xf32> to vector<64x4xbf16>
    %cst_30 = arith.constant dense<0.000000e+00> : vector<64x16xf32>
    %49 = tpu.matmul %48, %47, %cst_30 {dimension_numbers = #tpu.dot_dimension_numbers<[1], [1], [0], [0], [0, 0, 1, 0], [], []>} : vector<64x4xbf16>, vector<16x4xbf16>, vector<64x16xf32> -> vector<64x16xf32>
    %cst_31 = arith.constant 5.000000e-01 : f32
    %50 = vector.broadcast %cst_31 : f32 to vector<64x16xf32>
    %51 = arith.mulf %49, %50 : vector<64x16xf32>
    %cst_32 = arith.constant dense<0xFF800000> : vector<64xf32>
    %52 = vector.multi_reduction <maximumf>, %51, %cst_32 [1] : vector<64x16xf32> to vector<64xf32>
    %53 = vector.shape_cast %52 : vector<64xf32> to vector<64x1xf32>
    %54 = vector.broadcast %53 : vector<64x1xf32> to vector<64x16xf32>
    %55 = arith.subf %51, %54 : vector<64x16xf32>
    %56 = math.exp %55 : vector<64x16xf32>
    %cst_33 = arith.constant dense<0.000000e+00> : vector<64xf32>
    %57 = vector.multi_reduction <add>, %56, %cst_33 [1] : vector<64x16xf32> to vector<64xf32>
    %58 = vector.shape_cast %57 : vector<64xf32> to vector<64x1xf32>
    %59 = tpu.reciprocal %58 {approx = true} : vector<64x1xf32> -> vector<64x1xf32>
    %60 = vector.broadcast %59 : vector<64x1xf32> to vector<64x16xf32>
    %61 = arith.mulf %56, %60 : vector<64x16xf32>
    %62 = vector.extract_strided_slice %11 {offsets = [1, 0, 0], sizes = [1, 16, 4], strides = [1, 1, 1]} : vector<8x16x4xbf16> to vector<1x16x4xbf16>
    %63 = vector.shape_cast %62 : vector<1x16x4xbf16> to vector<16x4xbf16>
    %64 = arith.truncf %61 : vector<64x16xf32> to vector<64x16xbf16>
    %cst_34 = arith.constant dense<0.000000e+00> : vector<64x4xf32>
    %65 = tpu.matmul %64, %63, %cst_34 {dimension_numbers = #tpu.dot_dimension_numbers<[1], [0], [0], [1], [0, 0, 1, 1], [], []>} : vector<64x16xbf16>, vector<16x4xbf16>, vector<64x4xf32> -> vector<64x4xf32>
    %66 = vector.extract_strided_slice %13 {offsets = [1, 0, 0], sizes = [1, 4, 32], strides = [1, 1, 1]} : vector<8x4x32xbf16> to vector<1x4x32xbf16>
    %67 = vector.shape_cast %66 : vector<1x4x32xbf16> to vector<4x32xbf16>
    %68 = arith.truncf %65 : vector<64x4xf32> to vector<64x4xbf16>
    %cst_35 = arith.constant dense<0.000000e+00> : vector<64x32xf32>
    %69 = tpu.matmul %68, %67, %cst_35 {dimension_numbers = #tpu.dot_dimension_numbers<[1], [0], [0], [1], [0, 0, 1, 1], [], []>} : vector<64x4xbf16>, vector<4x32xbf16>, vector<64x32xf32> -> vector<64x32xf32>
    %70 = arith.addf %42, %69 : vector<64x32xf32>
    %71 = vector.extract_strided_slice %12 {offsets = [2, 0, 0], sizes = [1, 32, 4], strides = [1, 1, 1]} : vector<8x32x4xbf16> to vector<1x32x4xbf16>
    %72 = vector.shape_cast %71 : vector<1x32x4xbf16> to vector<32x4xbf16>
    %cst_36 = arith.constant dense<0.000000e+00> : vector<64x4xf32>
    %73 = tpu.matmul %3, %72, %cst_36 {dimension_numbers = #tpu.dot_dimension_numbers<[1], [0], [0], [1], [0, 0, 1, 1], [], []>} : vector<64x32xbf16>, vector<32x4xbf16>, vector<64x4xf32> -> vector<64x4xf32>
    %74 = vector.extract_strided_slice %9 {offsets = [2, 0, 0], sizes = [1, 16, 4], strides = [1, 1, 1]} : vector<8x16x4xbf16> to vector<1x16x4xbf16>
    %75 = vector.shape_cast %74 : vector<1x16x4xbf16> to vector<16x4xbf16>
    %76 = arith.truncf %73 : vector<64x4xf32> to vector<64x4xbf16>
    %cst_37 = arith.constant dense<0.000000e+00> : vector<64x16xf32>
    %77 = tpu.matmul %76, %75, %cst_37 {dimension_numbers = #tpu.dot_dimension_numbers<[1], [1], [0], [0], [0, 0, 1, 0], [], []>} : vector<64x4xbf16>, vector<16x4xbf16>, vector<64x16xf32> -> vector<64x16xf32>
    %cst_38 = arith.constant 5.000000e-01 : f32
    %78 = vector.broadcast %cst_38 : f32 to vector<64x16xf32>
    %79 = arith.mulf %77, %78 : vector<64x16xf32>
    %cst_39 = arith.constant dense<0xFF800000> : vector<64xf32>
    %80 = vector.multi_reduction <maximumf>, %79, %cst_39 [1] : vector<64x16xf32> to vector<64xf32>
    %81 = vector.shape_cast %80 : vector<64xf32> to vector<64x1xf32>
    %82 = vector.broadcast %81 : vector<64x1xf32> to vector<64x16xf32>
    %83 = arith.subf %79, %82 : vector<64x16xf32>
    %84 = math.exp %83 : vector<64x16xf32>
    %cst_40 = arith.constant dense<0.000000e+00> : vector<64xf32>
    %85 = vector.multi_reduction <add>, %84, %cst_40 [1] : vector<64x16xf32> to vector<64xf32>
    %86 = vector.shape_cast %85 : vector<64xf32> to vector<64x1xf32>
    %87 = tpu.reciprocal %86 {approx = true} : vector<64x1xf32> -> vector<64x1xf32>
    %88 = vector.broadcast %87 : vector<64x1xf32> to vector<64x16xf32>
    %89 = arith.mulf %84, %88 : vector<64x16xf32>
    %90 = vector.extract_strided_slice %11 {offsets = [2, 0, 0], sizes = [1, 16, 4], strides = [1, 1, 1]} : vector<8x16x4xbf16> to vector<1x16x4xbf16>
    %91 = vector.shape_cast %90 : vector<1x16x4xbf16> to vector<16x4xbf16>
    %92 = arith.truncf %89 : vector<64x16xf32> to vector<64x16xbf16>
    %cst_41 = arith.constant dense<0.000000e+00> : vector<64x4xf32>
    %93 = tpu.matmul %92, %91, %cst_41 {dimension_numbers = #tpu.dot_dimension_numbers<[1], [0], [0], [1], [0, 0, 1, 1], [], []>} : vector<64x16xbf16>, vector<16x4xbf16>, vector<64x4xf32> -> vector<64x4xf32>
    %94 = vector.extract_strided_slice %13 {offsets = [2, 0, 0], sizes = [1, 4, 32], strides = [1, 1, 1]} : vector<8x4x32xbf16> to vector<1x4x32xbf16>
    %95 = vector.shape_cast %94 : vector<1x4x32xbf16> to vector<4x32xbf16>
    %96 = arith.truncf %93 : vector<64x4xf32> to vector<64x4xbf16>
    %cst_42 = arith.constant dense<0.000000e+00> : vector<64x32xf32>
    %97 = tpu.matmul %96, %95, %cst_42 {dimension_numbers = #tpu.dot_dimension_numbers<[1], [0], [0], [1], [0, 0, 1, 1], [], []>} : vector<64x4xbf16>, vector<4x32xbf16>, vector<64x32xf32> -> vector<64x32xf32>
    %98 = arith.addf %70, %97 : vector<64x32xf32>
    %99 = vector.extract_strided_slice %12 {offsets = [3, 0, 0], sizes = [1, 32, 4], strides = [1, 1, 1]} : vector<8x32x4xbf16> to vector<1x32x4xbf16>
    %100 = vector.shape_cast %99 : vector<1x32x4xbf16> to vector<32x4xbf16>
    %cst_43 = arith.constant dense<0.000000e+00> : vector<64x4xf32>
    %101 = tpu.matmul %3, %100, %cst_43 {dimension_numbers = #tpu.dot_dimension_numbers<[1], [0], [0], [1], [0, 0, 1, 1], [], []>} : vector<64x32xbf16>, vector<32x4xbf16>, vector<64x4xf32> -> vector<64x4xf32>
    %102 = vector.extract_strided_slice %9 {offsets = [3, 0, 0], sizes = [1, 16, 4], strides = [1, 1, 1]} : vector<8x16x4xbf16> to vector<1x16x4xbf16>
    %103 = vector.shape_cast %102 : vector<1x16x4xbf16> to vector<16x4xbf16>
    %104 = arith.truncf %101 : vector<64x4xf32> to vector<64x4xbf16>
    %cst_44 = arith.constant dense<0.000000e+00> : vector<64x16xf32>
    %105 = tpu.matmul %104, %103, %cst_44 {dimension_numbers = #tpu.dot_dimension_numbers<[1], [1], [0], [0], [0, 0, 1, 0], [], []>} : vector<64x4xbf16>, vector<16x4xbf16>, vector<64x16xf32> -> vector<64x16xf32>
    %cst_45 = arith.constant 5.000000e-01 : f32
    %106 = vector.broadcast %cst_45 : f32 to vector<64x16xf32>
    %107 = arith.mulf %105, %106 : vector<64x16xf32>
    %cst_46 = arith.constant dense<0xFF800000> : vector<64xf32>
    %108 = vector.multi_reduction <maximumf>, %107, %cst_46 [1] : vector<64x16xf32> to vector<64xf32>
    %109 = vector.shape_cast %108 : vector<64xf32> to vector<64x1xf32>
    %110 = vector.broadcast %109 : vector<64x1xf32> to vector<64x16xf32>
    %111 = arith.subf %107, %110 : vector<64x16xf32>
    %112 = math.exp %111 : vector<64x16xf32>
    %cst_47 = arith.constant dense<0.000000e+00> : vector<64xf32>
    %113 = vector.multi_reduction <add>, %112, %cst_47 [1] : vector<64x16xf32> to vector<64xf32>
    %114 = vector.shape_cast %113 : vector<64xf32> to vector<64x1xf32>
    %115 = tpu.reciprocal %114 {approx = true} : vector<64x1xf32> -> vector<64x1xf32>
    %116 = vector.broadcast %115 : vector<64x1xf32> to vector<64x16xf32>
    %117 = arith.mulf %112, %116 : vector<64x16xf32>
    %118 = vector.extract_strided_slice %11 {offsets = [3, 0, 0], sizes = [1, 16, 4], strides = [1, 1, 1]} : vector<8x16x4xbf16> to vector<1x16x4xbf16>
    %119 = vector.shape_cast %118 : vector<1x16x4xbf16> to vector<16x4xbf16>
    %120 = arith.truncf %117 : vector<64x16xf32> to vector<64x16xbf16>
    %cst_48 = arith.constant dense<0.000000e+00> : vector<64x4xf32>
    %121 = tpu.matmul %120, %119, %cst_48 {dimension_numbers = #tpu.dot_dimension_numbers<[1], [0], [0], [1], [0, 0, 1, 1], [], []>} : vector<64x16xbf16>, vector<16x4xbf16>, vector<64x4xf32> -> vector<64x4xf32>
    %122 = vector.extract_strided_slice %13 {offsets = [3, 0, 0], sizes = [1, 4, 32], strides = [1, 1, 1]} : vector<8x4x32xbf16> to vector<1x4x32xbf16>
    %123 = vector.shape_cast %122 : vector<1x4x32xbf16> to vector<4x32xbf16>
    %124 = arith.truncf %121 : vector<64x4xf32> to vector<64x4xbf16>
    %cst_49 = arith.constant dense<0.000000e+00> : vector<64x32xf32>
    %125 = tpu.matmul %124, %123, %cst_49 {dimension_numbers = #tpu.dot_dimension_numbers<[1], [0], [0], [1], [0, 0, 1, 1], [], []>} : vector<64x4xbf16>, vector<4x32xbf16>, vector<64x32xf32> -> vector<64x32xf32>
    %126 = arith.addf %98, %125 : vector<64x32xf32>
    %127 = vector.extract_strided_slice %12 {offsets = [4, 0, 0], sizes = [1, 32, 4], strides = [1, 1, 1]} : vector<8x32x4xbf16> to vector<1x32x4xbf16>
    %128 = vector.shape_cast %127 : vector<1x32x4xbf16> to vector<32x4xbf16>
    %cst_50 = arith.constant dense<0.000000e+00> : vector<64x4xf32>
    %129 = tpu.matmul %3, %128, %cst_50 {dimension_numbers = #tpu.dot_dimension_numbers<[1], [0], [0], [1], [0, 0, 1, 1], [], []>} : vector<64x32xbf16>, vector<32x4xbf16>, vector<64x4xf32> -> vector<64x4xf32>
    %130 = vector.extract_strided_slice %9 {offsets = [4, 0, 0], sizes = [1, 16, 4], strides = [1, 1, 1]} : vector<8x16x4xbf16> to vector<1x16x4xbf16>
    %131 = vector.shape_cast %130 : vector<1x16x4xbf16> to vector<16x4xbf16>
    %132 = arith.truncf %129 : vector<64x4xf32> to vector<64x4xbf16>
    %cst_51 = arith.constant dense<0.000000e+00> : vector<64x16xf32>
    %133 = tpu.matmul %132, %131, %cst_51 {dimension_numbers = #tpu.dot_dimension_numbers<[1], [1], [0], [0], [0, 0, 1, 0], [], []>} : vector<64x4xbf16>, vector<16x4xbf16>, vector<64x16xf32> -> vector<64x16xf32>
    %cst_52 = arith.constant 5.000000e-01 : f32
    %134 = vector.broadcast %cst_52 : f32 to vector<64x16xf32>
    %135 = arith.mulf %133, %134 : vector<64x16xf32>
    %cst_53 = arith.constant dense<0xFF800000> : vector<64xf32>
    %136 = vector.multi_reduction <maximumf>, %135, %cst_53 [1] : vector<64x16xf32> to vector<64xf32>
    %137 = vector.shape_cast %136 : vector<64xf32> to vector<64x1xf32>
    %138 = vector.broadcast %137 : vector<64x1xf32> to vector<64x16xf32>
    %139 = arith.subf %135, %138 : vector<64x16xf32>
    %140 = math.exp %139 : vector<64x16xf32>
    %cst_54 = arith.constant dense<0.000000e+00> : vector<64xf32>
    %141 = vector.multi_reduction <add>, %140, %cst_54 [1] : vector<64x16xf32> to vector<64xf32>
    %142 = vector.shape_cast %141 : vector<64xf32> to vector<64x1xf32>
    %143 = tpu.reciprocal %142 {approx = true} : vector<64x1xf32> -> vector<64x1xf32>
    %144 = vector.broadcast %143 : vector<64x1xf32> to vector<64x16xf32>
    %145 = arith.mulf %140, %144 : vector<64x16xf32>
    %146 = vector.extract_strided_slice %11 {offsets = [4, 0, 0], sizes = [1, 16, 4], strides = [1, 1, 1]} : vector<8x16x4xbf16> to vector<1x16x4xbf16>
    %147 = vector.shape_cast %146 : vector<1x16x4xbf16> to vector<16x4xbf16>
    %148 = arith.truncf %145 : vector<64x16xf32> to vector<64x16xbf16>
    %cst_55 = arith.constant dense<0.000000e+00> : vector<64x4xf32>
    %149 = tpu.matmul %148, %147, %cst_55 {dimension_numbers = #tpu.dot_dimension_numbers<[1], [0], [0], [1], [0, 0, 1, 1], [], []>} : vector<64x16xbf16>, vector<16x4xbf16>, vector<64x4xf32> -> vector<64x4xf32>
    %150 = vector.extract_strided_slice %13 {offsets = [4, 0, 0], sizes = [1, 4, 32], strides = [1, 1, 1]} : vector<8x4x32xbf16> to vector<1x4x32xbf16>
    %151 = vector.shape_cast %150 : vector<1x4x32xbf16> to vector<4x32xbf16>
    %152 = arith.truncf %149 : vector<64x4xf32> to vector<64x4xbf16>
    %cst_56 = arith.constant dense<0.000000e+00> : vector<64x32xf32>
    %153 = tpu.matmul %152, %151, %cst_56 {dimension_numbers = #tpu.dot_dimension_numbers<[1], [0], [0], [1], [0, 0, 1, 1], [], []>} : vector<64x4xbf16>, vector<4x32xbf16>, vector<64x32xf32> -> vector<64x32xf32>
    %154 = arith.addf %126, %153 : vector<64x32xf32>
    %155 = vector.extract_strided_slice %12 {offsets = [5, 0, 0], sizes = [1, 32, 4], strides = [1, 1, 1]} : vector<8x32x4xbf16> to vector<1x32x4xbf16>
    %156 = vector.shape_cast %155 : vector<1x32x4xbf16> to vector<32x4xbf16>
    %cst_57 = arith.constant dense<0.000000e+00> : vector<64x4xf32>
    %157 = tpu.matmul %3, %156, %cst_57 {dimension_numbers = #tpu.dot_dimension_numbers<[1], [0], [0], [1], [0, 0, 1, 1], [], []>} : vector<64x32xbf16>, vector<32x4xbf16>, vector<64x4xf32> -> vector<64x4xf32>
    %158 = vector.extract_strided_slice %9 {offsets = [5, 0, 0], sizes = [1, 16, 4], strides = [1, 1, 1]} : vector<8x16x4xbf16> to vector<1x16x4xbf16>
    %159 = vector.shape_cast %158 : vector<1x16x4xbf16> to vector<16x4xbf16>
    %160 = arith.truncf %157 : vector<64x4xf32> to vector<64x4xbf16>
    %cst_58 = arith.constant dense<0.000000e+00> : vector<64x16xf32>
    %161 = tpu.matmul %160, %159, %cst_58 {dimension_numbers = #tpu.dot_dimension_numbers<[1], [1], [0], [0], [0, 0, 1, 0], [], []>} : vector<64x4xbf16>, vector<16x4xbf16>, vector<64x16xf32> -> vector<64x16xf32>
    %cst_59 = arith.constant 5.000000e-01 : f32
    %162 = vector.broadcast %cst_59 : f32 to vector<64x16xf32>
    %163 = arith.mulf %161, %162 : vector<64x16xf32>
    %cst_60 = arith.constant dense<0xFF800000> : vector<64xf32>
    %164 = vector.multi_reduction <maximumf>, %163, %cst_60 [1] : vector<64x16xf32> to vector<64xf32>
    %165 = vector.shape_cast %164 : vector<64xf32> to vector<64x1xf32>
    %166 = vector.broadcast %165 : vector<64x1xf32> to vector<64x16xf32>
    %167 = arith.subf %163, %166 : vector<64x16xf32>
    %168 = math.exp %167 : vector<64x16xf32>
    %cst_61 = arith.constant dense<0.000000e+00> : vector<64xf32>
    %169 = vector.multi_reduction <add>, %168, %cst_61 [1] : vector<64x16xf32> to vector<64xf32>
    %170 = vector.shape_cast %169 : vector<64xf32> to vector<64x1xf32>
    %171 = tpu.reciprocal %170 {approx = true} : vector<64x1xf32> -> vector<64x1xf32>
    %172 = vector.broadcast %171 : vector<64x1xf32> to vector<64x16xf32>
    %173 = arith.mulf %168, %172 : vector<64x16xf32>
    %174 = vector.extract_strided_slice %11 {offsets = [5, 0, 0], sizes = [1, 16, 4], strides = [1, 1, 1]} : vector<8x16x4xbf16> to vector<1x16x4xbf16>
    %175 = vector.shape_cast %174 : vector<1x16x4xbf16> to vector<16x4xbf16>
    %176 = arith.truncf %173 : vector<64x16xf32> to vector<64x16xbf16>
    %cst_62 = arith.constant dense<0.000000e+00> : vector<64x4xf32>
    %177 = tpu.matmul %176, %175, %cst_62 {dimension_numbers = #tpu.dot_dimension_numbers<[1], [0], [0], [1], [0, 0, 1, 1], [], []>} : vector<64x16xbf16>, vector<16x4xbf16>, vector<64x4xf32> -> vector<64x4xf32>
    %178 = vector.extract_strided_slice %13 {offsets = [5, 0, 0], sizes = [1, 4, 32], strides = [1, 1, 1]} : vector<8x4x32xbf16> to vector<1x4x32xbf16>
    %179 = vector.shape_cast %178 : vector<1x4x32xbf16> to vector<4x32xbf16>
    %180 = arith.truncf %177 : vector<64x4xf32> to vector<64x4xbf16>
    %cst_63 = arith.constant dense<0.000000e+00> : vector<64x32xf32>
    %181 = tpu.matmul %180, %179, %cst_63 {dimension_numbers = #tpu.dot_dimension_numbers<[1], [0], [0], [1], [0, 0, 1, 1], [], []>} : vector<64x4xbf16>, vector<4x32xbf16>, vector<64x32xf32> -> vector<64x32xf32>
    %182 = arith.addf %154, %181 : vector<64x32xf32>
    %183 = vector.extract_strided_slice %12 {offsets = [6, 0, 0], sizes = [1, 32, 4], strides = [1, 1, 1]} : vector<8x32x4xbf16> to vector<1x32x4xbf16>
    %184 = vector.shape_cast %183 : vector<1x32x4xbf16> to vector<32x4xbf16>
    %cst_64 = arith.constant dense<0.000000e+00> : vector<64x4xf32>
    %185 = tpu.matmul %3, %184, %cst_64 {dimension_numbers = #tpu.dot_dimension_numbers<[1], [0], [0], [1], [0, 0, 1, 1], [], []>} : vector<64x32xbf16>, vector<32x4xbf16>, vector<64x4xf32> -> vector<64x4xf32>
    %186 = vector.extract_strided_slice %9 {offsets = [6, 0, 0], sizes = [1, 16, 4], strides = [1, 1, 1]} : vector<8x16x4xbf16> to vector<1x16x4xbf16>
    %187 = vector.shape_cast %186 : vector<1x16x4xbf16> to vector<16x4xbf16>
    %188 = arith.truncf %185 : vector<64x4xf32> to vector<64x4xbf16>
    %cst_65 = arith.constant dense<0.000000e+00> : vector<64x16xf32>
    %189 = tpu.matmul %188, %187, %cst_65 {dimension_numbers = #tpu.dot_dimension_numbers<[1], [1], [0], [0], [0, 0, 1, 0], [], []>} : vector<64x4xbf16>, vector<16x4xbf16>, vector<64x16xf32> -> vector<64x16xf32>
    %cst_66 = arith.constant 5.000000e-01 : f32
    %190 = vector.broadcast %cst_66 : f32 to vector<64x16xf32>
    %191 = arith.mulf %189, %190 : vector<64x16xf32>
    %cst_67 = arith.constant dense<0xFF800000> : vector<64xf32>
    %192 = vector.multi_reduction <maximumf>, %191, %cst_67 [1] : vector<64x16xf32> to vector<64xf32>
    %193 = vector.shape_cast %192 : vector<64xf32> to vector<64x1xf32>
    %194 = vector.broadcast %193 : vector<64x1xf32> to vector<64x16xf32>
    %195 = arith.subf %191, %194 : vector<64x16xf32>
    %196 = math.exp %195 : vector<64x16xf32>
    %cst_68 = arith.constant dense<0.000000e+00> : vector<64xf32>
    %197 = vector.multi_reduction <add>, %196, %cst_68 [1] : vector<64x16xf32> to vector<64xf32>
    %198 = vector.shape_cast %197 : vector<64xf32> to vector<64x1xf32>
    %199 = tpu.reciprocal %198 {approx = true} : vector<64x1xf32> -> vector<64x1xf32>
    %200 = vector.broadcast %199 : vector<64x1xf32> to vector<64x16xf32>
    %201 = arith.mulf %196, %200 : vector<64x16xf32>
    %202 = vector.extract_strided_slice %11 {offsets = [6, 0, 0], sizes = [1, 16, 4], strides = [1, 1, 1]} : vector<8x16x4xbf16> to vector<1x16x4xbf16>
    %203 = vector.shape_cast %202 : vector<1x16x4xbf16> to vector<16x4xbf16>
    %204 = arith.truncf %201 : vector<64x16xf32> to vector<64x16xbf16>
    %cst_69 = arith.constant dense<0.000000e+00> : vector<64x4xf32>
    %205 = tpu.matmul %204, %203, %cst_69 {dimension_numbers = #tpu.dot_dimension_numbers<[1], [0], [0], [1], [0, 0, 1, 1], [], []>} : vector<64x16xbf16>, vector<16x4xbf16>, vector<64x4xf32> -> vector<64x4xf32>
    %206 = vector.extract_strided_slice %13 {offsets = [6, 0, 0], sizes = [1, 4, 32], strides = [1, 1, 1]} : vector<8x4x32xbf16> to vector<1x4x32xbf16>
    %207 = vector.shape_cast %206 : vector<1x4x32xbf16> to vector<4x32xbf16>
    %208 = arith.truncf %205 : vector<64x4xf32> to vector<64x4xbf16>
    %cst_70 = arith.constant dense<0.000000e+00> : vector<64x32xf32>
    %209 = tpu.matmul %208, %207, %cst_70 {dimension_numbers = #tpu.dot_dimension_numbers<[1], [0], [0], [1], [0, 0, 1, 1], [], []>} : vector<64x4xbf16>, vector<4x32xbf16>, vector<64x32xf32> -> vector<64x32xf32>
    %210 = arith.addf %182, %209 : vector<64x32xf32>
    %211 = vector.extract_strided_slice %12 {offsets = [7, 0, 0], sizes = [1, 32, 4], strides = [1, 1, 1]} : vector<8x32x4xbf16> to vector<1x32x4xbf16>
    %212 = vector.shape_cast %211 : vector<1x32x4xbf16> to vector<32x4xbf16>
    %cst_71 = arith.constant dense<0.000000e+00> : vector<64x4xf32>
    %213 = tpu.matmul %3, %212, %cst_71 {dimension_numbers = #tpu.dot_dimension_numbers<[1], [0], [0], [1], [0, 0, 1, 1], [], []>} : vector<64x32xbf16>, vector<32x4xbf16>, vector<64x4xf32> -> vector<64x4xf32>
    %214 = vector.extract_strided_slice %9 {offsets = [7, 0, 0], sizes = [1, 16, 4], strides = [1, 1, 1]} : vector<8x16x4xbf16> to vector<1x16x4xbf16>
    %215 = vector.shape_cast %214 : vector<1x16x4xbf16> to vector<16x4xbf16>
    %216 = arith.truncf %213 : vector<64x4xf32> to vector<64x4xbf16>
    %cst_72 = arith.constant dense<0.000000e+00> : vector<64x16xf32>
    %217 = tpu.matmul %216, %215, %cst_72 {dimension_numbers = #tpu.dot_dimension_numbers<[1], [1], [0], [0], [0, 0, 1, 0], [], []>} : vector<64x4xbf16>, vector<16x4xbf16>, vector<64x16xf32> -> vector<64x16xf32>
    %cst_73 = arith.constant 5.000000e-01 : f32
    %218 = vector.broadcast %cst_73 : f32 to vector<64x16xf32>
    %219 = arith.mulf %217, %218 : vector<64x16xf32>
    %cst_74 = arith.constant dense<0xFF800000> : vector<64xf32>
    %220 = vector.multi_reduction <maximumf>, %219, %cst_74 [1] : vector<64x16xf32> to vector<64xf32>
    %221 = vector.shape_cast %220 : vector<64xf32> to vector<64x1xf32>
    %222 = vector.broadcast %221 : vector<64x1xf32> to vector<64x16xf32>
    %223 = arith.subf %219, %222 : vector<64x16xf32>
    %224 = math.exp %223 : vector<64x16xf32>
    %cst_75 = arith.constant dense<0.000000e+00> : vector<64xf32>
    %225 = vector.multi_reduction <add>, %224, %cst_75 [1] : vector<64x16xf32> to vector<64xf32>
    %226 = vector.shape_cast %225 : vector<64xf32> to vector<64x1xf32>
    %227 = tpu.reciprocal %226 {approx = true} : vector<64x1xf32> -> vector<64x1xf32>
    %228 = vector.broadcast %227 : vector<64x1xf32> to vector<64x16xf32>
    %229 = arith.mulf %224, %228 : vector<64x16xf32>
    %230 = vector.extract_strided_slice %11 {offsets = [7, 0, 0], sizes = [1, 16, 4], strides = [1, 1, 1]} : vector<8x16x4xbf16> to vector<1x16x4xbf16>
    %231 = vector.shape_cast %230 : vector<1x16x4xbf16> to vector<16x4xbf16>
    %232 = arith.truncf %229 : vector<64x16xf32> to vector<64x16xbf16>
    %cst_76 = arith.constant dense<0.000000e+00> : vector<64x4xf32>
    %233 = tpu.matmul %232, %231, %cst_76 {dimension_numbers = #tpu.dot_dimension_numbers<[1], [0], [0], [1], [0, 0, 1, 1], [], []>} : vector<64x16xbf16>, vector<16x4xbf16>, vector<64x4xf32> -> vector<64x4xf32>
    %234 = vector.extract_strided_slice %13 {offsets = [7, 0, 0], sizes = [1, 4, 32], strides = [1, 1, 1]} : vector<8x4x32xbf16> to vector<1x4x32xbf16>
    %235 = vector.shape_cast %234 : vector<1x4x32xbf16> to vector<4x32xbf16>
    %236 = arith.truncf %233 : vector<64x4xf32> to vector<64x4xbf16>
    %cst_77 = arith.constant dense<0.000000e+00> : vector<64x32xf32>
    %237 = tpu.matmul %236, %235, %cst_77 {dimension_numbers = #tpu.dot_dimension_numbers<[1], [0], [0], [1], [0, 0, 1, 1], [], []>} : vector<64x4xbf16>, vector<4x32xbf16>, vector<64x32xf32> -> vector<64x32xf32>
    %238 = arith.addf %210, %237 : vector<64x32xf32>
    %cst_78 = arith.constant 0.000000e+00 : f32
    %239 = vector.shape_cast %7 : vector<64x1xi1> to vector<64x1xi1>
    %240 = vector.broadcast %239 : vector<64x1xi1> to vector<64x32xi1>
    %241 = vector.broadcast %cst_78 : f32 to vector<64x32xf32>
    %242 = arith.select %240, %241, %238 : vector<64x32xi1>, vector<64x32xf32>
    %c0_79 = arith.constant 0 : index
    %c0_80 = arith.constant 0 : index
    %243 = vector.load %arg9[%c0_79, %c0_80] : memref<1x32xf32, #tpu.memory_space<vmem>>, vector<1x32xf32>
    %244 = vector.broadcast %243 : vector<1x32xf32> to vector<64x32xf32>
    %245 = arith.addf %242, %244 : vector<64x32xf32>
    %c0_81 = arith.constant 0 : index
    %c0_82 = arith.constant 0 : index
    %c0_83 = arith.constant 0 : index
    %246 = vector.load %arg10[%c0_81, %c0_82, %c0_83] : memref<1x64x32xf32, #tpu.memory_space<vmem>>, vector<1x64x32xf32>
    %247 = vector.shape_cast %246 : vector<1x64x32xf32> to vector<64x32xf32>
    %248 = vector.shape_cast %245 : vector<64x32xf32> to vector<1x64x32xf32>
    tpu.vector_store %arg10[%c0_81, %c0_82, %c0_83], %248 {strides = array<i32>} : memref<1x64x32xf32, #tpu.memory_space<vmem>>, vector<1x64x32xf32>,
    return
  }
  func.func @transform_0(%arg0: i32, %arg1: i32) -> (i32, i32, i32) {
    %c0_i32 = arith.constant 0 : i32
    %c0_i32_0 = arith.constant 0 : i32
    return %arg0, %arg1, %c0_i32 : i32, i32, i32
  }
  func.func @transform_1(%arg0: i32, %arg1: i32) -> (i32, i32, i32) {
    %c0_i32 = arith.constant 0 : i32
    %c0_i32_0 = arith.constant 0 : i32
    return %arg0, %arg1, %c0_i32 : i32, i32, i32
  }
  func.func @transform_2(%arg0: i32, %arg1: i32) -> (i32, i32) {
    %c0_i32 = arith.constant 0 : i32
    %c0_i32_0 = arith.constant 0 : i32
    return %arg1, %c0_i32 : i32, i32
  }
  func.func @transform_3(%arg0: i32, %arg1: i32) -> (i32, i32, i32, i32) {
    %c0_i32 = arith.constant 0 : i32
    %c0_i32_0 = arith.constant 0 : i32
    %c0_i32_1 = arith.constant 0 : i32
    %c0_i32_2 = arith.constant 0 : i32
    return %arg0, %c0_i32, %c0_i32_0, %c0_i32_1 : i32, i32, i32, i32
  }
  func.func @transform_4(%arg0: i32, %arg1: i32) -> (i32, i32, i32, i32) {
    %c0_i32 = arith.constant 0 : i32
    %c0_i32_0 = arith.constant 0 : i32
    %c0_i32_1 = arith.constant 0 : i32
    %c0_i32_2 = arith.constant 0 : i32
    return %arg0, %c0_i32, %c0_i32_0, %c0_i32_1 : i32, i32, i32, i32
  }
  func.func @transform_5(%arg0: i32, %arg1: i32) -> (i32, i32, i32) {
    %c0_i32 = arith.constant 0 : i32
    %c0_i32_0 = arith.constant 0 : i32
    %c0_i32_1 = arith.constant 0 : i32
    %c0_i32_2 = arith.constant 0 : i32
    return %c0_i32, %c0_i32_0, %c0_i32_1 : i32, i32, i32
  }
  func.func @transform_6(%arg0: i32, %arg1: i32) -> (i32, i32, i32) {
    %c0_i32 = arith.constant 0 : i32
    %c0_i32_0 = arith.constant 0 : i32
    %c0_i32_1 = arith.constant 0 : i32
    %c0_i32_2 = arith.constant 0 : i32
    return %c0_i32, %c0_i32_0, %c0_i32_1 : i32, i32, i32
  }
  func.func @transform_7(%arg0: i32, %arg1: i32) -> (i32, i32) {
    %c0_i32 = arith.constant 0 : i32
    %c0_i32_0 = arith.constant 0 : i32
    %c0_i32_1 = arith.constant 0 : i32
    return %c0_i32, %c0_i32_0 : i32, i32
  }
  func.func @transform_8(%arg0: i32, %arg1: i32) -> (i32, i32, i32) {
    %c0_i32 = arith.constant 0 : i32
    %c0_i32_0 = arith.constant 0 : i32
    return %arg0, %arg1, %c0_i32 : i32, i32, i32
  }
}

</mosaic_0001>

<bundles_post_ra>
// kernel: global_attn_pallas.2
= control target key start
LH: loop header
LB: loop body
LE: loop exit
PB: predicated region body
PF: predicated region fallthrough
CT: control target
= control target key end

     0   :  { %s2509_s0 = inlined_call_operand.vmem [shape: bf16[2,64,32], index: 0, kind: input, shape index: {}]   ;;  %s2510_s1 = inlined_call_operand.vmem [shape: f32[2,1,64], index: 1, kind: input, shape index: {}]   ;;  %s2511_s2 = inlined_call_operand.vmem [shape: bf16[2,16,32], index: 2, kind: input, shape index: {}]   ;;  %s2512_s3 = inlined_call_operand.vmem [shape: bf16[16,32], index: 3, kind: input, shape index: {}]   ;;  %s2513_s4 = inlined_call_operand.vmem [shape: f32[1,32], index: 4, kind: input, shape index: {}]   ;;  %s2514_s5 = inlined_call_operand.vmem [shape: f32[1,32], index: 5, kind: input, shape index: {}]   ;;  %s2515_s6 = inlined_call_operand.vmem [shape: bf16[32,32], index: 6, kind: input, shape index: {}]   ;;  %s2516_s7 = inlined_call_operand.vmem [shape: bf16[32,32], index: 7, kind: input, shape index: {}]   ;;  %s2517_s8 = inlined_call_operand.vmem [shape: bf16[32,32], index: 8, kind: input, shape index: {}]   ;;  %s2518_s9 = inlined_call_operand.vmem [shape: bf16[32,32], index: 9, kind: input, shape index: {}]   ;;  %s2519_s10 = inlined_call_operand.vmem [shape: f32[1,32], index: 10, kind: input, shape index: {}]   ;;  %s2520_s11 = inlined_call_operand.vmem [shape: f32[1,32], index: 11, kind: input, shape index: {}]   ;;  %s2521_s12 = inlined_call_operand.vmem [shape: f32[1,32], index: 12, kind: input, shape index: {}]   ;;  %s2522_s13 = inlined_call_operand.vmem [shape: bf16[16,16], index: 13, kind: input, shape index: {}]   ;;  %s2523_s14 = inlined_call_operand.vmem [shape: f32[1,32], index: 14, kind: input, shape index: {}]   ;;  %s2524_s15 = inlined_call_operand.vmem [shape: f32[1,32], index: 15, kind: input, shape index: {}]   ;;  %s2525_s16 = inlined_call_operand.vmem [shape: bf16[32,32], index: 16, kind: input, shape index: {}]   ;;  %s2526_s17 = inlined_call_operand.vmem [shape: f32[1,32], index: 17, kind: input, shape index: {}]   ;;  %s2527_s18 = inlined_call_operand.vmem [shape: bf16[32,32], index: 18, kind: input, shape index: {}]   ;;  %s2528_s19 = inlined_call_operand.vmem [shape: f32[1,32], index: 19, kind: input, shape index: {}]   ;;  %s2529_s20 = inlined_call_operand.vmem [shape: f32[1,32], index: 20, kind: input, shape index: {}]   ;;  %s2530_s21 = inlined_call_operand.vmem [shape: f32[1,32], index: 21, kind: input, shape index: {}]   ;;  %s2531_s22 = inlined_call_operand.vmem [shape: bf16[32,32], index: 22, kind: input, shape index: {}]   ;;  %s2532_s23 = inlined_call_operand.vmem [shape: bf16[32,32], index: 23, kind: input, shape index: {}]   ;;  %s2533_s24 = inlined_call_operand.hbm [shape: f32[2,16,32], index: 24, kind: output, shape index: {0}]   ;;  %s2534_s25 = inlined_call_operand.vmem [shape: bf16[2,16,32], index: 25, kind: output, shape index: {1}]   ;;  %s2535_s26 = inlined_call_operand.vmem [shape: bf16[2,16,32], index: 26, kind: output, shape index: {2}]  }
   0x1   :  { %2549 = sst [smem:[#allocation10_spill]] %s2509_s0 }
   0x2   :  { %2550 = sst [smem:[#allocation11_spill]] %s2510_s1 }
   0x3   :  { %2551 = sst [smem:[#allocation12_spill]] %s2511_s2 }
   0x4   :  { %2552 = sst [smem:[#allocation13_spill]] %s2512_s3 }
   0x5   :  { %2553 = sst [smem:[#allocation14_spill]] %s2513_s4 }
   0x6   :  { %2554 = sst [smem:[#allocation15_spill]] %s2514_s5 }
   0x7   :  { %2555 = sst [smem:[#allocation16_spill]] %s2515_s6 }
   0x8   :  { %2556 = sst [smem:[#allocation17_spill]] %s2516_s7 }
   0x9   :  { %2557 = sst [smem:[#allocation18_spill]] %s2517_s8 }
   0xa   :  { %2558 = sst [smem:[#allocation19_spill]] %s2518_s9 }
   0xb   :  { %2559 = sst [smem:[#allocation20_spill]] %s2519_s10 }
   0xc   :  { %2560 = sst [smem:[#allocation21_spill]] %s2520_s11 }
   0xd   :  { %2561 = sst [smem:[#allocation22_spill]] %s2521_s12 }
   0xe   :  { %2562 = sst [smem:[#allocation23_spill]] %s2522_s13 }
   0xf   :  { %2563 = sst [smem:[#allocation24_spill]] %s2523_s14 }
  0x10   :  { %2564 = sst [smem:[#allocation25_spill]] %s2524_s15 }
  0x11   :  { %32 = vsyncpa [#allocation3], 0 }
  0x12   :  { %34 = vsyncpa [#allocation3 + $0x1], 0  ;;  %s2192_s27 = smov 0   ;;  %s2194_s3 = smov 0  }
  0x13   :  { %s2196_s7 = smov 0   ;;  %s2198_s28 = smov 0  }
  0x14 LB: > { %2565 = sst [smem:[#allocation5_spill]] %s2039_s27  ;;  %s2213_s8 = sadd.s32 4294967295, %s2051_s28   ;;  %s2051_s28 = sphi %s2198_s28, %s2593_s28   ;;  %s2047_s7 = sphi %s2196_s7, %s2595_s7   ;;  %s2043_s3 = sphi %s2194_s3, %s2597_s3   ;;  %s2039_s27 = sphi %s2192_s27, %s2596_s27  }
  0x15   : > { %2566 = sst [smem:[#allocation6_spill]] %s2047_s7  ;;  %s1752_s4 = sadd.s32 4294967294, %s2051_s28  }
  0x16   : > { %s2217_s29 = sadd.s32 1, %s2051_s28   ;;  %s566_s0 = sadd.s32 1, %s2047_s7 }
  0x17   : > { %2567 = sst [smem:[#allocation7_spill]] %s2217_s29  ;;  %s563_s9 = ssub.s32 %s2051_s28, %s2217_s29 }
  0x18   : > { %p576_p0 = scmp.ne.s32.totalorder %s2047_s7, %s2043_s3  ;;  %p564_p1 = scmp.eq.s32.totalorder %s563_s9, 0 }
  0x19   : > { %p577_p2 = scmp.eq.s32.totalorder %s2213_s8, 1  ;;  %p582_p3 = scmp.ne.s32.totalorder %s2043_s3, %s2039_s27 }
  0x1a   : > { %p583_p4 = scmp.eq.s32.totalorder %s1752_s4, 1  ;;  %p1755_p7 = scmp.ge.s32.totalorder %s2051_s28, 1 }
  0x1b   : > { %s2228_s30 = scalar_select %p564_p1, %s2047_s7, %s566_s0  }
  0x1c   : > { %p2230_p5 = por %p577_p2, %p576_p0  ;;  %p2234_p6 = por %p583_p4, %p582_p3 }
  0x1d   : > { %2568 = sst [smem:[#allocation8_spill]] %s2228_s30  ;;  %p738_p8 = scmp.lt.s32.totalorder %s2051_s28, 3 }
  0x1e   : > { %s2570_s5 = scalar_select %p2234_p6, 1, 0 }
  0x1f   : > { %p739_p9 = pnand %p1755_p7, %p738_p8 }
  0x20   : > { %2571 = sst [smem:[#allocation9_spill]] %s2570_s5  ;;  %p826_p10 = scmp.lt.s32.totalorder (!%p739_p9), %s2213_s8, 1 }
  0x21   : > { %742 = sbr.rel (%p739_p9) target bundleno = 2531 (0x9e3), region = 116  ;;  %s2572_s1 = sld [smem:[#allocation17_spill]] (!%p739_p9) }
  0x22   : > { %s2573_s7 = sld [smem:[#allocation12_spill]] (!%p739_p9) }
  0x23   : > { %s2574_s27 = sld [smem:[#allocation10_spill]] (!%p739_p9) }
  0x24   : > { %s2575_s9 = sld [smem:[#allocation16_spill]] (!%p739_p9) }
  0x25   : > { %s2585_s11 = sld [smem:[#allocation21_spill]] (!%p739_p9) }
  0x26   : > { %s2245_s4 = scalar_select %p826_p10, %s2213_s8, 1  ;;  %vm909_vm0 = vcmask 261120   ;;  %v2053_v8 = vmov 32.0   ;;  %vm1162_vm10 = vcmask 523264  }
  0x27   : > { %v1878_v0 = vld [vmem:[%s2572_s1 + $0x8] sm:$0xff]  ;;  %v1877_v6 = vld [vmem:[%s2572_s1] sm:$0xff]  ;;  %1959 = vrcp.f32 %v2053_v8  ;;  %s2586_s12 = sld [smem:[#allocation22_spill]]  ;;  %s1896_s1 = sshll.u32 %s2213_s8, 4 }
  0x28   : > { %1057 = vmatpush.bf16.msra.mxu1 %v1878_v0  ;;  %s2248_s0 = sshll.u32 %s2245_s4, 3  ;;  %s1871_s10 = sshll.u32 %s2245_s4, 5 }
  0x29   : > { %s838_s29 = scalar_lea.vmem %s2573_s7, %s2248_s0  ;;  %s830_s30 = scalar_lea.vmem %s2574_s27, %s1871_s10 }
  0x2a   : > { %v1898_v1 = vld [vmem:[%s838_s29] sm:$0xff]   ;;  %v2273_v11 = vld [vmem:[%s830_s30 + $0x8] sm:$0xff]  ;;  %v2279_v17 = vld [vmem:[%s830_s30 + $0x10] sm:$0xff]  ;;  %s2576_s29 = sld [smem:[#allocation14_spill]]  ;;  %s2009_s8 = scalar_lea.hbm %s2533_s24, 32 }
  0x2b   : > { %v2254_v2 = vunpack.c.l.bf16 %v1898_v1  ;;  %v2258_v4 = vunpack.c.h.bf16 %v1898_v1  ;;  %v2269_v7 = vld [vmem:[%s830_s30] sm:$0xff]  ;;  %v2289_v27 = vld [vmem:[%s830_s30 + $0x18] sm:$0xff]  ;;  %v1876_v33 = vld [vmem:[%s2575_s9 + $0x8] sm:$0xff]  ;;  %s2577_s10 = sld [smem:[#allocation15_spill]] }
  0x2c   : > { %1058 = vmatpush.bf16.msra.mxu1 %v1877_v6  ;;  %999 = vmatpush.bf16.msra.mxu0 %v1876_v33  ;;  %v1875_v36 = vld [vmem:[%s2575_s9] sm:$0xff]  ;;  %s2578_s9 = sld [smem:[#allocation13_spill]] }
  0x2d   : > { %v910_v3 = vsel %vm909_vm0, %v2254_v2, 0.0  ;;  %v913_v5 = vsel %vm909_vm0, %v2258_v4, 0.0  ;;  %v1960_v9 = vpop.eup %1959  ;;  %s2579_s30 = sld [smem:[#allocation18_spill]] }
  0x2e   : > { %911 = vadd.xlane.f32.xlu0 %v910_v3  ;;  %v917_v10 = vmul.f32 32.0, %v1960_v9  ;;  %vm921_vm1 = vweird.f32 %v1960_v9  ;;  %s2587_s13 = sld [smem:[#allocation23_spill]] }
  0x2f   : > { %1798 = vmatmul.msk.bf16.vlgmr.msra.gmra.mxu1 %vm909_vm0, %v2269_v7  ;;  %s2588_s14 = sld [smem:[#allocation24_spill]] }
  0x30   : > { %v918_v12 = vsub.f32 1.0, %v917_v10  ;;  %1000 = vmatpush.bf16.msra.mxu0 %v1875_v36  ;;  %v1948_v56 = vld [vmem:[%s2576_s29] ss:$0 sm:$0xff]  ;;  %s2589_s15 = sld [smem:[#allocation25_spill]]  ;;  %s2547_s29 = sand.u32 1, %s2043_s3  }
  0x31   : > { %v1949_v60 = vld [vmem:[%s2577_s10] ss:$0 sm:$0xff]  ;;  %s2580_s10 = sld [smem:[#allocation11_spill]]  ;;  %s1756_s27 = sshll.u32 %s2547_s29, 4 }
  0x32   : > { %v919_v13 = vmul.f32 %v1960_v9, %v918_v12  ;;  %v1902_v61 = vld [vmem:[%s2578_s9] sm:$0xff]   ;;  %s2583_s9 = sld [smem:[#allocation19_spill]]  ;;  %s1609_s29 = scalar_lea.hbm %s2533_s24, %s1896_s1 }
  0x33   : > { %v1903_v3 = vunpack.c.l.bf16 %v1902_v61  ;;  %v1904_v8 = vunpack.c.h.bf16 %v1902_v61  ;;  %s1612_s5 = sshll.u32 %s1609_s29, 4  ;;  %s1613_s5 = int_to_ptr.hbm [resolvable:$true] %s1612_s5 }
  0x34   : > { %v920_v14 = vadd.f32 %v1960_v9, %v919_v13 }
  0x36   : > { %914 = vadd.xlane.f32.xlu0 %v913_v5  ;;  %v2277_v15 = vsel %vm921_vm1, %v1960_v9, %v920_v14 }
  0x37   : > { %s833_s6 = scalar_lea.vmem %s2580_s10, %s2245_s4  ;;  %s2584_s10 = sld [smem:[#allocation20_spill]] }
  0x3f   : > { %1799 = vmatmul.msk.bf16.gmra.mxu1 %vm909_vm0, %v2273_v11 }
  0x4f   : > { %1800 = vmatmul.msk.bf16.gmra.mxu1 %vm909_vm0, %v2279_v17 }
  0x5f   : > { %1801 = vmatmul.msk.bf16.gmra.mxu1 %vm909_vm0, %v2289_v27 }
  0xa1   : > { %v912_v16 = vpop.xlane.xlu0 %911 }
  0xa2   : > { %v923_v18 = vmul.f32 %v2277_v15, %v912_v16 }
  0xa4   : > { %v925_v19 = vsub.f32 %v2254_v2, %v923_v18 }
  0xa6   : > { %v927_v20 = vmul.f32 %v925_v19, %v925_v19 }
  0xa8   : > { %v929_v21 = vsel %vm909_vm0, %v927_v20, 0.0 }
  0xa9   : > { %930 = vadd.xlane.f32.xlu1 %v929_v21  ;;  %v915_v22 = vpop.xlane.xlu0 %914 }
  0xaa   : > { %v924_v23 = vmul.f32 %v2277_v15, %v915_v22  ;;  %v1880_v22 = vld [vmem:[%s2579_s30 + $0x8] sm:$0xff] }
  0xab   : > { %1098 = vmatpush.bf16.msra.mxu2 %v1880_v22 }
  0xac   : > { %v926_v24 = vsub.f32 %v2258_v4, %v924_v23  ;;  %v2293_v28 = vpop.f32.mrf.mxu1  ;;  %v1879_v23 = vld [vmem:[%s2579_s30] sm:$0xff] }
  0xae   : > { %v928_v25 = vmul.f32 %v926_v24, %v926_v24 }
  0xaf   : > { %1099 = vmatpush.bf16.msra.mxu2 %v1879_v23 }
  0xb0   : > { %v932_v26 = vsel %vm909_vm0, %v928_v25, 0.0 }
  0xb1   : > { %933 = vadd.xlane.f32.xlu1 %v932_v26 }
  0xb2   : > { %1810 = vmatmul.msk.bf16.vlgmr.msra.gmra.mxu2 %vm909_vm0, %v2269_v7  ;;  %v2054_v7 = vmov 0  }
  0xb4   : > { %v2295_v29 = vpop.f32.mrf.mxu1 }
  0xb5   : > { %v1122_v32 = vpack.c.bf16 %v2295_v29, %v2293_v28  ;;  %v907_v28 = vld [vmem:[%s833_s6] sm:$0x1]  ;;  %s2432_s6 = scalar_lea.vmem [#allocation2], %s1756_s27 }
  0xb6   : > { %vm908_vm8 = vcmp.gt.f32.partialorder %v907_v28, 0.5  ;;  %s1610_s4 = sshll.u32 %s2432_s6, 4  ;;  %s1611_s4 = int_to_ptr.vmem [resolvable:$true] %s1610_s4 }
  0xb7   : > { %v1130_v21 = vsel %vm909_vm0, %v1122_v32, 0  ;;  %v1157_v29 = vsel %vm908_vm8, 1, %v2054_v7 }
  0xbc   : > { %v1065_v30 = vpop.f32.mrf.mxu1 }
  0xc2   : > { %1811 = vmatmul.msk.bf16.gmra.mxu2 %vm909_vm0, %v2273_v11 }
  0xc4   : > { %v1067_v31 = vpop.f32.mrf.mxu1 }
  0xcc   : > { %v1070_v38 = vpop.f32.mrf.mxu1 }
  0xd2   : > { %1812 = vmatmul.msk.bf16.gmra.mxu2 %vm909_vm0, %v2279_v17 }
  0xd4   : > { %v1072_v45 = vpop.f32.mrf.mxu1 }
  0xd5   : > { %v1124_v12 = vpack.c.bf16 %v1072_v45, %v1070_v38 }
  0xd7   : > { %v1136_v18 = vsel %vm909_vm0, %v1124_v12, 0 }
  0xdc   : > { %v1075_v53 = vpop.f32.mrf.mxu1 }
  0xe2   : > { %1813 = vmatmul.msk.bf16.gmra.mxu2 %vm909_vm0, %v2289_v27 }
  0xe4   : > { %v1077_v63 = vpop.f32.mrf.mxu1 }
  0xe5   : > { %v1125_v1 = vpack.c.bf16 %v1077_v63, %v1075_v53 }
  0xe7   : > { %v1139_v9 = vsel %vm909_vm0, %v1125_v1, 0 }
  0xe8   : > { %1145 = vmatpush.bf16.xpose.msra.mxu3 %v1139_v9 }
  0xf0   : > { %1146 = vmatpush.bf16.xpose.msra.mxu3 %v1136_v18 }
 0x11c   : > { %v931_v34 = vpop.xlane.xlu1 %930 }
 0x11d   : > { %v935_v35 = vmul.f32 %v931_v34, %v2277_v15 }
 0x11f   : > { %v937_v37 = vadd.f32 1e-05, %v935_v35 }
 0x121   : > { %1961 = vrsqrt.f32 %v937_v37  ;;  %vm945_vm3 = vweird.f32 %v937_v37 }
 0x124   : > { %v934_v39 = vpop.xlane.xlu1 %933 }
 0x125   : > { %v936_v40 = vmul.f32 %v934_v39, %v2277_v15 }
 0x127   : > { %v1962_v41 = vpop.eup %1961  ;;  %v938_v42 = vadd.f32 1e-05, %v936_v40 }
 0x128   : > { %v940_v43 = vmul.f32 %v1962_v41, %v937_v37  ;;  %vm946_vm2 = vweird.f32 %v1962_v41 }
 0x129   : > { %1963 = vrsqrt.f32 %v938_v42  ;;  %vm947_vm4 = vmor %vm945_vm3, %vm946_vm2  ;;  %vm955_vm6 = vweird.f32 %v938_v42  ;;  %vm1304_vm2 = vcmask 130048  }
 0x12a   : > { %v941_v44 = vmul.f32 %v1962_v41, %v940_v43 }
 0x12c   : > { %v942_v46 = vmul.f32 0.5, %v941_v44 }
 0x12e   : > { %v943_v47 = vsub.f32 1.5, %v942_v46 }
 0x12f   : > { %v1964_v48 = vpop.eup %1963 }
 0x130   : > { %v944_v49 = vmul.f32 %v1962_v41, %v943_v47  ;;  %v950_v50 = vmul.f32 %v1964_v48, %v938_v42  ;;  %vm956_vm5 = vweird.f32 %v1964_v48 }
 0x131   : > { %vm957_vm7 = vmor %vm955_vm6, %vm956_vm5 }
 0x132   : > { %v948_v51 = vsel %vm947_vm4, %v1962_v41, %v944_v49  ;;  %v951_v52 = vmul.f32 %v1964_v48, %v950_v50 }
 0x133   : > { %v959_v55 = vmul.f32 %v948_v51, %v925_v19  ;;  %v1123_v19 = vpack.c.bf16 %v1067_v31, %v1065_v30  ;;  %v1158_v30 = vperm.slane %v1157_v29, 0 }
 0x134   : > { %v952_v54 = vmul.f32 0.5, %v951_v52 }
 0x135   : > { %v964_v59 = vmul.f32 %v1948_v56, %v959_v55  ;;  %v1133_v20 = vsel %vm909_vm0, %v1123_v19, 0  ;;  %vm2340_vm9 = vcmp.eq.s32.totalorder %v1158_v30, 1  ;;  %v1101_v37 = vpop.f32.mrf.mxu2 }
 0x136   : > { %v953_v57 = vsub.f32 1.5, %v952_v54  ;;  %1147 = vmatpush.bf16.xpose.msra.mxu3 %v1133_v20 }
 0x137   : > { %v969_v6 = vadd.f32 %v1949_v60, %v964_v59 }
 0x138   : > { %v954_v58 = vmul.f32 %v1964_v48, %v953_v57 }
 0x139   : > { %v975_v13 = vadd.f32 %v1903_v3, %v969_v6  ;;  %v1882_v6 = vld [vmem:[%s2583_s9 + $0x8] sm:$0xff] }
 0x13a   : > { %v958_v62 = vsel %vm957_vm7, %v1964_v48, %v954_v58 }
 0x13b   : > { %v960_v0 = vmul.f32 %v958_v62, %v926_v24 }
 0x13d   : > { %v965_v5 = vmul.f32 %v1948_v56, %v960_v0  ;;  %v1103_v38 = vpop.f32.mrf.mxu2 }
 0x13e   : > { %1148 = vmatpush.bf16.xpose.msra.mxu3 %v1130_v21  ;;  %v1188_v58 = vpack.c.bf16 %v1103_v38, %v1101_v37 }
 0x13f   : > { %v970_v10 = vadd.f32 %v1949_v60, %v965_v5 }
 0x141   : > { %v976_v14 = vadd.f32 %v1904_v8, %v970_v10  ;;  %v1881_v8 = vld [vmem:[%s2583_s9] sm:$0xff] }
 0x143   : > { %v977_v16 = vpack.c.bf16 %v976_v14, %v975_v13  ;;  %v1950_v13 = vld [vmem:[%s2584_s10] ss:$0 sm:$0xff]  ;;  %s2590_s10 = sand.u32 1, %s2043_s3  }
 0x144   : > { %s1588_s9 = scalar_lea.sflag [#allocation3], %s2590_s10 }
 0x145   : > { %1773 = vmatmul.msk.bf16.vlgmr.msra.gmra.mxu0 %vm909_vm0, %v977_v16  ;;  %v1106_v39 = vpop.f32.mrf.mxu2 }
 0x14d   : > { %v1108_v40 = vpop.f32.mrf.mxu2 }
 0x14e   : > { %v1189_v57 = vpack.c.bf16 %v1108_v40, %v1106_v39 }
 0x155   : > { %v1111_v44 = vpop.f32.mrf.mxu2 }
 0x15d   : > { %v1113_v50 = vpop.f32.mrf.mxu2 }
 0x15e   : > { %v1190_v56 = vpack.c.bf16 %v1113_v50, %v1111_v44 }
 0x165   : > { %v1116_v53 = vpop.f32.mrf.mxu2 }
 0x16d   : > { %v1118_v54 = vpop.f32.mrf.mxu2 }
 0x16e   : > { %v1191_v55 = vpack.c.bf16 %v1118_v54, %v1116_v53  ;;  %v1952_v53 = vld [vmem:[%s2586_s12] ss:$0 sm:$0xff] }
 0x170   : > { %1199 = vmatpush.bf16.msrb.mxu0 %v1191_v55 }
 0x174   : > { %1200 = vmatpush.bf16.msrb.mxu0 %v1190_v56 }
 0x178   : > { %1201 = vmatpush.bf16.msrb.mxu0 %v1189_v57 }
 0x17c   : > { %1202 = vmatpush.bf16.msrb.mxu0 %v1188_v58  ;;  %v1883_v58 = vld [vmem:[%s2587_s13] sm:$0xff] }
 0x180   : > { %1234 = vmatpush.bf16.msra.mxu0 %v1882_v6 }
 0x184   : > { %1235 = vmatpush.bf16.msra.mxu0 %v1881_v8 }
 0x1c2   : > { %v1002_v24 = vpop.f32.mrf.mxu0 }
 0x1ca   : > { %v1004_v25 = vpop.f32.mrf.mxu0 }
 0x1cb   : > { %v1121_v26 = vpack.c.bf16 %v1004_v25, %v1002_v24 }
 0x1cd   : > { %1814 = vmatmul.msk.bf16.vlgmr.msra.gmra.mxu3 %vm909_vm0, %v1121_v26 }
 0x250   : > { %v1150_v11 = vpop.f32.mrf.mxu3 }
 0x251   : > { %v1155_v32 = vmul.f32 0.17677669, %v1150_v11 }
 0x253   : > { %v1160_v17 = vsel %vm2340_vm9, -1e+30, %v1155_v32 }
 0x254   : > { %v1163_v27 = vsel %vm1162_vm10, %v1160_v17, -inf }
 0x255   : > { %1164 = vmax.xlane.f32.xlu2 %v1163_v27 }
 0x258   : > { %v1152_v33 = vpop.f32.mrf.mxu3 }
 0x259   : > { %v1156_v34 = vmul.f32 0.17677669, %v1152_v33 }
 0x25b   : > { %v1161_v35 = vsel %vm2340_vm9, -1e+30, %v1156_v34 }
 0x25c   : > { %v1166_v36 = vsel %vm1162_vm10, %v1161_v35, -inf }
 0x25d   : > { %1167 = vmax.xlane.f32.xlu2 %v1166_v36 }
 0x2c8   : > { %v1165_v41 = vpop.xlane.xlu2 %1164 }
 0x2c9   : > { %v1169_v42 = vsub.f32 %v1160_v17, %v1165_v41 }
 0x2cb   : > { %v1171_v43 = vmul.f32 1.442695, %v1169_v42 }
 0x2cd   : > { %1965 = vpow2.f32 %v1171_v43 }
 0x2d0   : > { %v1168_v45 = vpop.xlane.xlu2 %1167 }
 0x2d1   : > { %v1170_v46 = vsub.f32 %v1161_v35, %v1168_v45 }
 0x2d3   : > { %v1966_v47 = vpop.eup %1965  ;;  %v1173_v48 = vmul.f32 1.442695, %v1170_v46 }
 0x2d4   : > { %v1175_v49 = vsel %vm1162_vm10, %v1966_v47, 0.0 }
 0x2d5   : > { %1967 = vpow2.f32 %v1173_v48  ;;  %1176 = vadd.xlane.f32.xlu0 %v1175_v49  ;;  %v1951_v48 = vld [vmem:[%s2585_s11] ss:$0 sm:$0xff]  ;;  %s2003_s11 = sshra.s32 %s1613_s5, 4  ;;  %s2004_s11 = int_to_ptr.hbm [resolvable:$true] %s2003_s11 }
 0x2d6   : > { %s2005_s12 = scalar_lea.hbm %s2004_s11, 16  ;;  %p2010_p0 = scmp.lt.s32.totalorder %s2004_s11, %s2533_s24 }
 0x2d7   : > { %p2006_p11 = scmp.ne.s32.totalorder %s2004_s11, %s2005_s12  ;;  %p2011_p1 = scmp.lt.s32.totalorder %s2009_s8, %s2005_s12 }
 0x2d9   : > { %p2007_p12 = pnand %p2006_p11, %p2230_p5  ;;  %p2012_p2 = por %p2011_p1, %p2010_p0 }
 0x2db   : > { %v1968_v51 = vpop.eup %1967  ;;  %p2008_p13 = pneg %p2007_p12 }
 0x2dc   : > { %v1178_v52 = vsel %vm1162_vm10, %v1968_v51, 0.0 }
 0x2dd   : > { %1179 = vadd.xlane.f32.xlu1 %v1178_v52  ;;  %p2013_p3 = pnand %p2012_p2, %p2008_p13 }
 0x348   : > { %v1177_v59 = vpop.xlane.xlu0 %1176 }
 0x349   : > { %1969 = vrcp.f32 %v1177_v59 }
 0x34f   : > { %v1970_v61 = vpop.eup %1969 }
 0x350   : > { %v1180_v60 = vpop.xlane.xlu1 %1179  ;;  %v1183_v62 = vmul.f32 %v1970_v61, %v1966_v47 }
 0x351   : > { %1971 = vrcp.f32 %v1180_v60 }
 0x352   : > { %v1185_v1 = vsel %vm2340_vm9, 0.0, %v1183_v62 }
 0x357   : > { %v1972_v63 = vpop.eup %1971 }
 0x358   : > { %v1184_v0 = vmul.f32 %v1972_v63, %v1968_v51 }
 0x35a   : > { %v1186_v3 = vsel %vm2340_vm9, 0.0, %v1184_v0 }
 0x35b   : > { %v1187_v5 = vpack.c.bf16 %v1186_v3, %v1185_v1 }
 0x35d   : > { %1815 = vmatmul.msk.bf16.vlgmr.msrb.gmra.mxu0 %vm1162_vm10, %v1187_v5 }
 0x3da   : > { %v1204_v9 = vpop.f32.mrf.mxu0 }
 0x3e2   : > { %v1206_v10 = vpop.f32.mrf.mxu0 }
 0x3e3   : > { %v1209_v12 = vpack.c.bf16 %v1206_v10, %v1204_v9 }
 0x3e5   : > { %1824 = vmatmul.msk.bf16.vlgmr.msra.gmra.mxu0 %vm909_vm0, %v1209_v12 }
 0x462   : > { %v1237_v14 = vpop.f32.mrf.mxu0 }
 0x463   : > { %v1238_v16 = vadd.f32 %v1950_v13, %v1237_v14 }
 0x465   : > { %v1242_v18 = vadd.f32 %v2254_v2, %v1238_v16  ;;  %v1885_v16 = vld [vmem:[%s2525_s16 + $0x8] sm:$0xff] }
 0x466   : > { %1403 = vmatpush.bf16.msrb.mxu0 %v1885_v16 }
 0x467   : > { %v1244_v19 = vsel %vm909_vm0, %v1242_v18, 0.0 }
 0x468   : > { %1245 = vadd.xlane.f32.xlu2 %v1244_v19 }
 0x46a   : > { %v1239_v20 = vpop.f32.mrf.mxu0 }
 0x46b   : > { %v1240_v21 = vadd.f32 %v1950_v13, %v1239_v20  ;;  %v1884_v20 = vld [vmem:[%s2525_s16] sm:$0xff] }
 0x46c   : > { %1404 = vmatpush.bf16.msrb.mxu0 %v1884_v20 }
 0x46d   : > { %v1243_v22 = vadd.f32 %v2258_v4, %v1240_v21 }
 0x46f   : > { %v1247_v23 = vsel %vm909_vm0, %v1243_v22, 0.0 }
 0x470   : > { %1248 = vadd.xlane.f32.xlu0 %v1247_v23 }
 0x4db   : > { %v1246_v24 = vpop.xlane.xlu2 %1245 }
 0x4dc   : > { %v1250_v25 = vmul.f32 %v1246_v24, %v2277_v15 }
 0x4de   : > { %v1252_v26 = vsub.f32 %v1242_v18, %v1250_v25 }
 0x4e0   : > { %v1254_v28 = vmul.f32 %v1252_v26, %v1252_v26 }
 0x4e2   : > { %v1256_v7 = vsel %vm909_vm0, %v1254_v28, 0.0 }
 0x4e3   : > { %v1249_v29 = vpop.xlane.xlu0 %1248  ;;  %1257 = vadd.xlane.f32.xlu1 %v1256_v7 }
 0x4e4   : > { %v1251_v2 = vmul.f32 %v1249_v29, %v2277_v15 }
 0x4e6   : > { %v1253_v30 = vsub.f32 %v1243_v22, %v1251_v2 }
 0x4e8   : > { %v1255_v11 = vmul.f32 %v1253_v30, %v1253_v30 }
 0x4ea   : > { %v1259_v31 = vsel %vm909_vm0, %v1255_v11, 0.0 }
 0x4eb   : > { %1260 = vadd.xlane.f32.xlu2 %v1259_v31 }
 0x556   : > { %v1258_v4 = vpop.xlane.xlu1 %1257 }
 0x557   : > { %v1262_v32 = vmul.f32 %v1258_v4, %v2277_v15 }
 0x559   : > { %v1264_v17 = vadd.f32 1e-05, %v1262_v32 }
 0x55b   : > { %1973 = vrsqrt.f32 %v1264_v17  ;;  %vm1272_vm12 = vweird.f32 %v1264_v17 }
 0x55e   : > { %v1261_v27 = vpop.xlane.xlu2 %1260 }
 0x55f   : > { %v1263_v33 = vmul.f32 %v1261_v27, %v2277_v15  ;;  %v1953_v27 = vld [vmem:[%s2588_s14] ss:$0 sm:$0xff] }
 0x561   : > { %v1974_v34 = vpop.eup %1973  ;;  %v1265_v35 = vadd.f32 1e-05, %v1263_v33 }
 0x562   : > { %v1267_v36 = vmul.f32 %v1974_v34, %v1264_v17  ;;  %vm1273_vm11 = vweird.f32 %v1974_v34 }
 0x563   : > { %1975 = vrsqrt.f32 %v1265_v35  ;;  %vm1274_vm13 = vmor %vm1272_vm12, %vm1273_vm11  ;;  %vm1282_vm15 = vweird.f32 %v1265_v35 }
 0x564   : > { %v1268_v37 = vmul.f32 %v1974_v34, %v1267_v36  ;;  %v1954_v36 = vld [vmem:[%s2589_s15] ss:$0 sm:$0xff] }
 0x566   : > { %v1269_v38 = vmul.f32 0.5, %v1268_v37 }
 0x568   : > { %v1270_v39 = vsub.f32 1.5, %v1269_v38 }
 0x569   : > { %v1976_v40 = vpop.eup %1975 }
 0x56a   : > { %v1271_v41 = vmul.f32 %v1974_v34, %v1270_v39  ;;  %v1277_v42 = vmul.f32 %v1976_v40, %v1265_v35  ;;  %vm1283_vm14 = vweird.f32 %v1976_v40 }
 0x56b   : > { %vm1284_vm1 = vmor %vm1282_vm15, %vm1283_vm14 }
 0x56c   : > { %v1278_v43 = vmul.f32 %v1976_v40, %v1277_v42  ;;  %v1275_v45 = vsel %vm1274_vm13, %v1974_v34, %v1271_v41 }
 0x56d   : > { %v1286_v47 = vmul.f32 %v1275_v45, %v1252_v26  ;;  %v1955_v45 = vld [vmem:[%s2526_s17] ss:$0 sm:$0xff] }
 0x56e   : > { %v1279_v44 = vmul.f32 0.5, %v1278_v43  ;;  %v1887_v43 = vld [vmem:[%s2527_s18 + $0x8] sm:$0xff] }
 0x56f   : > { %v1291_v52 = vmul.f32 %v1951_v48, %v1286_v47 }
 0x570   : > { %v1280_v46 = vsub.f32 1.5, %v1279_v44  ;;  %v1886_v44 = vld [vmem:[%s2527_s18] sm:$0xff] }
 0x571   : > { %v1296_v55 = vadd.f32 %v1952_v53, %v1291_v52 }
 0x572   : > { %v1281_v49 = vmul.f32 %v1976_v40, %v1280_v46 }
 0x574   : > { %v1285_v50 = vsel %vm1284_vm1, %v1976_v40, %v1281_v49 }
 0x575   : > { %v1287_v51 = vmul.f32 %v1285_v50, %v1253_v30 }
 0x577   : > { %v1292_v54 = vmul.f32 %v1951_v48, %v1287_v51 }
 0x579   : > { %v1297_v56 = vadd.f32 %v1952_v53, %v1292_v54 }
 0x57b   : > { %v1298_v57 = vpack.c.bf16 %v1297_v56, %v1296_v55 }
 0x57d   : > { %1315 = vmatpush.bf16.msrb.mxu3 %v1298_v57 }
 0x580   : > { %1829 = vmatmul.msk.bf16.vlgmr.msrb.gmra.mxu3 %vm1304_vm2, %v1883_v58 }
 0x581   : > { %1451 = vmatpush.bf16.msra.mxu3 %v1887_v43 }
 0x585   : > { %1452 = vmatpush.bf16.msra.mxu3 %v1886_v44 }
 0x603   : > { %v1317_v59 = vpop.f32.mrf.mxu3 }
 0x604   : > { %v2386_v60 = vadd.f32 %v1317_v59, %v1242_v18 }
 0x606   : > { %v1324_v61 = vsel %vm909_vm0, %v2386_v60, 0.0 }
 0x607   : > { %1325 = vadd.xlane.f32.xlu0 %v1324_v61 }
 0x60b   : > { %v1319_v62 = vpop.f32.mrf.mxu3 }
 0x60c   : > { %v2390_v63 = vadd.f32 %v1319_v62, %v1243_v22 }
 0x60e   : > { %v1327_v0 = vsel %vm909_vm0, %v2390_v63, 0.0 }
 0x60f   : > { %1328 = vadd.xlane.f32.xlu1 %v1327_v0 }
 0x67a   : > { %v1326_v1 = vpop.xlane.xlu0 %1325 }
 0x67b   : > { %v1330_v3 = vmul.f32 %v1326_v1, %v2277_v15 }
 0x67d   : > { %v1332_v5 = vsub.f32 %v2386_v60, %v1330_v3 }
 0x67f   : > { %v1334_v6 = vmul.f32 %v1332_v5, %v1332_v5 }
 0x681   : > { %v1336_v8 = vsel %vm909_vm0, %v1334_v6, 0.0 }
 0x682   : > { %1337 = vadd.xlane.f32.xlu2 %v1336_v8  ;;  %v1329_v9 = vpop.xlane.xlu1 %1328 }
 0x683   : > { %v1331_v10 = vmul.f32 %v1329_v9, %v2277_v15 }
 0x685   : > { %v1333_v12 = vsub.f32 %v2390_v63, %v1331_v10  ;;  %v1956_v10 = vld [vmem:[%s2528_s19] ss:$0 sm:$0xff] }
 0x687   : > { %v1335_v13 = vmul.f32 %v1333_v12, %v1333_v12 }
 0x689   : > { %v1339_v14 = vsel %vm909_vm0, %v1335_v13, 0.0 }
 0x68a   : > { %1340 = vadd.xlane.f32.xlu0 %v1339_v14 }
 0x6f5   : > { %v1338_v18 = vpop.xlane.xlu2 %1337 }
 0x6f6   : > { %v1342_v19 = vmul.f32 %v1338_v18, %v2277_v15 }
 0x6f8   : > { %v1344_v21 = vadd.f32 1e-05, %v1342_v19 }
 0x6fa   : > { %1977 = vrsqrt.f32 %v1344_v21  ;;  %vm1352_vm4 = vweird.f32 %v1344_v21 }
 0x6fd   : > { %v1341_v22 = vpop.xlane.xlu0 %1340 }
 0x6fe   : > { %v1343_v23 = vmul.f32 %v1341_v22, %v2277_v15 }
 0x700   : > { %v1978_v24 = vpop.eup %1977  ;;  %v1345_v25 = vadd.f32 1e-05, %v1343_v23 }
 0x701   : > { %v1347_v26 = vmul.f32 %v1978_v24, %v1344_v21  ;;  %vm1353_vm3 = vweird.f32 %v1978_v24 }
 0x702   : > { %1979 = vrsqrt.f32 %v1345_v25  ;;  %vm1354_vm5 = vmor %vm1352_vm4, %vm1353_vm3  ;;  %vm1362_vm7 = vweird.f32 %v1345_v25 }
 0x703   : > { %v1348_v28 = vmul.f32 %v1978_v24, %v1347_v26 }
 0x705   : > { %v1349_v7 = vmul.f32 0.5, %v1348_v28 }
 0x707   : > { %v1350_v29 = vsub.f32 1.5, %v1349_v7 }
 0x708   : > { %v1980_v2 = vpop.eup %1979 }
 0x709   : > { %v1351_v30 = vmul.f32 %v1978_v24, %v1350_v29  ;;  %v1357_v11 = vmul.f32 %v1980_v2, %v1345_v25  ;;  %vm1363_vm6 = vweird.f32 %v1980_v2 }
 0x70a   : > { %vm1364_vm8 = vmor %vm1362_vm7, %vm1363_vm6 }
 0x70b   : > { %v1358_v31 = vmul.f32 %v1980_v2, %v1357_v11  ;;  %v1355_v4 = vsel %vm1354_vm5, %v1978_v24, %v1351_v30  ;;  %v1889_v30 = vld [vmem:[%s2531_s22 + $0x8] sm:$0xff] }
 0x70c   : > { %v1366_v33 = vmul.f32 %v1355_v4, %v1332_v5  ;;  %1544 = vmatpush.bf16.msra.mxu0 %v1889_v30  ;;  %v1890_v4 = vld [vmem:[%s2532_s23] sm:$0xff] }
 0x70d   : > { %v1359_v32 = vmul.f32 0.5, %v1358_v31 }
 0x70e   : > { %v1371_v37 = vmul.f32 %v1953_v27, %v1366_v33 }
 0x70f   : > { %v1360_v17 = vsub.f32 1.5, %v1359_v32  ;;  %v1888_v32 = vld [vmem:[%s2531_s22] sm:$0xff] }
 0x710   : > { %v1376_v40 = vadd.f32 %v1954_v36, %v1371_v37  ;;  %1545 = vmatpush.bf16.msra.mxu0 %v1888_v32 }
 0x711   : > { %v1361_v34 = vmul.f32 %v1980_v2, %v1360_v17 }
 0x713   : > { %v1365_v35 = vsel %vm1364_vm8, %v1980_v2, %v1361_v34 }
 0x714   : > { %v1367_v38 = vmul.f32 %v1365_v35, %v1333_v12 }
 0x716   : > { %v1372_v39 = vmul.f32 %v1953_v27, %v1367_v38 }
 0x718   : > { %v1377_v41 = vadd.f32 %v1954_v36, %v1372_v39 }
 0x71a   : > { %v1378_v42 = vpack.c.bf16 %v1377_v41, %v1376_v40 }
 0x71c   : > { %1838 = vmatmul.msk.bf16.vlgmr.msrb.gmra.mxu0 %vm909_vm0, %v1378_v42 }
 0x799   : > { %v1406_v46 = vpop.f32.mrf.mxu0 }
 0x79a   : > { %v1407_v47 = vadd.f32 %v1955_v45, %v1406_v46 }
 0x79c   : > { %v1413_v48 = vmul.f32 0.044715, %v1407_v47  ;;  %v1411_v1 = vmul.f32 0.5, %v1407_v47 }
 0x79e   : > { %v1415_v49 = vmul.f32 %v1413_v48, %v1407_v47 }
 0x7a0   : > { %v1417_v50 = vmul.f32 %v1415_v49, %v1407_v47 }
 0x7a1   : > { %v1408_v51 = vpop.f32.mrf.mxu0 }
 0x7a2   : > { %v1419_v52 = vadd.f32 %v1417_v50, %v1407_v47  ;;  %v1409_v53 = vadd.f32 %v1955_v45, %v1408_v51  ;;  %v1958_v50 = vld [vmem:[%s2530_s21] ss:$0 sm:$0xff] }
 0x7a4   : > { %v1414_v54 = vmul.f32 0.044715, %v1409_v53  ;;  %v1421_v55 = vmul.f32 0.7978846, %v1419_v52  ;;  %v1412_v3 = vmul.f32 0.5, %v1409_v53 }
 0x7a6   : > { %v1416_v56 = vmul.f32 %v1414_v54, %v1409_v53  ;;  %1981 = vtanh.f32 %v1421_v55 }
 0x7a8   : > { %v1418_v57 = vmul.f32 %v1416_v56, %v1409_v53 }
 0x7aa   : > { %v1420_v58 = vadd.f32 %v1418_v57, %v1409_v53 }
 0x7ac   : > { %v1422_v59 = vmul.f32 0.7978846, %v1420_v58  ;;  %v1982_v61 = vpop.eup %1981 }
 0x7ad   : > { %v1425_v62 = vadd.f32 1.0, %v1982_v61 }
 0x7ae   : > { %1983 = vtanh.f32 %v1422_v59 }
 0x7af   : > { %v1427_v6 = vmul.f32 %v1425_v62, %v1411_v1 }
 0x7b4   : > { %v1984_v0 = vpop.eup %1983 }
 0x7b5   : > { %v1426_v5 = vadd.f32 1.0, %v1984_v0 }
 0x7b7   : > { %v1428_v8 = vmul.f32 %v1426_v5, %v1412_v3 }
 0x7b9   : > { %v1429_v9 = vpack.c.bf16 %v1428_v8, %v1427_v6 }
 0x7bb   : > { %1847 = vmatmul.msk.bf16.vlgmr.msra.gmra.mxu3 %vm909_vm0, %v1429_v9 }
 0x83e   : > { %v1454_v12 = vpop.f32.mrf.mxu3 }
 0x83f   : > { %v1459_v13 = vadd.f32 %v1454_v12, %v2386_v60  ;;  %v1891_v60 = vld [vmem:[%s2532_s23 + $0x8] sm:$0xff] }
 0x840   : > { %1575 = vmatpush.bf16.msrb.mxu1 %v1891_v60 }
 0x841   : > { %v1464_v14 = vadd.f32 %v1956_v10, %v1459_v13 }
 0x843   : > { %1466 = vst.msk [vmem:[%s2432_s6] sm:$0xff] %vm909_vm0, %v1464_v14  ;;  %v1468_v16 = vsel %vm909_vm0, %v1464_v14, 0.0 }
 0x844   : > { %1469 = vadd.xlane.f32.xlu1 %v1468_v16  ;;  %1576 = vmatpush.bf16.msrb.mxu1 %v1890_v4 }
 0x846   : > { %v1456_v18 = vpop.f32.mrf.mxu3 }
 0x847   : > { %v1460_v19 = vadd.f32 %v1456_v18, %v2390_v63 }
 0x849   : > { %v1465_v20 = vadd.f32 %v1956_v10, %v1460_v19 }
 0x84b   : > { %1467 = vst.msk [vmem:[%s2432_s6 + $0x8] sm:$0xff] %vm909_vm0, %v1465_v20  ;;  %v1471_v21 = vsel %vm909_vm0, %v1465_v20, 0.0 }
 0x84c   : > { %1472 = vadd.xlane.f32.xlu2 %v1471_v21 }
 0x8b7   : > { %v1470_v22 = vpop.xlane.xlu1 %1469 }
 0x8b8   : > { %v1474_v23 = vmul.f32 %v1470_v22, %v2277_v15 }
 0x8ba   : > { %v1476_v24 = vsub.f32 %v1464_v14, %v1474_v23 }
 0x8bc   : > { %v1478_v25 = vmul.f32 %v1476_v24, %v1476_v24 }
 0x8be   : > { %v1480_v26 = vsel %vm909_vm0, %v1478_v25, 0.0 }
 0x8bf   : > { %1481 = vadd.xlane.f32.xlu0 %v1480_v26  ;;  %v1473_v63 = vpop.xlane.xlu2 %1472 }
 0x8c0   : > { %v1475_v28 = vmul.f32 %v1473_v63, %v2277_v15 }
 0x8c2   : > { %v1477_v7 = vsub.f32 %v1465_v20, %v1475_v28 }
 0x8c4   : > { %v1479_v29 = vmul.f32 %v1477_v7, %v1477_v7 }
 0x8c6   : > { %v1483_v2 = vsel %vm909_vm0, %v1479_v29, 0.0 }
 0x8c7   : > { %1484 = vadd.xlane.f32.xlu1 %v1483_v2 }
 0x932   : > { %v1482_v11 = vpop.xlane.xlu0 %1481 }
 0x933   : > { %v1486_v31 = vmul.f32 %v1482_v11, %v2277_v15 }
 0x935   : > { %v1488_v17 = vadd.f32 1e-05, %v1486_v31 }
 0x937   : > { %1985 = vrsqrt.f32 %v1488_v17  ;;  %vm1496_vm10 = vweird.f32 %v1488_v17 }
 0x93a   : > { %v1485_v27 = vpop.xlane.xlu1 %1484 }
 0x93b   : > { %v1487_v33 = vmul.f32 %v1485_v27, %v2277_v15  ;;  %v1957_v15 = vld [vmem:[%s2529_s20] ss:$0 sm:$0xff] }
 0x93d   : > { %v1986_v34 = vpop.eup %1985  ;;  %v1489_v35 = vadd.f32 1e-05, %v1487_v33 }
 0x93e   : > { %v1491_v36 = vmul.f32 %v1986_v34, %v1488_v17  ;;  %vm1497_vm9 = vweird.f32 %v1986_v34 }
 0x93f   : > { %1987 = vrsqrt.f32 %v1489_v35  ;;  %vm1498_vm11 = vmor %vm1496_vm10, %vm1497_vm9  ;;  %vm1506_vm13 = vweird.f32 %v1489_v35 }
 0x940   : > { %v1492_v37 = vmul.f32 %v1986_v34, %v1491_v36 }
 0x942   : > { %v1493_v38 = vmul.f32 0.5, %v1492_v37 }
 0x944   : > { %v1494_v39 = vsub.f32 1.5, %v1493_v38 }
 0x945   : > { %v1988_v40 = vpop.eup %1987 }
 0x946   : > { %v1495_v41 = vmul.f32 %v1986_v34, %v1494_v39  ;;  %v1501_v42 = vmul.f32 %v1988_v40, %v1489_v35  ;;  %vm1507_vm12 = vweird.f32 %v1988_v40 }
 0x947   : > { %vm1508_vm14 = vmor %vm1506_vm13, %vm1507_vm12 }
 0x948   : > { %v1502_v43 = vmul.f32 %v1988_v40, %v1501_v42  ;;  %v1499_v44 = vsel %vm1498_vm11, %v1986_v34, %v1495_v41 }
 0x949   : > { %v1510_v47 = vmul.f32 %v1499_v44, %v1476_v24 }
 0x94a   : > { %v1503_v45 = vmul.f32 0.5, %v1502_v43 }
 0x94b   : > { %v1515_v51 = vmul.f32 %v1957_v15, %v1510_v47 }
 0x94c   : > { %v1504_v46 = vsub.f32 1.5, %v1503_v45 }
 0x94d   : > { %v1520_v54 = vadd.f32 %v1958_v50, %v1515_v51 }
 0x94e   : > { %v1505_v48 = vmul.f32 %v1988_v40, %v1504_v46 }
 0x950   : > { %v1509_v49 = vsel %vm1508_vm14, %v1988_v40, %v1505_v48 }
 0x951   : > { %v1511_v52 = vmul.f32 %v1509_v49, %v1477_v7 }
 0x953   : > { %v1516_v53 = vmul.f32 %v1957_v15, %v1511_v52 }
 0x955   : > { %v1521_v55 = vadd.f32 %v1958_v50, %v1516_v53 }
 0x957   : > { %v1522_v56 = vpack.c.bf16 %v1521_v55, %v1520_v54 }
 0x959   : > { %1856 = vmatmul.msk.bf16.vlgmr.msra.gmra.mxu0 %vm909_vm0, %v1522_v56  ;;  %1865 = vmatmul.msk.bf16.vlgmr.msrb.gmra.mxu1 %vm909_vm0, %v1522_v56 }
 0x95a   : > { %2016 = shalt.err (!%p2013_p3)
}
 0x95b   : > { %s2055_s29 = smov 128   ;;  %s2056_s1 = smov 8   ;;  %vm1554_vm0 = vcmask 257024  }
 0x95c   : > { %1905 = dma.vmem_to_hbm [thread:$0]  (%p2230_p5), %s1611_s4, 256, %s1613_s5, %s1588_s9, %s2055_s29, %s2055_s29, %s2056_s1  }
 0x95d   : > { %s843_s13 = scalar_lea.vmem %s2534_s25, %s2248_s0  ;;  %s848_s14 = scalar_lea.vmem %s2535_s26, %s2248_s0 }
 0x9d6   : > { %v1547_v57 = vpop.f32.mrf.mxu0  ;;  %v1578_v58 = vpop.f32.mrf.mxu1 }
 0x9d7   : > { %v1552_v59 = vpack.c.bf16 %v1547_v57, %v1547_v57  ;;  %v1583_v61 = vpack.c.bf16 %v1578_v58, %v1578_v58 }
 0x9d9   : > { %1555 = vst.msk [vmem:[%s843_s13] sm:$0xf] %vm1554_vm0, %v1552_v59 }
 0x9da   : > { %1585 = vst.msk [vmem:[%s848_s14] sm:$0xf] %vm1554_vm0, %v1583_v61 }
 0x9de   : > { %v1549_v62 = vpop.f32.mrf.mxu0  ;;  %v1580_v0 = vpop.f32.mrf.mxu1 }
 0x9df   : > { %v1553_v1 = vpack.c.bf16 %v1549_v62, %v1549_v62  ;;  %v1584_v3 = vpack.c.bf16 %v1580_v0, %v1580_v0 }
 0x9e1   : > { %1556 = vst.msk [vmem:[%s843_s13 + $0x4] sm:$0xf] %vm1554_vm0, %v1553_v1 }
 0x9e2   : > { %1586 = vst.msk [vmem:[%s848_s14 + $0x4] sm:$0xf] %vm1554_vm0, %v1584_v3 }
 0x9e3 PF: > { %s2591_s15 = sld [smem:[#allocation5_spill]]  ;;  %p1911_p4 = scmp.ge.s32.totalorder %s2051_s28, 2 }
 0x9e5   : > { %p1908_p5 = pnand %p1911_p4, %p2234_p6 }
 0x9e7   : > { %p1909_p7 = pneg %p1908_p5 }
 0x9e9   : > { %s1633_s9 = sand.u32 1, %s2591_s15  }
 0x9ea   : > { %s1634_s4 = scalar_lea.sflag [#allocation3], %s1633_s9 }
 0x9eb   : > { %2034 = dma.done.wait (%p1909_p7), %s1634_s4, 256  }
 0x9ec   : > { %2036 = vsyncadd (%p1909_p7), %s1634_s4, 4294967040  ;;  %s2593_s28 = sld [smem:[#allocation7_spill]]  ;;  %s2596_s27 = smov %s2043_s3 }
 0x9ed   : > { %s2594_s0 = sld [smem:[#allocation6_spill]] }
 0x9ee   : > { %s2595_s7 = sld [smem:[#allocation8_spill]] }
 0x9f2   : > { %p37_p8 = scmp.ge.s32.totalorder %s2593_s28, 4  }
 0x9f3   : > { %s2597_s3 = smov %s2594_s0 }
 0x9f4   :  { %39 = sbr.rel (!%p37_p8) target bundleno = 20 (0x14), region = 181 }
 0x9f9   :  { %1656 = vsyncpa [#allocation3], 1 }
 0x9fa   :  { %1658 = vsyncpa [#allocation3 + $0x1], 1 }

// kernel: global_attn_pallas.3
= control target key start
LH: loop header
LB: loop body
LE: loop exit
PB: predicated region body
PF: predicated region fallthrough
CT: control target
= control target key end

     0   :  { %s3868_s27 = smov 0   ;;  %s3870_s28 = smov 0   ;;  %s4945_s0 = inlined_call_operand.vmem [shape: bf16[2,64,32], index: 0, kind: input, shape index: {}]   ;;  %s4946_s1 = inlined_call_operand.vmem [shape: f32[2,64,1], index: 1, kind: input, shape index: {}]   ;;  %s4947_s2 = inlined_call_operand.vmem [shape: bf16[64,32], index: 2, kind: input, shape index: {}]   ;;  %s4948_s3 = inlined_call_operand.vmem [shape: bf16[2,8,16,4], index: 3, kind: input, shape index: {}]   ;;  %s4949_s4 = inlined_call_operand.vmem [shape: bf16[2,8,16,4], index: 4, kind: input, shape index: {}]   ;;  %s4950_s5 = inlined_call_operand.vmem [shape: bf16[8,32,4], index: 5, kind: input, shape index: {}]   ;;  %s4951_s6 = inlined_call_operand.vmem [shape: bf16[8,4,32], index: 6, kind: input, shape index: {}]   ;;  %s4952_s7 = inlined_call_operand.vmem [shape: f32[1,32], index: 7, kind: input, shape index: {}]   ;;  %s4953_s8 = inlined_call_operand.vmem [shape: f32[2,64,32], index: 8, kind: output, shape index: {}]  }
   0x1   :  { %s3872_s29 = smov 0  }
   0x2 LB: > { %s30_s30 = sadd.s32 1, %s3816_s28  ;;  %p3169_p0 = scmp.ge.s32.totalorder %s3820_s29, 1  ;;  %s3820_s29 = sphi %s3872_s29, %s18_s29   ;;  %s3816_s28 = sphi %s3870_s28, %s4955_s28   ;;  %s3812_s27 = sphi %s3868_s27, %s4954_s27  }
   0x3   : > { %p32_p1 = scmp.ge.s32.totalorder %s30_s30, 2  ;;  %p331_p2 = scmp.lt.s32.totalorder %s3820_s29, 3 }
   0x5   : > { %s4957_s30 = smov (%p32_p1, %s30_s30), 0  ;;  %p332_p3 = pnand %p3169_p0, %p331_p2 }
   0x6   : > { %p398_p4 = scmp.lt.s32.totalorder (!%p332_p3), %s3812_s27, 1 }
   0x7   : > { %335 = sbr.rel (%p332_p3) target bundleno = 2374 (0x946), region = 52 }
   0xc   : > { %v3460_v0 = vld [vmem:[%s4950_s5 + $0x8] sm:$0xff]  ;;  %v3459_v1 = vld [vmem:[%s4950_s5] sm:$0xff]  ;;  %s4959_s27 = smov (!%p398_p4, %s3812_s27), 1  ;;  %vm588_vm0 = vcmask 261120   ;;  %v3511_v21 = vld [vmem:[%s4947_s2 + $0x10] sm:$0xff]   ;;  %vm639_vm1 = vcmask 31744  }
   0xd   : > { %607 = vmatpush.bf16.msra.mxu0 %v3460_v0  ;;  %v3492_v2 = vld [vmem:[%s4947_s2] sm:$0xff]   ;;  %s3438_s15 = sshll.u32 %s4959_s27, 5  ;;  %v3510_v12 = vld [vmem:[%s4947_s2 + $0x8] sm:$0xff]   ;;  %v3501_v24 = vunpack.c.l.bf16 %v3511_v21  ;;  %v3502_v25 = vunpack.c.h.bf16 %v3511_v21  ;;  %v3512_v30 = vld [vmem:[%s4947_s2 + $0x18] sm:$0xff]   ;;  %s3933_s25 = sshll.u32 %s4959_s27, 6  ;;  %vm692_vm2 = vcmask 130048  }
   0xe   : > { %s3901_s18 = scalar_lea.vmem %s4945_s0, %s3438_s15  ;;  %v3493_v3 = vunpack.c.l.bf16 %v3492_v2  ;;  %v3494_v4 = vunpack.c.h.bf16 %v3492_v2  ;;  %v3497_v15 = vunpack.c.l.bf16 %v3510_v12  ;;  %v3498_v16 = vunpack.c.h.bf16 %v3510_v12  ;;  %s3939_s10 = scalar_lea.vmem %s4948_s3, %s3933_s25 }
   0xf   : > { %v3476_v5 = vld [vmem:[%s3901_s18] sm:$0xff]   ;;  %v3507_v11 = vld [vmem:[%s3901_s18 + $0x8] sm:$0xff]   ;;  %v3508_v20 = vld [vmem:[%s3901_s18 + $0x10] sm:$0xff]   ;;  %v3505_v33 = vunpack.c.l.bf16 %v3512_v30  ;;  %v3506_v34 = vunpack.c.h.bf16 %v3512_v30  ;;  %s3990_s16 = scalar_lea.vmem %s4949_s4, %s3933_s25  ;;  %vm1093_vm3 = vcmask 1041408   ;;  %s4848_s26 = scalar_lea.vmem %s4946_s1, %s3933_s25 }
  0x10   : > { %v3477_v6 = vunpack.c.l.bf16 %v3476_v5  ;;  %v3478_v7 = vunpack.c.h.bf16 %v3476_v5  ;;  %v3481_v13 = vunpack.c.l.bf16 %v3507_v11  ;;  %v3482_v14 = vunpack.c.h.bf16 %v3507_v11  ;;  %v3509_v29 = vld [vmem:[%s3901_s18 + $0x18] sm:$0xff]   ;;  %v3443_v38 = vld [vmem:[%s3939_s10] sm:$0xff]  ;;  %s4886_s13 = scalar_lea.vmem %s4953_s8, %s3933_s25 }
  0x11   : > { %608 = vmatpush.bf16.msra.mxu0 %v3459_v1  ;;  %v3485_v22 = vunpack.c.l.bf16 %v3508_v20  ;;  %v3486_v23 = vunpack.c.h.bf16 %v3508_v20  ;;  %v3489_v31 = vunpack.c.l.bf16 %v3509_v29  ;;  %v3490_v32 = vunpack.c.h.bf16 %v3509_v29 }
  0x12   : > { %v476_v8 = vadd.f32 %v3493_v3, %v3477_v6  ;;  %v477_v9 = vadd.f32 %v3494_v4, %v3478_v7  ;;  %v478_v17 = vadd.f32 %v3497_v15, %v3481_v13  ;;  %v479_v18 = vadd.f32 %v3498_v16, %v3482_v14 }
  0x13   : > { %v480_v26 = vadd.f32 %v3501_v24, %v3485_v22  ;;  %v481_v27 = vadd.f32 %v3502_v25, %v3486_v23  ;;  %v482_v35 = vadd.f32 %v3505_v33, %v3489_v31  ;;  %v483_v36 = vadd.f32 %v3506_v34, %v3490_v32  ;;  %v3461_v31 = vld [vmem:[%s4950_s5 + $0x10] sm:$0xff] }
  0x14   : > { %v3904_v10 = vpack.c.bf16 %v477_v9, %v476_v8  ;;  %v3912_v19 = vpack.c.bf16 %v479_v18, %v478_v17  ;;  %v653_v39 = vsel %vm639_vm1, %v3443_v38, 0 }
  0x15   : > { %v3920_v28 = vpack.c.bf16 %v481_v27, %v480_v26  ;;  %v3928_v37 = vpack.c.bf16 %v483_v36, %v482_v35  ;;  %662 = vmatpush.bf16.xpose.msra.mxu1 %v653_v39  ;;  %v3462_v27 = vld [vmem:[%s4950_s5 + $0x18] sm:$0xff] }
  0x16   : > { %3188 = vmatmul.msk.bf16.vlgmr.msra.gmra.mxu0 %vm588_vm0, %v3904_v10  ;;  %854 = vmatpush.bf16.msra.mxu3 %v3462_v27 }
  0x1a   : > { %855 = vmatpush.bf16.msra.mxu3 %v3461_v31 }
  0x1d   : > { %3216 = vmatmul.msk.bf16.vlgmr.msra.gmra.mxu3 %vm588_vm0, %v3904_v10 }
  0x26   : > { %3189 = vmatmul.msk.bf16.gmra.mxu0 %vm588_vm0, %v3912_v19 }
  0x2d   : > { %3217 = vmatmul.msk.bf16.gmra.mxu3 %vm588_vm0, %v3912_v19 }
  0x36   : > { %3190 = vmatmul.msk.bf16.gmra.mxu0 %vm588_vm0, %v3920_v28 }
  0x3d   : > { %3218 = vmatmul.msk.bf16.gmra.mxu3 %vm588_vm0, %v3920_v28 }
  0x46   : > { %3191 = vmatmul.msk.bf16.gmra.mxu0 %vm588_vm0, %v3928_v37 }
  0x4d   : > { %3219 = vmatmul.msk.bf16.gmra.mxu3 %vm588_vm0, %v3928_v37 }
  0x93   : > { %v610_v40 = vpop.f32.mrf.mxu0 }
  0x9b   : > { %v612_v41 = vpop.f32.mrf.mxu0 }
  0x9c   : > { %v630_v42 = vpack.c.bf16 %v612_v41, %v610_v40 }
  0x9e   : > { %3196 = vmatmul.msk.bf16.vlgmr.msra.gmra.mxu1 %vm639_vm1, %v630_v42 }
  0xa3   : > { %v615_v43 = vpop.f32.mrf.mxu0 }
  0xab   : > { %v617_v44 = vpop.f32.mrf.mxu0 }
  0xac   : > { %v631_v45 = vpack.c.bf16 %v617_v44, %v615_v43 }
  0xae   : > { %3197 = vmatmul.msk.bf16.gmra.mxu1 %vm639_vm1, %v631_v45 }
  0xb3   : > { %v620_v46 = vpop.f32.mrf.mxu0 }
  0xbb   : > { %v622_v47 = vpop.f32.mrf.mxu0 }
  0xbc   : > { %v632_v48 = vpack.c.bf16 %v622_v47, %v620_v46 }
  0xbe   : > { %3198 = vmatmul.msk.bf16.gmra.mxu1 %vm639_vm1, %v632_v48 }
  0xc3   : > { %v625_v49 = vpop.f32.mrf.mxu0 }
  0xcb   : > { %v627_v50 = vpop.f32.mrf.mxu0 }
  0xcc   : > { %v633_v51 = vpack.c.bf16 %v627_v50, %v625_v49 }
  0xce   : > { %3199 = vmatmul.msk.bf16.gmra.mxu1 %vm639_vm1, %v633_v51 }
 0x11b   : > { %v664_v52 = vpop.f32.mrf.mxu1 }
 0x11c   : > { %v684_v53 = vmul.f32 0.5, %v664_v52 }
 0x11e   : > { %v693_v54 = vsel %vm692_vm2, %v684_v53, -inf }
 0x11f   : > { %694 = vmax.xlane.f32.xlu0 %v693_v54 }
 0x123   : > { %v666_v55 = vpop.f32.mrf.mxu1 }
 0x124   : > { %v685_v56 = vmul.f32 0.5, %v666_v55 }
 0x126   : > { %v696_v57 = vsel %vm692_vm2, %v685_v56, -inf }
 0x127   : > { %697 = vmax.xlane.f32.xlu0 %v696_v57 }
 0x12b   : > { %v669_v58 = vpop.f32.mrf.mxu1 }
 0x12c   : > { %v686_v59 = vmul.f32 0.5, %v669_v58  ;;  %v3451_v58 = vld [vmem:[%s3990_s16] sm:$0xff] }
 0x12d   : > { %810 = vmatpush.bf16.msra.mxu2 %v3451_v58 }
 0x12e   : > { %v699_v60 = vsel %vm692_vm2, %v686_v59, -inf }
 0x12f   : > { %700 = vmax.xlane.f32.xlu1 %v699_v60 }
 0x133   : > { %v671_v61 = vpop.f32.mrf.mxu1 }
 0x134   : > { %v687_v62 = vmul.f32 0.5, %v671_v61 }
 0x136   : > { %v702_v63 = vsel %vm692_vm2, %v687_v62, -inf }
 0x137   : > { %703 = vmax.xlane.f32.xlu1 %v702_v63 }
 0x13b   : > { %v674_v0 = vpop.f32.mrf.mxu1 }
 0x13c   : > { %v688_v1 = vmul.f32 0.5, %v674_v0 }
 0x13e   : > { %v705_v2 = vsel %vm692_vm2, %v688_v1, -inf }
 0x13f   : > { %706 = vmax.xlane.f32.xlu2 %v705_v2 }
 0x143   : > { %v676_v3 = vpop.f32.mrf.mxu1 }
 0x144   : > { %v689_v4 = vmul.f32 0.5, %v676_v3 }
 0x146   : > { %v708_v5 = vsel %vm692_vm2, %v689_v4, -inf }
 0x147   : > { %709 = vmax.xlane.f32.xlu2 %v708_v5 }
 0x14b   : > { %v679_v6 = vpop.f32.mrf.mxu1 }
 0x14c   : > { %v690_v7 = vmul.f32 0.5, %v679_v6 }
 0x14e   : > { %v711_v8 = vsel %vm692_vm2, %v690_v7, -inf }
 0x14f   : > { %712 = vmax.xlane.f32.xlu0 %v711_v8 }
 0x153   : > { %v681_v9 = vpop.f32.mrf.mxu1 }
 0x154   : > { %v691_v11 = vmul.f32 0.5, %v681_v9 }
 0x156   : > { %v714_v12 = vsel %vm692_vm2, %v691_v11, -inf }
 0x157   : > { %715 = vmax.xlane.f32.xlu1 %v714_v12 }
 0x192   : > { %v695_v13 = vpop.xlane.xlu0 %694 }
 0x193   : > { %v717_v14 = vsub.f32 %v684_v53, %v695_v13 }
 0x195   : > { %v725_v15 = vmul.f32 1.442695, %v717_v14 }
 0x197   : > { %3542 = vpow2.f32 %v725_v15 }
 0x19a   : > { %v698_v16 = vpop.xlane.xlu0 %697 }
 0x19b   : > { %v718_v17 = vsub.f32 %v685_v56, %v698_v16 }
 0x19d   : > { %v3955_v18 = vpop.eup %3542  ;;  %v727_v20 = vmul.f32 1.442695, %v718_v17 }
 0x19e   : > { %v741_v21 = vsel %vm692_vm2, %v3955_v18, 0.0 }
 0x19f   : > { %3544 = vpow2.f32 %v727_v20  ;;  %742 = vadd.xlane.f32.xlu2 %v741_v21 }
 0x1a2   : > { %v701_v22 = vpop.xlane.xlu1 %700 }
 0x1a3   : > { %v719_v23 = vsub.f32 %v686_v59, %v701_v22  ;;  %v3444_v59 = vld [vmem:[%s3939_s10 + $0x8] sm:$0xff]  ;;  %v857_v22 = vpop.f32.mrf.mxu3 }
 0x1a4   : > { %v899_v60 = vsel %vm639_vm1, %v3444_v59, 0 }
 0x1a5   : > { %v3959_v24 = vpop.eup %3544  ;;  %v729_v25 = vmul.f32 1.442695, %v719_v23  ;;  %908 = vmatpush.bf16.xpose.msrb.mxu2 %v899_v60 }
 0x1a6   : > { %v744_v26 = vsel %vm692_vm2, %v3959_v24, 0.0 }
 0x1a7   : > { %3546 = vpow2.f32 %v729_v25  ;;  %745 = vadd.xlane.f32.xlu0 %v744_v26 }
 0x1aa   : > { %v704_v29 = vpop.xlane.xlu1 %703 }
 0x1ab   : > { %v720_v30 = vsub.f32 %v687_v62, %v704_v29  ;;  %v859_v29 = vpop.f32.mrf.mxu3 }
 0x1ac   : > { %v877_v31 = vpack.c.bf16 %v859_v29, %v857_v22 }
 0x1ad   : > { %v3969_v32 = vpop.eup %3546  ;;  %v731_v33 = vmul.f32 1.442695, %v720_v30 }
 0x1ae   : > { %v747_v34 = vsel %vm692_vm2, %v3969_v32, 0.0 }
 0x1af   : > { %3548 = vpow2.f32 %v731_v33  ;;  %748 = vadd.xlane.f32.xlu1 %v747_v34 }
 0x1b2   : > { %v707_v35 = vpop.xlane.xlu2 %706 }
 0x1b3   : > { %v721_v36 = vsub.f32 %v688_v1, %v707_v35  ;;  %v862_v30 = vpop.f32.mrf.mxu3 }
 0x1b5   : > { %v3549_v38 = vpop.eup %3548  ;;  %v733_v39 = vmul.f32 1.442695, %v721_v36 }
 0x1b6   : > { %v750_v40 = vsel %vm692_vm2, %v3549_v38, 0.0 }
 0x1b7   : > { %3550 = vpow2.f32 %v733_v39  ;;  %751 = vadd.xlane.f32.xlu2 %v750_v40  ;;  %v568_v39 = vld [vmem:[%s4951_s6] sm:$0x3] }
 0x1b8   : > { %v1139_v40 = vsel %vm1093_vm3, %v568_v39, 0 }
 0x1b9   : > { %1148 = vmatpush.bf16.msrb.mxu3 %v1139_v40 }
 0x1ba   : > { %v710_v41 = vpop.xlane.xlu2 %709 }
 0x1bb   : > { %v722_v42 = vsub.f32 %v689_v4, %v710_v41 }
 0x1bd   : > { %v3551_v43 = vpop.eup %3550  ;;  %v735_v44 = vmul.f32 1.442695, %v722_v42 }
 0x1be   : > { %v753_v45 = vsel %vm692_vm2, %v3551_v43, 0.0 }
 0x1bf   : > { %3552 = vpow2.f32 %v735_v44  ;;  %754 = vadd.xlane.f32.xlu0 %v753_v45 }
 0x1c2   : > { %v713_v46 = vpop.xlane.xlu0 %712 }
 0x1c3   : > { %v723_v47 = vsub.f32 %v690_v7, %v713_v46 }
 0x1c5   : > { %v3553_v48 = vpop.eup %3552  ;;  %v737_v49 = vmul.f32 1.442695, %v723_v47 }
 0x1c6   : > { %v756_v50 = vsel %vm692_vm2, %v3553_v48, 0.0 }
 0x1c7   : > { %3554 = vpow2.f32 %v737_v49  ;;  %757 = vadd.xlane.f32.xlu1 %v756_v50 }
 0x1ca   : > { %v716_v51 = vpop.xlane.xlu1 %715 }
 0x1cb   : > { %v724_v52 = vsub.f32 %v691_v11, %v716_v51 }
 0x1cd   : > { %v3555_v53 = vpop.eup %3554  ;;  %v739_v54 = vmul.f32 1.442695, %v724_v52 }
 0x1ce   : > { %v759_v55 = vsel %vm692_vm2, %v3555_v53, 0.0 }
 0x1cf   : > { %3556 = vpow2.f32 %v739_v54  ;;  %760 = vadd.xlane.f32.xlu2 %v759_v55 }
 0x1d5   : > { %v3557_v56 = vpop.eup %3556 }
 0x1d6   : > { %v762_v57 = vsel %vm692_vm2, %v3557_v56, 0.0 }
 0x1d7   : > { %763 = vadd.xlane.f32.xlu0 %v762_v57 }
 0x212   : > { %v743_v61 = vpop.xlane.xlu2 %742 }
 0x213   : > { %3558 = vrcp.f32 %v743_v61 }
 0x219   : > { %v3559_v63 = vpop.eup %3558 }
 0x21a   : > { %v746_v62 = vpop.xlane.xlu0 %745  ;;  %v773_v1 = vmul.f32 %v3559_v63, %v3955_v18 }
 0x21b   : > { %3560 = vrcp.f32 %v746_v62 }
 0x221   : > { %v3561_v0 = vpop.eup %3560 }
 0x222   : > { %v774_v2 = vmul.f32 %v3561_v0, %v3959_v24  ;;  %v749_v4 = vpop.xlane.xlu1 %748 }
 0x223   : > { %3562 = vrcp.f32 %v749_v4 }
 0x224   : > { %v781_v3 = vpack.c.bf16 %v774_v2, %v773_v1 }
 0x226   : > { %3204 = vmatmul.msk.bf16.vlgmr.msra.gmra.mxu2 %vm692_vm2, %v781_v3 }
 0x229   : > { %v3563_v6 = vpop.eup %3562 }
 0x22a   : > { %v752_v5 = vpop.xlane.xlu2 %751  ;;  %v775_v8 = vmul.f32 %v3563_v6, %v3969_v32  ;;  %v864_v32 = vpop.f32.mrf.mxu3 }
 0x22b   : > { %3564 = vrcp.f32 %v752_v5  ;;  %v878_v34 = vpack.c.bf16 %v864_v32, %v862_v30 }
 0x231   : > { %v3565_v7 = vpop.eup %3564 }
 0x232   : > { %v776_v9 = vmul.f32 %v3565_v7, %v3549_v38  ;;  %v755_v12 = vpop.xlane.xlu0 %754  ;;  %v867_v33 = vpop.f32.mrf.mxu3 }
 0x233   : > { %3566 = vrcp.f32 %v755_v12 }
 0x234   : > { %v782_v11 = vpack.c.bf16 %v776_v9, %v775_v8 }
 0x236   : > { %3205 = vmatmul.msk.bf16.gmra.mxu2 %vm692_vm2, %v782_v11 }
 0x239   : > { %v3567_v14 = vpop.eup %3566 }
 0x23a   : > { %v758_v13 = vpop.xlane.xlu1 %757  ;;  %v777_v16 = vmul.f32 %v3567_v14, %v3551_v43  ;;  %v869_v35 = vpop.f32.mrf.mxu3 }
 0x23b   : > { %3568 = vrcp.f32 %v758_v13  ;;  %v879_v36 = vpack.c.bf16 %v869_v35, %v867_v33 }
 0x241   : > { %v3569_v15 = vpop.eup %3568 }
 0x242   : > { %v778_v17 = vmul.f32 %v3569_v15, %v3553_v48  ;;  %v761_v20 = vpop.xlane.xlu2 %760  ;;  %v872_v38 = vpop.f32.mrf.mxu3 }
 0x243   : > { %3570 = vrcp.f32 %v761_v20 }
 0x244   : > { %v783_v18 = vpack.c.bf16 %v778_v17, %v777_v16  ;;  %v3464_v16 = vld [vmem:[%s4950_s5 + $0x28] sm:$0xff] }
 0x245   : > { %1188 = vmatpush.bf16.msra.mxu2 %v3464_v16 }
 0x246   : > { %3206 = vmatmul.msk.bf16.gmra.mxu2 %vm692_vm2, %v783_v18 }
 0x249   : > { %v3571_v23 = vpop.eup %3570 }
 0x24a   : > { %v764_v21 = vpop.xlane.xlu0 %763  ;;  %v779_v25 = vmul.f32 %v3571_v23, %v3555_v53  ;;  %v874_v41 = vpop.f32.mrf.mxu3 }
 0x24b   : > { %3572 = vrcp.f32 %v764_v21  ;;  %v880_v42 = vpack.c.bf16 %v874_v41, %v872_v38  ;;  %v3463_v21 = vld [vmem:[%s4950_s5 + $0x20] sm:$0xff] }
 0x24c   : > { %1189 = vmatpush.bf16.msra.mxu2 %v3463_v21 }
 0x251   : > { %v3573_v24 = vpop.eup %3572 }
 0x252   : > { %v780_v26 = vmul.f32 %v3573_v24, %v3557_v56 }
 0x254   : > { %v784_v27 = vpack.c.bf16 %v780_v26, %v779_v25 }
 0x256   : > { %3207 = vmatmul.msk.bf16.gmra.mxu2 %vm692_vm2, %v784_v27 }
 0x266   : > { %3224 = vmatmul.msk.bf16.vlgmr.msrb.gmra.mxu2 %vm639_vm1, %v877_v31 }
 0x276   : > { %3225 = vmatmul.msk.bf16.gmra.mxu2 %vm639_vm1, %v878_v34 }
 0x286   : > { %3226 = vmatmul.msk.bf16.gmra.mxu2 %vm639_vm1, %v879_v36 }
 0x296   : > { %3227 = vmatmul.msk.bf16.gmra.mxu2 %vm639_vm1, %v880_v42 }
 0x2a6   : > { %3252 = vmatmul.msk.bf16.vlgmr.msra.gmra.mxu2 %vm588_vm0, %v3904_v10 }
 0x2a9   : > { %v812_v43 = vpop.f32.mrf.mxu2 }
 0x2b1   : > { %v814_v44 = vpop.f32.mrf.mxu2 }
 0x2b2   : > { %v832_v45 = vpack.c.bf16 %v814_v44, %v812_v43  ;;  %v3466_v44 = vld [vmem:[%s4950_s5 + $0x38] sm:$0xff] }
 0x2b3   : > { %1485 = vmatpush.bf16.msrb.mxu2 %v3466_v44 }
 0x2b4   : > { %3240 = vmatmul.msk.bf16.vlgmr.msrb.gmra.mxu3 %vm639_vm1, %v832_v45  ;;  %v3452_v45 = vld [vmem:[%s3990_s16 + $0x8] sm:$0xff] }
 0x2b5   : > { %1055 = vmatpush.bf16.msrb.mxu0 %v3452_v45 }
 0x2b6   : > { %3253 = vmatmul.msk.bf16.gmra.mxu2 %vm588_vm0, %v3912_v19 }
 0x2b9   : > { %v817_v46 = vpop.f32.mrf.mxu2 }
 0x2c1   : > { %v819_v47 = vpop.f32.mrf.mxu2 }
 0x2c2   : > { %v833_v48 = vpack.c.bf16 %v819_v47, %v817_v46  ;;  %v3465_v46 = vld [vmem:[%s4950_s5 + $0x30] sm:$0xff] }
 0x2c3   : > { %1486 = vmatpush.bf16.msrb.mxu2 %v3465_v46 }
 0x2c4   : > { %3241 = vmatmul.msk.bf16.gmra.mxu3 %vm639_vm1, %v833_v48 }
 0x2c6   : > { %3254 = vmatmul.msk.bf16.gmra.mxu2 %vm588_vm0, %v3920_v28 }
 0x2c9   : > { %v822_v49 = vpop.f32.mrf.mxu2 }
 0x2d1   : > { %v824_v50 = vpop.f32.mrf.mxu2 }
 0x2d2   : > { %v834_v51 = vpack.c.bf16 %v824_v50, %v822_v49 }
 0x2d4   : > { %3242 = vmatmul.msk.bf16.gmra.mxu3 %vm639_vm1, %v834_v51 }
 0x2d6   : > { %3255 = vmatmul.msk.bf16.gmra.mxu2 %vm588_vm0, %v3928_v37 }
 0x2d9   : > { %v827_v52 = vpop.f32.mrf.mxu2 }
 0x2e1   : > { %v829_v53 = vpop.f32.mrf.mxu2 }
 0x2e2   : > { %v835_v54 = vpack.c.bf16 %v829_v53, %v827_v52 }
 0x2e4   : > { %3243 = vmatmul.msk.bf16.gmra.mxu3 %vm639_vm1, %v835_v54 }
 0x2e6   : > { %3284 = vmatmul.msk.bf16.vlgmr.msrb.gmra.mxu2 %vm588_vm0, %v3904_v10 }
 0x2e9   : > { %v910_v55 = vpop.f32.mrf.mxu2 }
 0x2ea   : > { %v930_v56 = vmul.f32 0.5, %v910_v55 }
 0x2ec   : > { %v938_v57 = vsel %vm692_vm2, %v930_v56, -inf }
 0x2ed   : > { %939 = vmax.xlane.f32.xlu1 %v938_v57 }
 0x2f1   : > { %v912_v58 = vpop.f32.mrf.mxu2 }
 0x2f2   : > { %v931_v59 = vmul.f32 0.5, %v912_v58 }
 0x2f4   : > { %v941_v60 = vsel %vm692_vm2, %v931_v59, -inf }
 0x2f5   : > { %942 = vmax.xlane.f32.xlu2 %v941_v60 }
 0x2f6   : > { %3285 = vmatmul.msk.bf16.gmra.mxu2 %vm588_vm0, %v3912_v19 }
 0x2f9   : > { %v915_v61 = vpop.f32.mrf.mxu2 }
 0x2fa   : > { %v932_v62 = vmul.f32 0.5, %v915_v61 }
 0x2fc   : > { %v944_v63 = vsel %vm692_vm2, %v932_v62, -inf }
 0x2fd   : > { %945 = vmax.xlane.f32.xlu0 %v944_v63 }
 0x301   : > { %v917_v0 = vpop.f32.mrf.mxu2 }
 0x302   : > { %v933_v1 = vmul.f32 0.5, %v917_v0  ;;  %v3445_v0 = vld [vmem:[%s3939_s10 + $0x10] sm:$0xff] }
 0x304   : > { %v947_v2 = vsel %vm692_vm2, %v933_v1, -inf }
 0x305   : > { %948 = vmax.xlane.f32.xlu1 %v947_v2 }
 0x306   : > { %3286 = vmatmul.msk.bf16.gmra.mxu2 %vm588_vm0, %v3920_v28 }
 0x309   : > { %v920_v3 = vpop.f32.mrf.mxu2 }
 0x30a   : > { %v934_v4 = vmul.f32 0.5, %v920_v3 }
 0x30c   : > { %v950_v5 = vsel %vm692_vm2, %v934_v4, -inf }
 0x30d   : > { %951 = vmax.xlane.f32.xlu2 %v950_v5 }
 0x311   : > { %v922_v6 = vpop.f32.mrf.mxu2 }
 0x312   : > { %v935_v7 = vmul.f32 0.5, %v922_v6 }
 0x314   : > { %v953_v8 = vsel %vm692_vm2, %v935_v7, -inf }
 0x315   : > { %954 = vmax.xlane.f32.xlu0 %v953_v8 }
 0x316   : > { %3287 = vmatmul.msk.bf16.gmra.mxu2 %vm588_vm0, %v3928_v37 }
 0x319   : > { %v925_v9 = vpop.f32.mrf.mxu2 }
 0x31a   : > { %v936_v11 = vmul.f32 0.5, %v925_v9 }
 0x31c   : > { %v956_v12 = vsel %vm692_vm2, %v936_v11, -inf }
 0x31d   : > { %957 = vmax.xlane.f32.xlu1 %v956_v12 }
 0x321   : > { %v927_v13 = vpop.f32.mrf.mxu2 }
 0x322   : > { %v4021_v14 = vmul.f32 0.5, %v927_v13 }
 0x324   : > { %v959_v15 = vsel %vm692_vm2, %v4021_v14, -inf }
 0x325   : > { %960 = vmax.xlane.f32.xlu2 %v959_v15 }
 0x360   : > { %v940_v17 = vpop.xlane.xlu1 %939 }
 0x361   : > { %v962_v18 = vsub.f32 %v930_v56, %v940_v17 }
 0x363   : > { %v970_v20 = vmul.f32 1.442695, %v962_v18  ;;  %v3468_v18 = vld [vmem:[%s4950_s5 + $0x48] sm:$0xff] }
 0x364   : > { %1782 = vmatpush.bf16.msra.mxu2 %v3468_v18 }
 0x365   : > { %3574 = vpow2.f32 %v970_v20 }
 0x368   : > { %v943_v22 = vpop.xlane.xlu2 %942 }
 0x369   : > { %v963_v23 = vsub.f32 %v931_v59, %v943_v22 }
 0x36b   : > { %v4033_v24 = vpop.eup %3574  ;;  %v972_v25 = vmul.f32 1.442695, %v963_v23 }
 0x36c   : > { %v986_v26 = vsel %vm692_vm2, %v4033_v24, 0.0 }
 0x36d   : > { %3576 = vpow2.f32 %v972_v25  ;;  %987 = vadd.xlane.f32.xlu0 %v986_v26 }
 0x370   : > { %v946_v27 = vpop.xlane.xlu0 %945 }
 0x371   : > { %v964_v29 = vsub.f32 %v932_v62, %v946_v27  ;;  %v3446_v27 = vld [vmem:[%s3939_s10 + $0x18] sm:$0xff] }
 0x373   : > { %v4037_v30 = vpop.eup %3576  ;;  %v974_v31 = vmul.f32 1.442695, %v964_v29  ;;  %v1191_v29 = vpop.f32.mrf.mxu2 }
 0x374   : > { %v989_v32 = vsel %vm692_vm2, %v4037_v30, 0.0 }
 0x375   : > { %3578 = vpow2.f32 %v974_v31  ;;  %990 = vadd.xlane.f32.xlu1 %v989_v32 }
 0x378   : > { %v949_v33 = vpop.xlane.xlu1 %948 }
 0x379   : > { %v965_v34 = vsub.f32 %v933_v1, %v949_v33  ;;  %v1233_v1 = vsel %vm639_vm1, %v3445_v0, 0 }
 0x37a   : > { %1242 = vmatpush.bf16.xpose.msra.mxu0 %v1233_v1 }
 0x37b   : > { %v4043_v35 = vpop.eup %3578  ;;  %v976_v36 = vmul.f32 1.442695, %v965_v34  ;;  %v1193_v34 = vpop.f32.mrf.mxu2 }
 0x37c   : > { %v992_v38 = vsel %vm692_vm2, %v4043_v35, 0.0 }
 0x37d   : > { %3580 = vpow2.f32 %v976_v36  ;;  %993 = vadd.xlane.f32.xlu2 %v992_v38 }
 0x380   : > { %v952_v39 = vpop.xlane.xlu2 %951 }
 0x381   : > { %v966_v40 = vsub.f32 %v934_v4, %v952_v39  ;;  %v3467_v39 = vld [vmem:[%s4950_s5 + $0x40] sm:$0xff] }
 0x382   : > { %1783 = vmatpush.bf16.msra.mxu2 %v3467_v39 }
 0x383   : > { %v3581_v41 = vpop.eup %3580  ;;  %v978_v42 = vmul.f32 1.442695, %v966_v40  ;;  %v1196_v40 = vpop.f32.mrf.mxu2 }
 0x384   : > { %v995_v43 = vsel %vm692_vm2, %v3581_v41, 0.0 }
 0x385   : > { %3582 = vpow2.f32 %v978_v42  ;;  %996 = vadd.xlane.f32.xlu0 %v995_v43  ;;  %3316 = vmatmul.msk.bf16.vlgmr.msra.gmra.mxu2 %vm588_vm0, %v3904_v10 }
 0x388   : > { %v955_v47 = vpop.xlane.xlu0 %954 }
 0x389   : > { %v967_v48 = vsub.f32 %v935_v7, %v955_v47 }
 0x38b   : > { %v3583_v49 = vpop.eup %3582  ;;  %v980_v50 = vmul.f32 1.442695, %v967_v48  ;;  %v1198_v42 = vpop.f32.mrf.mxu2  ;;  %v569_v48 = vld [vmem:[%s4951_s6 + $0x2] sm:$0x3] }
 0x38c   : > { %v998_v51 = vsel %vm692_vm2, %v3583_v49, 0.0  ;;  %v1212_v44 = vpack.c.bf16 %v1198_v42, %v1196_v40 }
 0x38d   : > { %3584 = vpow2.f32 %v980_v50  ;;  %999 = vadd.xlane.f32.xlu1 %v998_v51 }
 0x390   : > { %v958_v52 = vpop.xlane.xlu1 %957 }
 0x391   : > { %v968_v53 = vsub.f32 %v936_v11, %v958_v52 }
 0x393   : > { %v3585_v54 = vpop.eup %3584  ;;  %v982_v55 = vmul.f32 1.442695, %v968_v53  ;;  %v1201_v43 = vpop.f32.mrf.mxu2 }
 0x394   : > { %v1001_v56 = vsel %vm692_vm2, %v3585_v54, 0.0 }
 0x395   : > { %3586 = vpow2.f32 %v982_v55  ;;  %1002 = vadd.xlane.f32.xlu2 %v1001_v56  ;;  %3317 = vmatmul.msk.bf16.gmra.mxu2 %vm588_vm0, %v3912_v19 }
 0x398   : > { %v961_v57 = vpop.xlane.xlu2 %960 }
 0x399   : > { %v969_v58 = vsub.f32 %v4021_v14, %v961_v57 }
 0x39b   : > { %v3587_v59 = vpop.eup %3586  ;;  %v984_v60 = vmul.f32 1.442695, %v969_v58  ;;  %v1203_v45 = vpop.f32.mrf.mxu2 }
 0x39c   : > { %v1004_v61 = vsel %vm692_vm2, %v3587_v59, 0.0  ;;  %v1213_v47 = vpack.c.bf16 %v1203_v45, %v1201_v43 }
 0x39d   : > { %3588 = vpow2.f32 %v984_v60  ;;  %1005 = vadd.xlane.f32.xlu0 %v1004_v61 }
 0x3a3   : > { %v3589_v62 = vpop.eup %3588  ;;  %v1206_v46 = vpop.f32.mrf.mxu2 }
 0x3a4   : > { %v1007_v63 = vsel %vm692_vm2, %v3589_v62, 0.0 }
 0x3a5   : > { %1008 = vadd.xlane.f32.xlu1 %v1007_v63  ;;  %3318 = vmatmul.msk.bf16.gmra.mxu2 %vm588_vm0, %v3920_v28 }
 0x3ab   : > { %v1208_v50 = vpop.f32.mrf.mxu2 }
 0x3ac   : > { %v1214_v51 = vpack.c.bf16 %v1208_v50, %v1206_v46 }
 0x3b3   : > { %v1488_v52 = vpop.f32.mrf.mxu2 }
 0x3b5   : > { %3319 = vmatmul.msk.bf16.gmra.mxu2 %vm588_vm0, %v3928_v37 }
 0x3bb   : > { %v1490_v53 = vpop.f32.mrf.mxu2 }
 0x3bc   : > { %v1508_v55 = vpack.c.bf16 %v1490_v53, %v1488_v52  ;;  %v3472_v53 = vld [vmem:[%s4950_s5 + $0x68] sm:$0xff] }
 0x3c3   : > { %v1493_v61 = vpop.f32.mrf.mxu2 }
 0x3cb   : > { %v1495_v0 = vpop.f32.mrf.mxu2 }
 0x3cc   : > { %v1509_v1 = vpack.c.bf16 %v1495_v0, %v1493_v61 }
 0x3e0   : > { %v988_v2 = vpop.xlane.xlu0 %987 }
 0x3e1   : > { %3590 = vrcp.f32 %v988_v2  ;;  %v3447_v2 = vld [vmem:[%s3939_s10 + $0x20] sm:$0xff] }
 0x3e7   : > { %v3591_v4 = vpop.eup %3590 }
 0x3e8   : > { %v991_v3 = vpop.xlane.xlu1 %990  ;;  %v1018_v6 = vmul.f32 %v3591_v4, %v4033_v24 }
 0x3e9   : > { %3592 = vrcp.f32 %v991_v3  ;;  %v1827_v3 = vsel %vm639_vm1, %v3447_v2, 0 }
 0x3ef   : > { %v3593_v5 = vpop.eup %3592 }
 0x3f0   : > { %v1019_v7 = vmul.f32 %v3593_v5, %v4037_v30  ;;  %v994_v9 = vpop.xlane.xlu2 %993  ;;  %v1530_v30 = vsel %vm639_vm1, %v3446_v27, 0  ;;  %v1498_v5 = vpop.f32.mrf.mxu2 }
 0x3f1   : > { %3594 = vrcp.f32 %v994_v9 }
 0x3f2   : > { %v1026_v8 = vpack.c.bf16 %v1019_v7, %v1018_v6 }
 0x3f4   : > { %3232 = vmatmul.msk.bf16.vlgmr.msrb.gmra.mxu0 %vm692_vm2, %v1026_v8 }
 0x3f5   : > { %1539 = vmatpush.bf16.xpose.msrb.mxu0 %v1530_v30 }
 0x3f7   : > { %v3595_v12 = vpop.eup %3594 }
 0x3f8   : > { %v997_v11 = vpop.xlane.xlu0 %996  ;;  %v1020_v14 = vmul.f32 %v3595_v12, %v4043_v35  ;;  %v1500_v8 = vpop.f32.mrf.mxu2 }
 0x3f9   : > { %3596 = vrcp.f32 %v997_v11  ;;  %v1510_v9 = vpack.c.bf16 %v1500_v8, %v1498_v5  ;;  %v3469_v11 = vld [vmem:[%s4950_s5 + $0x50] sm:$0xff] }
 0x3ff   : > { %v3597_v13 = vpop.eup %3596 }
 0x400   : > { %v1021_v15 = vmul.f32 %v3597_v13, %v3581_v41  ;;  %v1000_v17 = vpop.xlane.xlu1 %999  ;;  %v1211_v41 = vpack.c.bf16 %v1193_v34, %v1191_v29  ;;  %v1503_v13 = vpop.f32.mrf.mxu2 }
 0x401   : > { %3598 = vrcp.f32 %v1000_v17 }
 0x402   : > { %v1027_v16 = vpack.c.bf16 %v1021_v15, %v1020_v14 }
 0x404   : > { %3233 = vmatmul.msk.bf16.gmra.mxu0 %vm692_vm2, %v1027_v16 }
 0x407   : > { %v3599_v21 = vpop.eup %3598 }
 0x408   : > { %v1003_v20 = vpop.xlane.xlu2 %1002  ;;  %v1022_v23 = vmul.f32 %v3599_v21, %v3583_v49  ;;  %v1095_v49 = vsel %vm1093_vm3, %v569_v48, 0  ;;  %v1505_v16 = vpop.f32.mrf.mxu2 }
 0x409   : > { %3600 = vrcp.f32 %v1003_v20  ;;  %1104 = vmatpush.bf16.msrb.mxu1 %v1095_v49  ;;  %v1511_v18 = vpack.c.bf16 %v1505_v16, %v1503_v13 }
 0x40f   : > { %v3601_v22 = vpop.eup %3600 }
 0x410   : > { %v1023_v24 = vmul.f32 %v3601_v22, %v3585_v54  ;;  %v1006_v26 = vpop.xlane.xlu0 %1005  ;;  %v1785_v22 = vpop.f32.mrf.mxu2 }
 0x411   : > { %3602 = vrcp.f32 %v1006_v26 }
 0x412   : > { %v1028_v25 = vpack.c.bf16 %v1023_v24, %v1022_v23 }
 0x414   : > { %3234 = vmatmul.msk.bf16.gmra.mxu0 %vm692_vm2, %v1028_v25 }
 0x417   : > { %v3603_v32 = vpop.eup %3602 }
 0x418   : > { %v1009_v31 = vpop.xlane.xlu1 %1008  ;;  %v1024_v35 = vmul.f32 %v3603_v32, %v3587_v59  ;;  %v3470_v59 = vld [vmem:[%s4950_s5 + $0x58] sm:$0xff]  ;;  %v1787_v26 = vpop.f32.mrf.mxu2 }
 0x419   : > { %3604 = vrcp.f32 %v1009_v31  ;;  %2079 = vmatpush.bf16.msrb.mxu2 %v3470_v59  ;;  %v1805_v29 = vpack.c.bf16 %v1787_v26, %v1785_v22  ;;  %v3471_v59 = vld [vmem:[%s4950_s5 + $0x60] sm:$0xff] }
 0x41d   : > { %2080 = vmatpush.bf16.msrb.mxu2 %v3469_v11 }
 0x41f   : > { %v3605_v33 = vpop.eup %3604 }
 0x420   : > { %v1025_v36 = vmul.f32 %v3605_v33, %v3589_v62  ;;  %3348 = vmatmul.msk.bf16.vlgmr.msrb.gmra.mxu2 %vm588_vm0, %v3904_v10  ;;  %v1790_v32 = vpop.f32.mrf.mxu2 }
 0x421   : > { %2376 = vmatpush.bf16.msra.mxu2 %v3472_v53 }
 0x422   : > { %v1029_v38 = vpack.c.bf16 %v1025_v36, %v1024_v35 }
 0x424   : > { %3235 = vmatmul.msk.bf16.gmra.mxu0 %vm692_vm2, %v1029_v38 }
 0x425   : > { %2377 = vmatpush.bf16.msra.mxu2 %v3471_v59 }
 0x428   : > { %v1792_v36 = vpop.f32.mrf.mxu2 }
 0x429   : > { %v1806_v39 = vpack.c.bf16 %v1792_v36, %v1790_v32 }
 0x430   : > { %3349 = vmatmul.msk.bf16.gmra.mxu2 %vm588_vm0, %v3912_v19 }
 0x434   : > { %3260 = vmatmul.msk.bf16.vlgmr.msra.gmra.mxu0 %vm639_vm1, %v1211_v41 }
 0x435   : > { %1836 = vmatpush.bf16.xpose.msra.mxu0 %v1827_v3 }
 0x440   : > { %3350 = vmatmul.msk.bf16.gmra.mxu2 %vm588_vm0, %v3920_v28 }
 0x444   : > { %3261 = vmatmul.msk.bf16.gmra.mxu0 %vm639_vm1, %v1212_v44 }
 0x450   : > { %3351 = vmatmul.msk.bf16.gmra.mxu2 %vm588_vm0, %v3928_v37 }
 0x454   : > { %3262 = vmatmul.msk.bf16.gmra.mxu0 %vm639_vm1, %v1213_v47 }
 0x460   : > { %3380 = vmatmul.msk.bf16.vlgmr.msra.gmra.mxu2 %vm588_vm0, %v3904_v10 }
 0x464   : > { %3263 = vmatmul.msk.bf16.gmra.mxu0 %vm639_vm1, %v1214_v51 }
 0x470   : > { %3381 = vmatmul.msk.bf16.gmra.mxu2 %vm588_vm0, %v3912_v19 }
 0x471   : > { %v1057_v54 = vpop.f32.mrf.mxu0 }
 0x474   : > { %3292 = vmatmul.msk.bf16.vlgmr.msrb.gmra.mxu0 %vm639_vm1, %v1508_v55 }
 0x479   : > { %v1059_v56 = vpop.f32.mrf.mxu0 }
 0x47a   : > { %v1077_v57 = vpack.c.bf16 %v1059_v56, %v1057_v54  ;;  %v3448_v54 = vld [vmem:[%s3939_s10 + $0x28] sm:$0xff]  ;;  %v1795_v56 = vpop.f32.mrf.mxu2 }
 0x47b   : > { %v2124_v55 = vsel %vm639_vm1, %v3448_v54, 0 }
 0x47c   : > { %3236 = vmatmul.msk.bf16.vlgmr.msrb.gmra.mxu1 %vm639_vm1, %v1077_v57  ;;  %2133 = vmatpush.bf16.xpose.msrb.mxu0 %v2124_v55 }
 0x480   : > { %3382 = vmatmul.msk.bf16.gmra.mxu2 %vm588_vm0, %v3920_v28 }
 0x481   : > { %v1062_v58 = vpop.f32.mrf.mxu0 }
 0x482   : > { %v1797_v57 = vpop.f32.mrf.mxu2 }
 0x484   : > { %3293 = vmatmul.msk.bf16.gmra.mxu0 %vm639_vm1, %v1509_v1 }
 0x489   : > { %v1064_v60 = vpop.f32.mrf.mxu0 }
 0x48a   : > { %v1078_v62 = vpack.c.bf16 %v1064_v60, %v1062_v58  ;;  %v1807_v58 = vpack.c.bf16 %v1797_v57, %v1795_v56 }
 0x48c   : > { %3237 = vmatmul.msk.bf16.gmra.mxu1 %vm639_vm1, %v1078_v62 }
 0x490   : > { %3383 = vmatmul.msk.bf16.gmra.mxu2 %vm588_vm0, %v3928_v37 }
 0x491   : > { %v1067_v63 = vpop.f32.mrf.mxu0 }
 0x494   : > { %3294 = vmatmul.msk.bf16.gmra.mxu0 %vm639_vm1, %v1510_v9 }
 0x499   : > { %v1069_v4 = vpop.f32.mrf.mxu0 }
 0x49a   : > { %v1079_v6 = vpack.c.bf16 %v1069_v4, %v1067_v63  ;;  %v1800_v63 = vpop.f32.mrf.mxu2 }
 0x49c   : > { %3238 = vmatmul.msk.bf16.gmra.mxu1 %vm639_vm1, %v1079_v6 }
 0x4a1   : > { %v1072_v7 = vpop.f32.mrf.mxu0 }
 0x4a2   : > { %v1802_v4 = vpop.f32.mrf.mxu2 }
 0x4a4   : > { %3295 = vmatmul.msk.bf16.gmra.mxu0 %vm639_vm1, %v1511_v18 }
 0x4a9   : > { %v1074_v12 = vpop.f32.mrf.mxu0 }
 0x4aa   : > { %v1080_v14 = vpack.c.bf16 %v1074_v12, %v1072_v7  ;;  %v1808_v7 = vpack.c.bf16 %v1802_v4, %v1800_v63 }
 0x4ac   : > { %3239 = vmatmul.msk.bf16.gmra.mxu1 %vm639_vm1, %v1080_v14  ;;  %v2082_v14 = vpop.f32.mrf.mxu2 }
 0x4b1   : > { %v1244_v15 = vpop.f32.mrf.mxu0 }
 0x4b2   : > { %v4122_v17 = vmul.f32 0.5, %v1244_v15 }
 0x4b4   : > { %v1272_v20 = vsel %vm692_vm2, %v4122_v17, -inf  ;;  %3324 = vmatmul.msk.bf16.vlgmr.msra.gmra.mxu0 %vm639_vm1, %v1805_v29 }
 0x4b5   : > { %1273 = vmax.xlane.f32.xlu2 %v1272_v20 }
 0x4b9   : > { %v1246_v21 = vpop.f32.mrf.mxu0 }
 0x4ba   : > { %v4127_v23 = vmul.f32 0.5, %v1246_v21 }
 0x4bc   : > { %v1275_v24 = vsel %vm692_vm2, %v4127_v23, -inf }
 0x4bd   : > { %1276 = vmax.xlane.f32.xlu0 %v1275_v24 }
 0x4c1   : > { %v1249_v25 = vpop.f32.mrf.mxu0 }
 0x4c2   : > { %v4133_v27 = vmul.f32 0.5, %v1249_v25 }
 0x4c4   : > { %v1278_v30 = vsel %vm692_vm2, %v4133_v27, -inf  ;;  %3325 = vmatmul.msk.bf16.gmra.mxu0 %vm639_vm1, %v1806_v39 }
 0x4c5   : > { %1279 = vmax.xlane.f32.xlu1 %v1278_v30 }
 0x4c9   : > { %v1251_v31 = vpop.f32.mrf.mxu0 }
 0x4ca   : > { %v4138_v33 = vmul.f32 0.5, %v1251_v31 }
 0x4cc   : > { %v1281_v34 = vsel %vm692_vm2, %v4138_v33, -inf }
 0x4cd   : > { %1282 = vmax.xlane.f32.xlu2 %v1281_v34 }
 0x4d1   : > { %v1254_v35 = vpop.f32.mrf.mxu0 }
 0x4d2   : > { %v4144_v38 = vmul.f32 0.5, %v1254_v35 }
 0x4d4   : > { %v1284_v40 = vsel %vm692_vm2, %v4144_v38, -inf  ;;  %3326 = vmatmul.msk.bf16.gmra.mxu0 %vm639_vm1, %v1807_v58 }
 0x4d5   : > { %1285 = vmax.xlane.f32.xlu0 %v1284_v40 }
 0x4d9   : > { %v1256_v41 = vpop.f32.mrf.mxu0 }
 0x4da   : > { %v4149_v42 = vmul.f32 0.5, %v1256_v41 }
 0x4dc   : > { %v1287_v43 = vsel %vm692_vm2, %v4149_v42, -inf }
 0x4dd   : > { %1288 = vmax.xlane.f32.xlu1 %v1287_v43 }
 0x4e1   : > { %v1259_v44 = vpop.f32.mrf.mxu0 }
 0x4e2   : > { %v4155_v45 = vmul.f32 0.5, %v1259_v44 }
 0x4e4   : > { %v1290_v46 = vsel %vm692_vm2, %v4155_v45, -inf  ;;  %3327 = vmatmul.msk.bf16.gmra.mxu0 %vm639_vm1, %v1808_v7 }
 0x4e5   : > { %1291 = vmax.xlane.f32.xlu2 %v1290_v46 }
 0x4e9   : > { %v1261_v47 = vpop.f32.mrf.mxu0 }
 0x4ea   : > { %v4159_v48 = vmul.f32 0.5, %v1261_v47 }
 0x4ec   : > { %v1293_v49 = vsel %vm692_vm2, %v4159_v48, -inf }
 0x4ed   : > { %1294 = vmax.xlane.f32.xlu0 %v1293_v49 }
 0x4f1   : > { %v1541_v50 = vpop.f32.mrf.mxu0 }
 0x4f2   : > { %v4163_v51 = vmul.f32 0.5, %v1541_v50 }
 0x4f4   : > { %v1569_v52 = vsel %vm692_vm2, %v4163_v51, -inf }
 0x4f5   : > { %1570 = vmax.xlane.f32.xlu0 %v1569_v52 }
 0x4f9   : > { %v1543_v60 = vpop.f32.mrf.mxu0 }
 0x4fa   : > { %v4185_v9 = vmul.f32 0.5, %v1543_v60 }
 0x4fc   : > { %v1572_v18 = vsel %vm692_vm2, %v4185_v9, -inf }
 0x501   : > { %v1546_v1 = vpop.f32.mrf.mxu0 }
 0x502   : > { %v4196_v20 = vmul.f32 0.5, %v1546_v1 }
 0x504   : > { %v1575_v30 = vsel %vm692_vm2, %v4196_v20, -inf }
 0x509   : > { %v1548_v13 = vpop.f32.mrf.mxu0 }
 0x50a   : > { %v4206_v31 = vmul.f32 0.5, %v1548_v13 }
 0x50c   : > { %v1578_v39 = vsel %vm692_vm2, %v4206_v31, -inf }
 0x511   : > { %v1551_v26 = vpop.f32.mrf.mxu0 }
 0x512   : > { %v4217_v43 = vmul.f32 0.5, %v1551_v26 }
 0x514   : > { %v1581_v52 = vsel %vm692_vm2, %v4217_v43, -inf }
 0x519   : > { %v1553_v41 = vpop.f32.mrf.mxu0 }
 0x51a   : > { %v4227_v55 = vmul.f32 0.5, %v1553_v41 }
 0x521   : > { %v1556_v54 = vpop.f32.mrf.mxu0 }
 0x528   : > { %v1274_v61 = vpop.xlane.xlu2 %1273 }
 0x529   : > { %v1296_v62 = vsub.f32 %v4122_v17, %v1274_v61  ;;  %v1584_v61 = vsel %vm692_vm2, %v4227_v55, -inf }
 0x52b   : > { %v1304_v0 = vmul.f32 1.442695, %v1296_v62  ;;  %v4238_v62 = vmul.f32 0.5, %v1556_v54 }
 0x52d   : > { %3606 = vpow2.f32 %v1304_v0  ;;  %v1587_v7 = vsel %vm692_vm2, %v4238_v62, -inf }
 0x530   : > { %v1277_v2 = vpop.xlane.xlu0 %1276 }
 0x531   : > { %v1297_v3 = vsub.f32 %v4127_v23, %v1277_v2  ;;  %v2084_v23 = vpop.f32.mrf.mxu2 }
 0x533   : > { %v4180_v5 = vpop.eup %3606  ;;  %v1306_v6 = vmul.f32 1.442695, %v1297_v3 }
 0x534   : > { %v1320_v8 = vsel %vm692_vm2, %v4180_v5, 0.0 }
 0x535   : > { %3608 = vpow2.f32 %v1306_v6  ;;  %1321 = vadd.xlane.f32.xlu1 %v1320_v8  ;;  %v3474_v8 = vld [vmem:[%s4950_s5 + $0x78] sm:$0xff] }
 0x536   : > { %2673 = vmatpush.bf16.msrb.mxu2 %v3474_v8 }
 0x538   : > { %v1280_v11 = vpop.xlane.xlu1 %1279 }
 0x539   : > { %v1298_v12 = vsub.f32 %v4133_v27, %v1280_v11  ;;  %v2102_v27 = vpack.c.bf16 %v2084_v23, %v2082_v14  ;;  %v2087_v34 = vpop.f32.mrf.mxu2 }
 0x53b   : > { %v4190_v15 = vpop.eup %3608  ;;  %v1308_v16 = vmul.f32 1.442695, %v1298_v12  ;;  %3356 = vmatmul.msk.bf16.vlgmr.msrb.gmra.mxu0 %vm639_vm1, %v2102_v27 }
 0x53c   : > { %v1323_v17 = vsel %vm692_vm2, %v4190_v15, 0.0 }
 0x53d   : > { %3610 = vpow2.f32 %v1308_v16  ;;  %1324 = vadd.xlane.f32.xlu2 %v1323_v17  ;;  %1573 = vmax.xlane.f32.xlu1 %v1572_v18 }
 0x540   : > { %v1283_v21 = vpop.xlane.xlu2 %1282 }
 0x541   : > { %v1299_v22 = vsub.f32 %v4138_v33, %v1283_v21  ;;  %v2089_v46 = vpop.f32.mrf.mxu2 }
 0x542   : > { %v2103_v50 = vpack.c.bf16 %v2089_v46, %v2087_v34  ;;  %v3449_v34 = vld [vmem:[%s3939_s10 + $0x30] sm:$0xff] }
 0x543   : > { %v4199_v24 = vpop.eup %3610  ;;  %v1310_v25 = vmul.f32 1.442695, %v1299_v22 }
 0x544   : > { %v1326_v29 = vsel %vm692_vm2, %v4199_v24, 0.0 }
 0x545   : > { %3612 = vpow2.f32 %v1310_v25  ;;  %1327 = vadd.xlane.f32.xlu2 %v1326_v29  ;;  %1576 = vmax.xlane.f32.xlu1 %v1575_v30 }
 0x548   : > { %v1286_v32 = vpop.xlane.xlu0 %1285 }
 0x549   : > { %v1300_v33 = vsub.f32 %v4144_v38, %v1286_v32  ;;  %v2092_v57 = vpop.f32.mrf.mxu2 }
 0x54b   : > { %v4211_v35 = vpop.eup %3612  ;;  %v1312_v36 = vmul.f32 1.442695, %v1300_v33  ;;  %3357 = vmatmul.msk.bf16.gmra.mxu0 %vm639_vm1, %v2103_v50  ;;  %v3453_v33 = vld [vmem:[%s3990_s16 + $0x10] sm:$0xff] }
 0x54c   : > { %v1329_v40 = vsel %vm692_vm2, %v4211_v35, 0.0  ;;  %1389 = vmatpush.bf16.msra.mxu1 %v3453_v33 }
 0x54d   : > { %3614 = vpow2.f32 %v1312_v36  ;;  %1579 = vmax.xlane.f32.xlu2 %v1578_v39  ;;  %1330 = vadd.xlane.f32.xlu0 %v1329_v40  ;;  %v2421_v36 = vsel %vm639_vm1, %v3449_v34, 0  ;;  %v3473_v39 = vld [vmem:[%s4950_s5 + $0x70] sm:$0xff] }
 0x54e   : > { %2430 = vmatpush.bf16.xpose.msra.mxu0 %v2421_v36  ;;  %2674 = vmatpush.bf16.msrb.mxu2 %v3473_v39 }
 0x550   : > { %v1289_v38 = vpop.xlane.xlu1 %1288 }
 0x551   : > { %v1301_v44 = vsub.f32 %v4149_v42, %v1289_v38  ;;  %v2094_v1 = vpop.f32.mrf.mxu2  ;;  %3412 = vmatmul.msk.bf16.vlgmr.msrb.gmra.mxu2 %vm588_vm0, %v3904_v10 }
 0x552   : > { %v2104_v4 = vpack.c.bf16 %v2094_v1, %v2092_v57 }
 0x553   : > { %v4220_v47 = vpop.eup %3614  ;;  %v1314_v49 = vmul.f32 1.442695, %v1301_v44 }
 0x554   : > { %v1332_v53 = vsel %vm692_vm2, %v4220_v47, 0.0 }
 0x555   : > { %3616 = vpow2.f32 %v1314_v49  ;;  %1582 = vmax.xlane.f32.xlu2 %v1581_v52  ;;  %1333 = vadd.xlane.f32.xlu0 %v1332_v53 }
 0x558   : > { %v1292_v42 = vpop.xlane.xlu2 %1291 }
 0x559   : > { %v1302_v56 = vsub.f32 %v4155_v45, %v1292_v42  ;;  %v1558_v45 = vpop.f32.mrf.mxu0  ;;  %v2097_v41 = vpop.f32.mrf.mxu2 }
 0x55b   : > { %v4232_v58 = vpop.eup %3616  ;;  %v1316_v59 = vmul.f32 1.442695, %v1302_v56  ;;  %3358 = vmatmul.msk.bf16.gmra.mxu0 %vm639_vm1, %v2104_v4 }
 0x55c   : > { %v1335_v60 = vsel %vm692_vm2, %v4232_v58, 0.0 }
 0x55d   : > { %3618 = vpow2.f32 %v1316_v59  ;;  %1336 = vadd.xlane.f32.xlu1 %v1335_v60  ;;  %1585 = vmax.xlane.f32.xlu0 %v1584_v61 }
 0x560   : > { %v1295_v63 = vpop.xlane.xlu0 %1294 }
 0x561   : > { %v1303_v0 = vsub.f32 %v4159_v48, %v1295_v63  ;;  %v4251_v48 = vmul.f32 0.5, %v1558_v45  ;;  %v1838_v14 = vpop.f32.mrf.mxu0  ;;  %v2099_v49 = vpop.f32.mrf.mxu2  ;;  %3413 = vmatmul.msk.bf16.gmra.mxu2 %vm588_vm0, %v3912_v19 }
 0x562   : > { %v4260_v21 = vmul.f32 0.5, %v1838_v14  ;;  %v2105_v50 = vpack.c.bf16 %v2099_v49, %v2097_v41 }
 0x563   : > { %v4241_v2 = vpop.eup %3618  ;;  %v1318_v3 = vmul.f32 1.442695, %v1303_v0  ;;  %v1590_v17 = vsel %vm692_vm2, %v4251_v48, -inf }
 0x564   : > { %v1338_v6 = vsel %vm692_vm2, %v4241_v2, 0.0 }
 0x565   : > { %3620 = vpow2.f32 %v1318_v3  ;;  %1339 = vadd.xlane.f32.xlu1 %v1338_v6  ;;  %1588 = vmax.xlane.f32.xlu0 %v1587_v7 }
 0x568   : > { %v1571_v11 = vpop.xlane.xlu0 %1570 }
 0x569   : > { %v1593_v12 = vsub.f32 %v4163_v51, %v1571_v11  ;;  %v1866_v51 = vsel %vm692_vm2, %v4260_v21, -inf  ;;  %v1840_v25 = vpop.f32.mrf.mxu0  ;;  %v2379_v61 = vpop.f32.mrf.mxu2 }
 0x56a   : > { %v4268_v26 = vmul.f32 0.5, %v1840_v25 }
 0x56b   : > { %v4254_v13 = vpop.eup %3620  ;;  %v1601_v16 = vmul.f32 1.442695, %v1593_v12  ;;  %3359 = vmatmul.msk.bf16.gmra.mxu0 %vm639_vm1, %v2105_v50 }
 0x56c   : > { %v1341_v18 = vsel %vm692_vm2, %v4254_v13, 0.0  ;;  %v1869_v27 = vsel %vm692_vm2, %v4268_v26, -inf }
 0x56d   : > { %3622 = vpow2.f32 %v1601_v16  ;;  %1591 = vmax.xlane.f32.xlu1 %v1590_v17  ;;  %1342 = vadd.xlane.f32.xlu2 %v1341_v18 }
 0x571   : > { %v1843_v29 = vpop.f32.mrf.mxu0  ;;  %v2381_v3 = vpop.f32.mrf.mxu2  ;;  %3414 = vmatmul.msk.bf16.gmra.mxu2 %vm588_vm0, %v3920_v28 }
 0x572   : > { %v4272_v30 = vmul.f32 0.5, %v1843_v29  ;;  %v2399_v4 = vpack.c.bf16 %v2381_v3, %v2379_v61 }
 0x573   : > { %v4262_v22 = vpop.eup %3622 }
 0x574   : > { %v1617_v23 = vsel %vm692_vm2, %v4262_v22, 0.0  ;;  %v1872_v32 = vsel %vm692_vm2, %v4272_v30, -inf }
 0x575   : > { %1867 = vmax.xlane.f32.xlu1 %v1866_v51  ;;  %1618 = vadd.xlane.f32.xlu2 %v1617_v23 }
 0x579   : > { %v1845_v42 = vpop.f32.mrf.mxu0  ;;  %v2384_v23 = vpop.f32.mrf.mxu2 }
 0x57a   : > { %v4302_v12 = vmul.f32 0.5, %v1845_v42 }
 0x57b   : > { %3388 = vmatmul.msk.bf16.vlgmr.msra.gmra.mxu0 %vm639_vm1, %v2399_v4 }
 0x57d   : > { %1870 = vmax.xlane.f32.xlu2 %v1869_v27 }
 0x581   : > { %v2386_v34 = vpop.f32.mrf.mxu2  ;;  %3415 = vmatmul.msk.bf16.gmra.mxu2 %vm588_vm0, %v3928_v37 }
 0x582   : > { %v2400_v36 = vpack.c.bf16 %v2386_v34, %v2384_v23 }
 0x585   : > { %1873 = vmax.xlane.f32.xlu2 %v1872_v32 }
 0x58b   : > { %3389 = vmatmul.msk.bf16.gmra.mxu0 %vm639_vm1, %v2400_v36 }
 0x5a8   : > { %v1322_v40 = vpop.xlane.xlu1 %1321 }
 0x5a9   : > { %3624 = vrcp.f32 %v1322_v40 }
 0x5af   : > { %v3625_v53 = vpop.eup %3624 }
 0x5b0   : > { %v1325_v38 = vpop.xlane.xlu2 %1324  ;;  %v1574_v44 = vpop.xlane.xlu1 %1573  ;;  %v1352_v56 = vmul.f32 %v3625_v53, %v4180_v5 }
 0x5b1   : > { %3626 = vrcp.f32 %v1325_v38  ;;  %v1594_v46 = vsub.f32 %v4185_v9, %v1574_v44  ;;  %v1848_v5 = vpop.f32.mrf.mxu0 }
 0x5b3   : > { %v1603_v52 = vmul.f32 1.442695, %v1594_v46 }
 0x5b5   : > { %3628 = vpow2.f32 %v1603_v52 }
 0x5b7   : > { %v3627_v54 = vpop.eup %3626 }
 0x5b8   : > { %v1353_v57 = vmul.f32 %v3627_v54, %v4190_v15  ;;  %v1328_v10 = vpop.xlane.xlu2 %1327  ;;  %v1577_v59 = vpop.xlane.xlu1 %1576 }
 0x5b9   : > { %v1595_v60 = vsub.f32 %v4196_v20, %v1577_v59  ;;  %v1850_v51 = vpop.f32.mrf.mxu0 }
 0x5ba   : > { %v1360_v63 = vpack.c.bf16 %v1353_v57, %v1352_v56  ;;  %v2389_v56 = vpop.f32.mrf.mxu2 }
 0x5bb   : > { %v4291_v9 = vpop.eup %3628  ;;  %v1605_v45 = vmul.f32 1.442695, %v1595_v60 }
 0x5bc   : > { %3268 = vmatmul.msk.bf16.vlgmr.msra.gmra.mxu1 %vm692_vm2, %v1360_v63  ;;  %v1620_v0 = vsel %vm692_vm2, %v4291_v9, 0.0 }
 0x5bd   : > { %3630 = vpow2.f32 %v1605_v45  ;;  %1621 = vadd.xlane.f32.xlu0 %v1620_v0 }
 0x5be   : > { %3632 = vrcp.f32 %v1328_v10 }
 0x5c0   : > { %v1580_v15 = vpop.xlane.xlu2 %1579  ;;  %v1331_v1 = vpop.xlane.xlu0 %1330 }
 0x5c1   : > { %v1596_v20 = vsub.f32 %v4206_v31, %v1580_v15  ;;  %3634 = vrcp.f32 %v1331_v1  ;;  %v1853_v41 = vpop.f32.mrf.mxu0 }
 0x5c2   : > { %v2391_v45 = vpop.f32.mrf.mxu2 }
 0x5c3   : > { %v4297_v19 = vpop.eup %3630  ;;  %v1607_v6 = vmul.f32 1.442695, %v1596_v20  ;;  %v2401_v0 = vpack.c.bf16 %v2391_v45, %v2389_v56  ;;  %v3454_v45 = vld [vmem:[%s3990_s16 + $0x18] sm:$0xff] }
 0x5c4   : > { %v1623_v7 = vsel %vm692_vm2, %v4297_v19, 0.0  ;;  %v3633_v8 = vpop.eup %3632  ;;  %1686 = vmatpush.bf16.msrb.mxu1 %v3454_v45 }
 0x5c5   : > { %3636 = vpow2.f32 %v1607_v6  ;;  %1624 = vadd.xlane.f32.xlu0 %v1623_v7  ;;  %v1354_v31 = vmul.f32 %v3633_v8, %v4199_v24  ;;  %v1875_v24 = vsel %vm692_vm2, %v4302_v12, -inf  ;;  %3390 = vmatmul.msk.bf16.gmra.mxu0 %vm639_vm1, %v2401_v0  ;;  %v3450_v0 = vld [vmem:[%s3939_s10 + $0x38] sm:$0xff] }
 0x5c7   : > { %v3635_v11 = vpop.eup %3634 }
 0x5c8   : > { %v1583_v14 = vpop.xlane.xlu2 %1582  ;;  %v1334_v16 = vpop.xlane.xlu0 %1333  ;;  %v1355_v17 = vmul.f32 %v3635_v11, %v4211_v35  ;;  %v4316_v35 = vmul.f32 0.5, %v1848_v5 }
 0x5c9   : > { %v1597_v18 = vsub.f32 %v4217_v43, %v1583_v14 }
 0x5ca   : > { %v1361_v25 = vpack.c.bf16 %v1355_v17, %v1354_v31  ;;  %v1878_v44 = vsel %vm692_vm2, %v4316_v35, -inf  ;;  %v2394_v31 = vpop.f32.mrf.mxu2 }
 0x5cb   : > { %v4309_v27 = vpop.eup %3636  ;;  %v1609_v29 = vmul.f32 1.442695, %v1597_v18 }
 0x5cc   : > { %3269 = vmatmul.msk.bf16.gmra.mxu1 %vm692_vm2, %v1361_v25  ;;  %v1626_v32 = vsel %vm692_vm2, %v4309_v27, 0.0 }
 0x5cd   : > { %3638 = vpow2.f32 %v1609_v29  ;;  %1627 = vadd.xlane.f32.xlu1 %v1626_v32  ;;  %1876 = vmax.xlane.f32.xlu0 %v1875_v24 }
 0x5ce   : > { %3640 = vrcp.f32 %v1334_v16 }
 0x5d0   : > { %v1337_v43 = vpop.xlane.xlu1 %1336  ;;  %v1586_v33 = vpop.xlane.xlu0 %1585 }
 0x5d1   : > { %3642 = vrcp.f32 %v1337_v43  ;;  %v1598_v28 = vsub.f32 %v4227_v55, %v1586_v33  ;;  %v4326_v55 = vmul.f32 0.5, %v1850_v51  ;;  %v4359_v51 = vpop.f32.mrf.mxu1 }
 0x5d2   : > { %v2396_v24 = vpop.f32.mrf.mxu2 }
 0x5d3   : > { %v4319_v39 = vpop.eup %3638  ;;  %v1611_v40 = vmul.f32 1.442695, %v1598_v28  ;;  %v1881_v60 = vsel %vm692_vm2, %v4326_v55, -inf  ;;  %v2402_v43 = vpack.c.bf16 %v2396_v24, %v2394_v31 }
 0x5d4   : > { %v1629_v38 = vsel %vm692_vm2, %v4319_v39, 0.0  ;;  %v3641_v46 = vpop.eup %3640 }
 0x5d5   : > { %3644 = vpow2.f32 %v1611_v40  ;;  %1630 = vadd.xlane.f32.xlu1 %v1629_v38  ;;  %1879 = vmax.xlane.f32.xlu0 %v1878_v44  ;;  %v1356_v53 = vmul.f32 %v3641_v46, %v4220_v47 }
 0x5d6   : > { %3391 = vmatmul.msk.bf16.gmra.mxu0 %vm639_vm1, %v2402_v43 }
 0x5d7   : > { %v3643_v49 = vpop.eup %3642 }
 0x5d8   : > { %v1340_v50 = vpop.xlane.xlu1 %1339  ;;  %v1589_v52 = vpop.xlane.xlu0 %1588  ;;  %v1357_v54 = vmul.f32 %v3643_v49, %v4232_v58 }
 0x5d9   : > { %v1599_v42 = vsub.f32 %v4238_v62, %v1589_v52  ;;  %v1855_v58 = vpop.f32.mrf.mxu0  ;;  %v4340_v62 = vmul.f32 0.5, %v1853_v41  ;;  %v4376_v40 = vpop.f32.mrf.mxu1 }
 0x5da   : > { %v1362_v57 = vpack.c.bf16 %v1357_v54, %v1356_v53  ;;  %v4350_v6 = vmul.f32 0.5, %v1855_v58 }
 0x5db   : > { %v4333_v10 = vpop.eup %3644  ;;  %v1613_v59 = vmul.f32 1.442695, %v1599_v42  ;;  %v1884_v1 = vsel %vm692_vm2, %v4340_v62, -inf }
 0x5dc   : > { %3270 = vmatmul.msk.bf16.gmra.mxu1 %vm692_vm2, %v1362_v57  ;;  %v1632_v47 = vsel %vm692_vm2, %v4333_v10, 0.0  ;;  %v1887_v29 = vsel %vm692_vm2, %v4350_v6, -inf }
 0x5dd   : > { %3646 = vpow2.f32 %v1613_v59  ;;  %1882 = vmax.xlane.f32.xlu1 %v1881_v60  ;;  %1633 = vadd.xlane.f32.xlu2 %v1632_v47 }
 0x5de   : > { %3648 = vrcp.f32 %v1340_v50 }
 0x5e0   : > { %v1592_v61 = vpop.xlane.xlu1 %1591  ;;  %v1343_v37 = vpop.xlane.xlu2 %1342 }
 0x5e1   : > { %v1600_v63 = vsub.f32 %v4251_v48, %v1592_v61  ;;  %3650 = vrcp.f32 %v1343_v37  ;;  %v2135_v48 = vpop.f32.mrf.mxu0  ;;  %v4387_v53 = vpop.f32.mrf.mxu1 }
 0x5e3   : > { %v4343_v5 = vpop.eup %3646  ;;  %v1615_v15 = vmul.f32 1.442695, %v1600_v63 }
 0x5e4   : > { %v1635_v20 = vsel %vm692_vm2, %v4343_v5, 0.0  ;;  %v3649_v3 = vpop.eup %3648 }
 0x5e5   : > { %3652 = vpow2.f32 %v1615_v15  ;;  %1885 = vmax.xlane.f32.xlu1 %v1884_v1  ;;  %1636 = vadd.xlane.f32.xlu2 %v1635_v20  ;;  %v1358_v11 = vmul.f32 %v3649_v3, %v4241_v2  ;;  %v4366_v2 = vmul.f32 0.5, %v2135_v48  ;;  %v2718_v15 = vsel %vm639_vm1, %v3450_v0, 0  ;;  %v570_v20 = vld [vmem:[%s4951_s6 + $0x4] sm:$0x3] }
 0x5e6   : > { %2727 = vmatpush.bf16.xpose.msrb.mxu0 %v2718_v15  ;;  %v1428_v3 = vsel %vm1093_vm3, %v570_v20, 0 }
 0x5e7   : > { %v3651_v4 = vpop.eup %3650  ;;  %v2163_v36 = vsel %vm692_vm2, %v4366_v2, -inf  ;;  %1437 = vmatpush.bf16.msra.mxu3 %v1428_v3 }
 0x5e8   : > { %v1868_v7 = vpop.xlane.xlu1 %1867  ;;  %v4352_v8 = vpop.xlane.xlu2 %1618  ;;  %v1359_v14 = vmul.f32 %v3651_v4, %v4254_v13 }
 0x5e9   : > { %v1890_v16 = vsub.f32 %v4260_v21, %v1868_v7  ;;  %v2137_v21 = vpop.f32.mrf.mxu0  ;;  %v4399_v60 = vpop.f32.mrf.mxu1 }
 0x5ea   : > { %v1363_v17 = vpack.c.bf16 %v1359_v14, %v1358_v11  ;;  %v4378_v41 = vmul.f32 0.5, %v2137_v21 }
 0x5eb   : > { %v4357_v18 = vpop.eup %3652  ;;  %v1898_v23 = vmul.f32 1.442695, %v1890_v16 }
 0x5ec   : > { %3271 = vmatmul.msk.bf16.gmra.mxu1 %vm692_vm2, %v1363_v17  ;;  %v1638_v25 = vsel %vm692_vm2, %v4357_v18, 0.0  ;;  %v2166_v50 = vsel %vm692_vm2, %v4378_v41, -inf }
 0x5ed   : > { %3654 = vpow2.f32 %v1898_v23  ;;  %1639 = vadd.xlane.f32.xlu0 %v1638_v25  ;;  %1888 = vmax.xlane.f32.xlu2 %v1887_v29  ;;  %v2676_v29 = vpop.f32.mrf.mxu2 }
 0x5f0   : > { %v1871_v13 = vpop.xlane.xlu2 %1870 }
 0x5f1   : > { %v1891_v32 = vsub.f32 %v4268_v26, %v1871_v13  ;;  %v2140_v46 = vpop.f32.mrf.mxu0  ;;  %v4405_v37 = vpop.f32.mrf.mxu1 }
 0x5f2   : > { %v4389_v54 = vmul.f32 0.5, %v2140_v46 }
 0x5f3   : > { %v4369_v33 = vpop.eup %3654  ;;  %v1900_v28 = vmul.f32 1.442695, %v1891_v32 }
 0x5f4   : > { %v1914_v34 = vsel %vm692_vm2, %v4369_v33, 0.0 }
 0x5f5   : > { %3656 = vpow2.f32 %v1900_v28  ;;  %1915 = vadd.xlane.f32.xlu0 %v1914_v34  ;;  %2164 = vmax.xlane.f32.xlu2 %v2163_v36  ;;  %v2678_v43 = vpop.f32.mrf.mxu2 }
 0x5f6   : > { %v2696_v34 = vpack.c.bf16 %v2678_v43, %v2676_v29 }
 0x5f8   : > { %v1874_v26 = vpop.xlane.xlu2 %1873  ;;  %3420 = vmatmul.msk.bf16.vlgmr.msrb.gmra.mxu0 %vm639_vm1, %v2696_v34 }
 0x5f9   : > { %v1892_v38 = vsub.f32 %v4272_v30, %v1874_v26  ;;  %v2169_v30 = vsel %vm692_vm2, %v4389_v54, -inf  ;;  %v2142_v57 = vpop.f32.mrf.mxu0  ;;  %v4412_v1 = vpop.f32.mrf.mxu1 }
 0x5fa   : > { %v4397_v59 = vmul.f32 0.5, %v2142_v57 }
 0x5fb   : > { %v4381_v44 = vpop.eup %3656  ;;  %v1902_v49 = vmul.f32 1.442695, %v1892_v38 }
 0x5fc   : > { %v1917_v52 = vsel %vm692_vm2, %v4381_v44, 0.0  ;;  %v2172_v47 = vsel %vm692_vm2, %v4397_v59, -inf }
 0x5fd   : > { %3658 = vpow2.f32 %v1902_v49  ;;  %2167 = vmax.xlane.f32.xlu0 %v2166_v50  ;;  %1918 = vadd.xlane.f32.xlu1 %v1917_v52 }
 0x5fe   : > { %3660 = vrcp.f32 %v4352_v8 }
 0x601   : > { %v2145_v58 = vpop.f32.mrf.mxu0  ;;  %v4418_v4 = vpop.f32.mrf.mxu1 }
 0x602   : > { %v4403_v61 = vmul.f32 0.5, %v2145_v58 }
 0x603   : > { %v4391_v42 = vpop.eup %3658 }
 0x604   : > { %v1920_v56 = vsel %vm692_vm2, %v4391_v42, 0.0  ;;  %v2175_v63 = vsel %vm692_vm2, %v4403_v61, -inf  ;;  %v3661_v11 = vpop.eup %3660 }
 0x605   : > { %2170 = vmax.xlane.f32.xlu0 %v2169_v30  ;;  %1921 = vadd.xlane.f32.xlu1 %v1920_v56  ;;  %v1649_v16 = vmul.f32 %v3661_v11, %v4262_v22  ;;  %v2681_v30 = vpop.f32.mrf.mxu2 }
 0x609   : > { %v4421_v7 = vpop.f32.mrf.mxu1  ;;  %v2147_v36 = vpop.f32.mrf.mxu0 }
 0x60d   : > { %2173 = vmax.xlane.f32.xlu1 %v2172_v47  ;;  %v2683_v0 = vpop.f32.mrf.mxu2 }
 0x60e   : > { %v2697_v3 = vpack.c.bf16 %v2683_v0, %v2681_v30 }
 0x610   : > { %3421 = vmatmul.msk.bf16.gmra.mxu0 %vm639_vm1, %v2697_v3 }
 0x615   : > { %2176 = vmax.xlane.f32.xlu1 %v2175_v63 }
 0x630   : > { %v1622_v48 = vpop.xlane.xlu0 %1621 }
 0x631   : > { %3662 = vrcp.f32 %v1622_v48 }
 0x637   : > { %v3663_v14 = vpop.eup %3662 }
 0x638   : > { %v1650_v31 = vmul.f32 %v3663_v14, %v4291_v9  ;;  %v1625_v17 = vpop.xlane.xlu0 %1624 }
 0x639   : > { %v1391_v23 = vpop.f32.mrf.mxu1  ;;  %3664 = vrcp.f32 %v1625_v17 }
 0x63a   : > { %v1657_v25 = vpack.c.bf16 %v1650_v31, %v1649_v16  ;;  %v4445_v16 = vmul.f32 0.5, %v2147_v36 }
 0x63c   : > { %3300 = vmatmul.msk.bf16.vlgmr.msrb.gmra.mxu1 %vm692_vm2, %v1657_v25 }
 0x63f   : > { %v3665_v22 = vpop.eup %3664 }
 0x640   : > { %v1628_v13 = vpop.xlane.xlu1 %1627  ;;  %v1877_v21 = vpop.xlane.xlu0 %1876  ;;  %v1651_v26 = vmul.f32 %v3665_v22, %v4297_v19 }
 0x641   : > { %3666 = vrcp.f32 %v1628_v13  ;;  %v1893_v8 = vsub.f32 %v4302_v12, %v1877_v21  ;;  %v1393_v32 = vpop.f32.mrf.mxu1  ;;  %v2150_v19 = vpop.f32.mrf.mxu0 }
 0x642   : > { %v1411_v24 = vpack.c.bf16 %v1393_v32, %v1391_v23  ;;  %v2686_v32 = vpop.f32.mrf.mxu2 }
 0x643   : > { %v1904_v28 = vmul.f32 1.442695, %v1893_v8 }
 0x644   : > { %3272 = vmatmul.msk.bf16.vlgmr.msra.gmra.mxu3 %vm639_vm1, %v1411_v24 }
 0x645   : > { %3668 = vpow2.f32 %v1904_v28 }
 0x647   : > { %v3667_v9 = vpop.eup %3666 }
 0x648   : > { %v1652_v38 = vmul.f32 %v3667_v9, %v4309_v27  ;;  %v1631_v46 = vpop.xlane.xlu1 %1630  ;;  %v1880_v49 = vpop.xlane.xlu0 %1879 }
 0x649   : > { %v1894_v12 = vsub.f32 %v4316_v35, %v1880_v49  ;;  %v1396_v50 = vpop.f32.mrf.mxu1  ;;  %v2152_v21 = vpop.f32.mrf.mxu0 }
 0x64a   : > { %v1658_v52 = vpack.c.bf16 %v1652_v38, %v1651_v26  ;;  %v2688_v26 = vpop.f32.mrf.mxu2 }
 0x64b   : > { %v4432_v56 = vpop.eup %3668  ;;  %v1906_v57 = vmul.f32 1.442695, %v1894_v12  ;;  %v2698_v12 = vpack.c.bf16 %v2688_v26, %v2686_v32 }
 0x64c   : > { %3301 = vmatmul.msk.bf16.gmra.mxu1 %vm692_vm2, %v1658_v52  ;;  %v1923_v47 = vsel %vm692_vm2, %v4432_v56, 0.0 }
 0x64d   : > { %3670 = vpow2.f32 %v1906_v57  ;;  %1924 = vadd.xlane.f32.xlu2 %v1923_v47  ;;  %3422 = vmatmul.msk.bf16.gmra.mxu0 %vm639_vm1, %v2698_v12  ;;  %v4469_v47 = vmul.f32 0.5, %v2152_v21 }
 0x64e   : > { %3672 = vrcp.f32 %v1631_v46 }
 0x650   : > { %v1883_v27 = vpop.xlane.xlu1 %1882  ;;  %v1634_v58 = vpop.xlane.xlu2 %1633 }
 0x651   : > { %v1895_v35 = vsub.f32 %v4326_v55, %v1883_v27  ;;  %3674 = vrcp.f32 %v1634_v58  ;;  %v1398_v63 = vpop.f32.mrf.mxu1  ;;  %v3455_v55 = vld [vmem:[%s3990_s16 + $0x20] sm:$0xff]  ;;  %v2432_v49 = vpop.f32.mrf.mxu0 }
 0x652   : > { %v1412_v45 = vpack.c.bf16 %v1398_v63, %v1396_v50  ;;  %1983 = vmatpush.bf16.msra.mxu1 %v3455_v55  ;;  %v2691_v0 = vpop.f32.mrf.mxu2 }
 0x653   : > { %v4438_v15 = vpop.eup %3670  ;;  %v1908_v20 = vmul.f32 1.442695, %v1895_v35 }
 0x654   : > { %3273 = vmatmul.msk.bf16.gmra.mxu3 %vm639_vm1, %v1412_v45  ;;  %v1926_v48 = vsel %vm692_vm2, %v4438_v15, 0.0  ;;  %v3673_v11 = vpop.eup %3672 }
 0x655   : > { %3676 = vpow2.f32 %v1908_v20  ;;  %1927 = vadd.xlane.f32.xlu2 %v1926_v48  ;;  %v1653_v31 = vmul.f32 %v3673_v11, %v4319_v39  ;;  %v2178_v39 = vsel %vm692_vm2, %v4445_v16, -inf  ;;  %v2184_v48 = vsel %vm692_vm2, %v4469_v47, -inf }
 0x657   : > { %v3675_v14 = vpop.eup %3674 }
 0x658   : > { %v1654_v17 = vmul.f32 %v3675_v14, %v4333_v10  ;;  %v1886_v23 = vpop.xlane.xlu1 %1885  ;;  %v1637_v25 = vpop.xlane.xlu2 %1636  ;;  %v4457_v10 = vmul.f32 0.5, %v2150_v19 }
 0x659   : > { %v1896_v29 = vsub.f32 %v4340_v62, %v1886_v23  ;;  %v1401_v13 = vpop.f32.mrf.mxu1 }
 0x65a   : > { %v1659_v8 = vpack.c.bf16 %v1654_v17, %v1653_v31  ;;  %v2181_v52 = vsel %vm692_vm2, %v4457_v10, -inf  ;;  %v2693_v23 = vpop.f32.mrf.mxu2 }
 0x65b   : > { %v4450_v24 = vpop.eup %3676  ;;  %v1910_v43 = vmul.f32 1.442695, %v1896_v29 }
 0x65c   : > { %3302 = vmatmul.msk.bf16.gmra.mxu1 %vm692_vm2, %v1659_v8  ;;  %v1929_v28 = vsel %vm692_vm2, %v4450_v24, 0.0 }
 0x65d   : > { %3678 = vpow2.f32 %v1910_v43  ;;  %1930 = vadd.xlane.f32.xlu0 %v1929_v28  ;;  %2179 = vmax.xlane.f32.xlu2 %v2178_v39 }
 0x65e   : > { %3680 = vrcp.f32 %v1637_v25 }
 0x660   : > { %v1889_v62 = vpop.xlane.xlu2 %1888  ;;  %v1640_v34 = vpop.xlane.xlu0 %1639 }
 0x661   : > { %v1897_v22 = vsub.f32 %v4350_v6, %v1889_v62  ;;  %3682 = vrcp.f32 %v1640_v34  ;;  %v1403_v9 = vpop.f32.mrf.mxu1 }
 0x662   : > { %v1413_v36 = vpack.c.bf16 %v1403_v9, %v1401_v13  ;;  %v2699_v13 = vpack.c.bf16 %v2693_v23, %v2691_v0  ;;  %v4495_v9 = vpop.f32.mrf.mxu3 }
 0x663   : > { %v4460_v38 = vpop.eup %3678  ;;  %v1912_v46 = vmul.f32 1.442695, %v1897_v22 }
 0x664   : > { %3274 = vmatmul.msk.bf16.gmra.mxu3 %vm639_vm1, %v1413_v36  ;;  %v1932_v50 = vsel %vm692_vm2, %v4460_v38, 0.0  ;;  %v3681_v30 = vpop.eup %3680  ;;  %3423 = vmatmul.msk.bf16.gmra.mxu0 %vm639_vm1, %v2699_v13  ;;  %v571_v13 = vld [vmem:[%s4951_s6 + $0x6] sm:$0x3] }
 0x665   : > { %3684 = vpow2.f32 %v1912_v46  ;;  %1933 = vadd.xlane.f32.xlu0 %v1932_v50  ;;  %2182 = vmax.xlane.f32.xlu2 %v2181_v52  ;;  %v1655_v57 = vmul.f32 %v3681_v30, %v4343_v5 }
 0x667   : > { %v3683_v6 = vpop.eup %3682 }
 0x668   : > { %v1656_v19 = vmul.f32 %v3683_v6, %v4357_v18  ;;  %v2165_v27 = vpop.xlane.xlu2 %2164  ;;  %v1916_v58 = vpop.xlane.xlu0 %1915 }
 0x669   : > { %v2187_v35 = vsub.f32 %v4366_v2, %v2165_v27  ;;  %v1406_v63 = vpop.f32.mrf.mxu1  ;;  %v2434_v18 = vpop.f32.mrf.mxu0  ;;  %v4480_v2 = vmul.f32 0.5, %v2432_v49 }
 0x66a   : > { %v1660_v45 = vpack.c.bf16 %v1656_v19, %v1655_v57  ;;  %v4492_v39 = vmul.f32 0.5, %v2434_v18  ;;  %v4510_v6 = vpop.f32.mrf.mxu3 }
 0x66b   : > { %v4473_v20 = vpop.eup %3684  ;;  %v2195_v3 = vmul.f32 1.442695, %v2187_v35  ;;  %v2460_v21 = vsel %vm692_vm2, %v4480_v2, -inf }
 0x66c   : > { %3303 = vmatmul.msk.bf16.gmra.mxu1 %vm692_vm2, %v1660_v45  ;;  %v1935_v5 = vsel %vm692_vm2, %v4473_v20, 0.0  ;;  %v2463_v12 = vsel %vm692_vm2, %v4492_v39, -inf }
 0x66d   : > { %3686 = vpow2.f32 %v2195_v3  ;;  %2185 = vmax.xlane.f32.xlu0 %v2184_v48  ;;  %1936 = vadd.xlane.f32.xlu1 %v1935_v5 }
 0x66e   : > { %3688 = vrcp.f32 %v1916_v58 }
 0x670   : > { %v1919_v11 = vpop.xlane.xlu1 %1918  ;;  %v2168_v14 = vpop.xlane.xlu0 %2167 }
 0x671   : > { %3690 = vrcp.f32 %v1919_v11  ;;  %v2188_v55 = vsub.f32 %v4378_v41, %v2168_v14  ;;  %v1408_v31 = vpop.f32.mrf.mxu1  ;;  %v2437_v43 = vpop.f32.mrf.mxu0 }
 0x672   : > { %v1414_v17 = vpack.c.bf16 %v1408_v31, %v1406_v63  ;;  %v1155_v5 = vpop.f32.mrf.mxu3 }
 0x673   : > { %v4483_v25 = vpop.eup %3686  ;;  %v2197_v29 = vmul.f32 1.442695, %v2188_v55 }
 0x674   : > { %3275 = vmatmul.msk.bf16.gmra.mxu3 %vm639_vm1, %v1414_v17  ;;  %v2211_v8 = vsel %vm692_vm2, %v4483_v25, 0.0  ;;  %v3689_v32 = vpop.eup %3688 }
 0x675   : > { %3692 = vpow2.f32 %v2197_v29  ;;  %2461 = vmax.xlane.f32.xlu0 %v2460_v21  ;;  %2212 = vadd.xlane.f32.xlu1 %v2211_v8  ;;  %v1946_v28 = vmul.f32 %v3689_v32, %v4369_v33  ;;  %v1725_v8 = vsel %vm1093_vm3, %v571_v13, 0 }
 0x676   : > { %1734 = vmatpush.bf16.msrb.mxu3 %v1725_v8 }
 0x677   : > { %v3691_v41 = vpop.eup %3690 }
 0x678   : > { %v1947_v62 = vmul.f32 %v3691_v41, %v4381_v44  ;;  %v1922_v34 = vpop.xlane.xlu1 %1921  ;;  %v2171_v22 = vpop.xlane.xlu0 %2170  ;;  %v4505_v44 = vmul.f32 0.5, %v2437_v43 }
 0x679   : > { %v2189_v36 = vsub.f32 %v4389_v54, %v2171_v22  ;;  %v2439_v52 = vpop.f32.mrf.mxu0 }
 0x67a   : > { %v1954_v26 = vpack.c.bf16 %v1947_v62, %v1946_v28  ;;  %v2466_v19 = vsel %vm692_vm2, %v4505_v44, -inf  ;;  %v4516_v58 = vmul.f32 0.5, %v2439_v52  ;;  %v4533_v31 = vpop.f32.mrf.mxu3 }
 0x67b   : > { %v4498_v46 = vpop.eup %3692  ;;  %v2199_v49 = vmul.f32 1.442695, %v2189_v36 }
 0x67c   : > { %3332 = vmatmul.msk.bf16.vlgmr.msra.gmra.mxu1 %vm692_vm2, %v1954_v26  ;;  %v2214_v33 = vsel %vm692_vm2, %v4498_v46, 0.0  ;;  %v2469_v48 = vsel %vm692_vm2, %v4516_v58, -inf }
 0x67d   : > { %3694 = vpow2.f32 %v2199_v49  ;;  %2464 = vmax.xlane.f32.xlu1 %v2463_v12  ;;  %2215 = vadd.xlane.f32.xlu2 %v2214_v33  ;;  %v1151_v33 = vadd.f32 %v4495_v9, %v4359_v51 }
 0x680   : > { %v2174_v50 = vpop.xlane.xlu1 %2173 }
 0x681   : > { %v2190_v54 = vsub.f32 %v4397_v59, %v2174_v50  ;;  %v2442_v45 = vpop.f32.mrf.mxu0 }
 0x682   : > { %v4525_v18 = vmul.f32 0.5, %v2442_v45  ;;  %v4545_v32 = vpop.f32.mrf.mxu3 }
 0x683   : > { %v4508_v30 = vpop.eup %3694  ;;  %v2201_v57 = vmul.f32 1.442695, %v2190_v54 }
 0x684   : > { %v2217_v27 = vsel %vm692_vm2, %v4508_v30, 0.0  ;;  %v2472_v14 = vsel %vm692_vm2, %v4525_v18, -inf }
 0x685   : > { %3696 = vpow2.f32 %v2201_v57  ;;  %2467 = vmax.xlane.f32.xlu1 %v2466_v19  ;;  %2218 = vadd.xlane.f32.xlu2 %v2217_v27 }
 0x688   : > { %v2177_v35 = vpop.xlane.xlu1 %2176 }
 0x689   : > { %v2191_v63 = vsub.f32 %v4403_v61, %v2177_v35  ;;  %v2444_v55 = vpop.f32.mrf.mxu0 }
 0x68a   : > { %v4535_v17 = vmul.f32 0.5, %v2444_v55  ;;  %v4549_v43 = vpop.f32.mrf.mxu3 }
 0x68b   : > { %v4519_v59 = vpop.eup %3696  ;;  %v2203_v0 = vmul.f32 1.442695, %v2191_v63 }
 0x68c   : > { %v2220_v3 = vsel %vm692_vm2, %v4519_v59, 0.0  ;;  %v2475_v23 = vsel %vm692_vm2, %v4535_v17, -inf }
 0x68d   : > { %3698 = vpow2.f32 %v2203_v0  ;;  %2221 = vadd.xlane.f32.xlu0 %v2220_v3  ;;  %2470 = vmax.xlane.f32.xlu2 %v2469_v48  ;;  %v1156_v48 = vadd.f32 %v1155_v5, %v4387_v53 }
 0x68e   : > { %3700 = vrcp.f32 %v1922_v34 }
 0x691   : > { %v2447_v29 = vpop.f32.mrf.mxu0 }
 0x692   : > { %v4542_v21 = vmul.f32 0.5, %v2447_v29  ;;  %v4551_v28 = vpop.f32.mrf.mxu3 }
 0x693   : > { %v4527_v11 = vpop.eup %3698 }
 0x694   : > { %v2223_v61 = vsel %vm692_vm2, %v4527_v11, 0.0  ;;  %v2478_v41 = vsel %vm692_vm2, %v4542_v21, -inf  ;;  %v3701_v12 = vpop.eup %3700 }
 0x695   : > { %2224 = vadd.xlane.f32.xlu0 %v2223_v61  ;;  %2473 = vmax.xlane.f32.xlu2 %v2472_v14  ;;  %v1948_v54 = vmul.f32 %v3701_v12, %v4391_v42 }
 0x699   : > { %v2449_v14 = vpop.f32.mrf.mxu0 }
 0x69a   : > { %v4553_v22 = vpop.f32.mrf.mxu3 }
 0x69d   : > { %2476 = vmax.xlane.f32.xlu0 %v2475_v23  ;;  %v3456_v23 = vld [vmem:[%s3990_s16 + $0x28] sm:$0xff] }
 0x69e   : > { %2280 = vmatpush.bf16.msrb.mxu1 %v3456_v23 }
 0x6a5   : > { %2479 = vmax.xlane.f32.xlu0 %v2478_v41 }
 0x6b9   : > { %v1688_v62 = vpop.f32.mrf.mxu1 }
 0x6c0   : > { %v1925_v36 = vpop.xlane.xlu2 %1924 }
 0x6c1   : > { %3702 = vrcp.f32 %v1925_v36  ;;  %v1690_v26 = vpop.f32.mrf.mxu1 }
 0x6c2   : > { %v1708_v49 = vpack.c.bf16 %v1690_v26, %v1688_v62 }
 0x6c4   : > { %3304 = vmatmul.msk.bf16.vlgmr.msrb.gmra.mxu3 %vm639_vm1, %v1708_v49 }
 0x6c7   : > { %v3703_v50 = vpop.eup %3702  ;;  %v1439_v52 = vpop.f32.mrf.mxu3 }
 0x6c8   : > { %v1949_v57 = vmul.f32 %v3703_v50, %v4432_v56  ;;  %v4560_v19 = vadd.f32 %v1439_v52, %v1151_v33  ;;  %v1928_v27 = vpop.xlane.xlu2 %1927 }
 0x6c9   : > { %v1693_v34 = vpop.f32.mrf.mxu1  ;;  %3704 = vrcp.f32 %v1928_v27 }
 0x6ca   : > { %v1955_v35 = vpack.c.bf16 %v1949_v57, %v1948_v54 }
 0x6cc   : > { %3333 = vmatmul.msk.bf16.gmra.mxu1 %vm692_vm2, %v1955_v35 }
 0x6cf   : > { %v4563_v63 = vpop.f32.mrf.mxu3  ;;  %v3705_v56 = vpop.eup %3704 }
 0x6d0   : > { %v2180_v45 = vpop.xlane.xlu2 %2179  ;;  %v1931_v0 = vpop.xlane.xlu0 %1930  ;;  %v1950_v29 = vmul.f32 %v3705_v56, %v4438_v15 }
 0x6d1   : > { %v2192_v51 = vsub.f32 %v4445_v16, %v2180_v45  ;;  %3706 = vrcp.f32 %v1931_v0  ;;  %v1695_v9 = vpop.f32.mrf.mxu1  ;;  %v1161_v0 = vadd.f32 %v4545_v32, %v4405_v37 }
 0x6d2   : > { %v1709_v42 = vpack.c.bf16 %v1695_v9, %v1693_v34 }
 0x6d3   : > { %v2205_v3 = vmul.f32 1.442695, %v2192_v51 }
 0x6d4   : > { %3305 = vmatmul.msk.bf16.gmra.mxu3 %vm639_vm1, %v1709_v42 }
 0x6d5   : > { %3708 = vpow2.f32 %v2205_v3 }
 0x6d7   : > { %v3707_v61 = vpop.eup %3706  ;;  %v1444_v55 = vpop.f32.mrf.mxu3 }
 0x6d8   : > { %v1951_v13 = vmul.f32 %v3707_v61, %v4450_v24  ;;  %v4571_v8 = vadd.f32 %v1444_v55, %v1156_v48  ;;  %v2183_v16 = vpop.xlane.xlu2 %2182  ;;  %v1934_v41 = vpop.xlane.xlu0 %1933 }
 0x6d9   : > { %v2193_v62 = vsub.f32 %v4457_v10, %v2183_v16  ;;  %v1698_v36 = vpop.f32.mrf.mxu1  ;;  %v2729_v24 = vpop.f32.mrf.mxu0  ;;  %v572_v10 = vld [vmem:[%s4951_s6 + $0x8] sm:$0x3] }
 0x6da   : > { %v1956_v26 = vpack.c.bf16 %v1951_v13, %v1950_v29  ;;  %v2022_v50 = vsel %vm1093_vm3, %v572_v10, 0 }
 0x6db   : > { %v4574_v49 = vpop.eup %3708  ;;  %v2207_v53 = vmul.f32 1.442695, %v2193_v62  ;;  %2031 = vmatpush.bf16.msra.mxu3 %v2022_v50 }
 0x6dc   : > { %3334 = vmatmul.msk.bf16.gmra.mxu1 %vm692_vm2, %v1956_v26  ;;  %v2226_v5 = vsel %vm692_vm2, %v4574_v49, 0.0 }
 0x6dd   : > { %3710 = vpow2.f32 %v2207_v53  ;;  %2227 = vadd.xlane.f32.xlu1 %v2226_v5 }
 0x6de   : > { %3712 = vrcp.f32 %v1934_v41 }
 0x6df   : > { %v4579_v15 = vpop.f32.mrf.mxu3 }
 0x6e0   : > { %v1937_v12 = vpop.xlane.xlu1 %1936  ;;  %v2186_v33 = vpop.xlane.xlu0 %2185 }
 0x6e1   : > { %3714 = vrcp.f32 %v1937_v12  ;;  %v2194_v52 = vsub.f32 %v4469_v47, %v2186_v33  ;;  %v1700_v54 = vpop.f32.mrf.mxu1  ;;  %v4593_v47 = vmul.f32 0.5, %v2449_v14  ;;  %v2731_v29 = vpop.f32.mrf.mxu0 }
 0x6e2   : > { %v1710_v57 = vpack.c.bf16 %v1700_v54, %v1698_v36 }
 0x6e3   : > { %v4586_v27 = vpop.eup %3710  ;;  %v2209_v34 = vmul.f32 1.442695, %v2194_v52  ;;  %v2481_v32 = vsel %vm692_vm2, %v4593_v47, -inf }
 0x6e4   : > { %3306 = vmatmul.msk.bf16.gmra.mxu3 %vm639_vm1, %v1710_v57  ;;  %v2229_v35 = vsel %vm692_vm2, %v4586_v27, 0.0  ;;  %v3713_v45 = vpop.eup %3712  ;;  %v4622_v57 = vmul.f32 0.5, %v2731_v29 }
 0x6e5   : > { %3716 = vpow2.f32 %v2209_v34  ;;  %2230 = vadd.xlane.f32.xlu1 %v2229_v35  ;;  %v1952_v42 = vmul.f32 %v3713_v45, %v4460_v38 }
 0x6e7   : > { %v3715_v51 = vpop.eup %3714  ;;  %v1449_v9 = vpop.f32.mrf.mxu3 }
 0x6e8   : > { %v1953_v3 = vmul.f32 %v3715_v51, %v4473_v20  ;;  %v4597_v56 = vadd.f32 %v1449_v9, %v1161_v0  ;;  %v2213_v48 = vpop.xlane.xlu1 %2212  ;;  %v2462_v61 = vpop.xlane.xlu0 %2461 }
 0x6e9   : > { %v2484_v55 = vsub.f32 %v4480_v2, %v2462_v61  ;;  %v1703_v23 = vpop.f32.mrf.mxu1  ;;  %v4609_v2 = vmul.f32 0.5, %v2729_v24  ;;  %v2734_v10 = vpop.f32.mrf.mxu0 }
 0x6ea   : > { %v1957_v13 = vpack.c.bf16 %v1953_v3, %v1952_v42 }
 0x6eb   : > { %v4600_v16 = vpop.eup %3716  ;;  %v2492_v37 = vmul.f32 1.442695, %v2484_v55  ;;  %v2757_v12 = vsel %vm692_vm2, %v4609_v2, -inf }
 0x6ec   : > { %3335 = vmatmul.msk.bf16.gmra.mxu1 %vm692_vm2, %v1957_v13  ;;  %v2232_v38 = vsel %vm692_vm2, %v4600_v16, 0.0 }
 0x6ed   : > { %3718 = vpow2.f32 %v2492_v37  ;;  %2482 = vmax.xlane.f32.xlu1 %v2481_v32  ;;  %2233 = vadd.xlane.f32.xlu2 %v2232_v38 }
 0x6ee   : > { %3720 = vrcp.f32 %v2213_v48 }
 0x6ef   : > { %v4607_v20 = vpop.f32.mrf.mxu3 }
 0x6f0   : > { %v2465_v14 = vpop.xlane.xlu1 %2464  ;;  %v2216_v41 = vpop.xlane.xlu2 %2215 }
 0x6f1   : > { %v2485_v62 = vsub.f32 %v4492_v39, %v2465_v14  ;;  %3722 = vrcp.f32 %v2216_v41  ;;  %v1705_v36 = vpop.f32.mrf.mxu1  ;;  %v1166_v39 = vadd.f32 %v4551_v28, %v4418_v4  ;;  %v4635_v28 = vmul.f32 0.5, %v2734_v10 }
 0x6f2   : > { %v1711_v26 = vpack.c.bf16 %v1705_v36, %v1703_v23 }
 0x6f3   : > { %v4612_v53 = vpop.eup %3718  ;;  %v2494_v5 = vmul.f32 1.442695, %v2485_v62  ;;  %v2763_v38 = vsel %vm692_vm2, %v4635_v28, -inf }
 0x6f4   : > { %3307 = vmatmul.msk.bf16.gmra.mxu3 %vm639_vm1, %v1711_v26  ;;  %v2508_v24 = vsel %vm692_vm2, %v4612_v53, 0.0  ;;  %v3721_v33 = vpop.eup %3720 }
 0x6f5   : > { %3724 = vpow2.f32 %v2494_v5  ;;  %2758 = vmax.xlane.f32.xlu1 %v2757_v12  ;;  %2509 = vadd.xlane.f32.xlu2 %v2508_v24  ;;  %v2243_v54 = vmul.f32 %v3721_v33, %v4483_v25  ;;  %v2760_v25 = vsel %vm692_vm2, %v4622_v57, -inf }
 0x6f7   : > { %v3723_v50 = vpop.eup %3722  ;;  %v1454_v52 = vpop.f32.mrf.mxu3 }
 0x6f8   : > { %v2244_v34 = vmul.f32 %v3723_v50, %v4498_v46  ;;  %v4625_v35 = vadd.f32 %v1454_v52, %v1166_v39  ;;  %v2468_v45 = vpop.xlane.xlu1 %2467  ;;  %v2219_v0 = vpop.xlane.xlu2 %2218 }
 0x6f9   : > { %v2486_v51 = vsub.f32 %v4505_v44, %v2468_v45  ;;  %v1985_v9 = vpop.f32.mrf.mxu1  ;;  %v2736_v46 = vpop.f32.mrf.mxu0 }
 0x6fa   : > { %v2251_v42 = vpack.c.bf16 %v2244_v34, %v2243_v54  ;;  %v4646_v36 = vmul.f32 0.5, %v2736_v46 }
 0x6fb   : > { %v4628_v3 = vpop.eup %3724  ;;  %v2496_v48 = vmul.f32 1.442695, %v2486_v51 }
 0x6fc   : > { %3364 = vmatmul.msk.bf16.vlgmr.msrb.gmra.mxu1 %vm692_vm2, %v2251_v42  ;;  %v2511_v4 = vsel %vm692_vm2, %v4628_v3, 0.0  ;;  %v2766_v50 = vsel %vm692_vm2, %v4646_v36, -inf }
 0x6fd   : > { %3726 = vpow2.f32 %v2496_v48  ;;  %2512 = vadd.xlane.f32.xlu0 %v2511_v4  ;;  %2761 = vmax.xlane.f32.xlu2 %v2760_v25 }
 0x6fe   : > { %3728 = vrcp.f32 %v2219_v0 }
 0x700   : > { %v2471_v44 = vpop.xlane.xlu2 %2470  ;;  %v2222_v61 = vpop.xlane.xlu0 %2221 }
 0x701   : > { %v2487_v55 = vsub.f32 %v4516_v58, %v2471_v44  ;;  %3730 = vrcp.f32 %v2222_v61  ;;  %v1987_v23 = vpop.f32.mrf.mxu1  ;;  %v2739_v58 = vpop.f32.mrf.mxu0 }
 0x702   : > { %v2005_v29 = vpack.c.bf16 %v1987_v23, %v1985_v9 }
 0x703   : > { %v4638_v13 = vpop.eup %3726  ;;  %v2498_v37 = vmul.f32 1.442695, %v2487_v55 }
 0x704   : > { %3336 = vmatmul.msk.bf16.vlgmr.msra.gmra.mxu3 %vm639_vm1, %v2005_v29  ;;  %v2514_v32 = vsel %vm692_vm2, %v4638_v13, 0.0  ;;  %v3729_v14 = vpop.eup %3728 }
 0x705   : > { %3732 = vpow2.f32 %v2498_v37  ;;  %2515 = vadd.xlane.f32.xlu0 %v2514_v32  ;;  %2764 = vmax.xlane.f32.xlu2 %v2763_v38  ;;  %v2245_v62 = vmul.f32 %v3729_v14, %v4508_v30  ;;  %v4687_v38 = vpop.f32.mrf.mxu3 }
 0x707   : > { %v3731_v41 = vpop.eup %3730 }
 0x708   : > { %v2246_v26 = vmul.f32 %v3731_v41, %v4519_v59  ;;  %v2474_v5 = vpop.xlane.xlu2 %2473  ;;  %v2225_v10 = vpop.xlane.xlu0 %2224  ;;  %v4657_v59 = vmul.f32 0.5, %v2739_v58 }
 0x709   : > { %v2488_v12 = vsub.f32 %v4525_v18, %v2474_v5  ;;  %v2741_v54 = vpop.f32.mrf.mxu0 }
 0x70a   : > { %v2252_v24 = vpack.c.bf16 %v2246_v26, %v2245_v62  ;;  %v2769_v0 = vsel %vm692_vm2, %v4657_v59, -inf  ;;  %v4666_v9 = vmul.f32 0.5, %v2741_v54 }
 0x70b   : > { %v4650_v33 = vpop.eup %3732  ;;  %v2500_v39 = vmul.f32 1.442695, %v2488_v12 }
 0x70c   : > { %3365 = vmatmul.msk.bf16.gmra.mxu1 %vm692_vm2, %v2252_v24  ;;  %v2517_v30 = vsel %vm692_vm2, %v4650_v33, 0.0  ;;  %v2772_v46 = vsel %vm692_vm2, %v4666_v9, -inf }
 0x70d   : > { %3734 = vpow2.f32 %v2500_v39  ;;  %2767 = vmax.xlane.f32.xlu0 %v2766_v50  ;;  %2518 = vadd.xlane.f32.xlu1 %v2517_v30  ;;  %v3457_v30 = vld [vmem:[%s3990_s16 + $0x30] sm:$0xff] }
 0x70e   : > { %2577 = vmatpush.bf16.msra.mxu1 %v3457_v30 }
 0x710   : > { %v2477_v52 = vpop.xlane.xlu0 %2476 }
 0x711   : > { %v2489_v18 = vsub.f32 %v4535_v17, %v2477_v52  ;;  %v2744_v17 = vpop.f32.mrf.mxu0 }
 0x712   : > { %v4675_v61 = vmul.f32 0.5, %v2744_v17 }
 0x713   : > { %v4660_v34 = vpop.eup %3734  ;;  %v2502_v45 = vmul.f32 1.442695, %v2489_v18 }
 0x714   : > { %v2520_v51 = vsel %vm692_vm2, %v4660_v34, 0.0 }
 0x715   : > { %3736 = vpow2.f32 %v2502_v45  ;;  %2770 = vmax.xlane.f32.xlu0 %v2769_v0  ;;  %2521 = vadd.xlane.f32.xlu1 %v2520_v51  ;;  %v573_v51 = vld [vmem:[%s4951_s6 + $0xa] sm:$0x3] }
 0x718   : > { %v2480_v42 = vpop.xlane.xlu0 %2479 }
 0x719   : > { %v2490_v48 = vsub.f32 %v4542_v21, %v2480_v42  ;;  %v2775_v21 = vsel %vm692_vm2, %v4675_v61, -inf  ;;  %v2746_v29 = vpop.f32.mrf.mxu0 }
 0x71a   : > { %v4683_v37 = vmul.f32 0.5, %v2746_v29 }
 0x71b   : > { %v4669_v4 = vpop.eup %3736  ;;  %v2504_v25 = vmul.f32 1.442695, %v2490_v48 }
 0x71c   : > { %v2523_v44 = vsel %vm692_vm2, %v4669_v4, 0.0  ;;  %v2778_v32 = vsel %vm692_vm2, %v4683_v37, -inf }
 0x71d   : > { %3738 = vpow2.f32 %v2504_v25  ;;  %2773 = vmax.xlane.f32.xlu1 %v2772_v46  ;;  %2524 = vadd.xlane.f32.xlu2 %v2523_v44 }
 0x71e   : > { %3740 = vrcp.f32 %v2225_v10 }
 0x723   : > { %v4677_v55 = vpop.eup %3738 }
 0x724   : > { %v2526_v23 = vsel %vm692_vm2, %v4677_v55, 0.0  ;;  %v3741_v24 = vpop.eup %3740 }
 0x725   : > { %2776 = vmax.xlane.f32.xlu1 %v2775_v21  ;;  %2527 = vadd.xlane.f32.xlu2 %v2526_v23  ;;  %v2247_v52 = vmul.f32 %v3741_v24, %v4527_v11 }
 0x72d   : > { %2779 = vmax.xlane.f32.xlu2 %v2778_v32 }
 0x747   : > { %v1736_v14 = vpop.f32.mrf.mxu3 }
 0x748   : > { %v4690_v41 = vadd.f32 %v1736_v14, %v4560_v19 }
 0x749   : > { %v1990_v58 = vpop.f32.mrf.mxu1 }
 0x74f   : > { %v4692_v62 = vpop.f32.mrf.mxu3 }
 0x750   : > { %v2228_v26 = vpop.xlane.xlu1 %2227 }
 0x751   : > { %3742 = vrcp.f32 %v2228_v26  ;;  %v1992_v5 = vpop.f32.mrf.mxu1 }
 0x752   : > { %v2006_v12 = vpack.c.bf16 %v1992_v5, %v1990_v58 }
 0x754   : > { %3337 = vmatmul.msk.bf16.gmra.mxu3 %vm639_vm1, %v2006_v12 }
 0x757   : > { %v3743_v39 = vpop.eup %3742  ;;  %v1741_v50 = vpop.f32.mrf.mxu3 }
 0x758   : > { %v2248_v54 = vmul.f32 %v3743_v39, %v4574_v49  ;;  %v4699_v19 = vadd.f32 %v1741_v50, %v4571_v8  ;;  %v2231_v10 = vpop.xlane.xlu1 %2230  ;;  %v2319_v49 = vsel %vm1093_vm3, %v573_v51, 0 }
 0x759   : > { %v1995_v18 = vpop.f32.mrf.mxu1  ;;  %3744 = vrcp.f32 %v2231_v10  ;;  %2328 = vmatpush.bf16.msrb.mxu3 %v2319_v49 }
 0x75a   : > { %v2253_v45 = vpack.c.bf16 %v2248_v54, %v2247_v52 }
 0x75c   : > { %3366 = vmatmul.msk.bf16.gmra.mxu1 %vm692_vm2, %v2253_v45 }
 0x75f   : > { %v4702_v0 = vpop.f32.mrf.mxu3  ;;  %v3745_v46 = vpop.eup %3744 }
 0x760   : > { %v2483_v42 = vpop.xlane.xlu1 %2482  ;;  %v2234_v11 = vpop.xlane.xlu2 %2233  ;;  %v2249_v23 = vmul.f32 %v3745_v46, %v4586_v27 }
 0x761   : > { %v2491_v8 = vsub.f32 %v4593_v47, %v2483_v42  ;;  %3746 = vrcp.f32 %v2234_v11  ;;  %v1997_v48 = vpop.f32.mrf.mxu1 }
 0x762   : > { %v2007_v17 = vpack.c.bf16 %v1997_v48, %v1995_v18 }
 0x763   : > { %v2506_v25 = vmul.f32 1.442695, %v2491_v8 }
 0x764   : > { %3338 = vmatmul.msk.bf16.gmra.mxu3 %vm639_vm1, %v2007_v17 }
 0x765   : > { %3748 = vpow2.f32 %v2506_v25 }
 0x767   : > { %v3747_v44 = vpop.eup %3746  ;;  %v1746_v21 = vpop.f32.mrf.mxu3 }
 0x768   : > { %v2250_v29 = vmul.f32 %v3747_v44, %v4600_v16  ;;  %v4713_v32 = vadd.f32 %v1746_v21, %v4597_v56  ;;  %v2759_v14 = vpop.xlane.xlu1 %2758  ;;  %v2510_v47 = vpop.xlane.xlu2 %2509 }
 0x769   : > { %v2781_v58 = vsub.f32 %v4609_v2, %v2759_v14  ;;  %v2000_v26 = vpop.f32.mrf.mxu1 }
 0x76a   : > { %v2254_v5 = vpack.c.bf16 %v2250_v29, %v2249_v23 }
 0x76b   : > { %v4716_v12 = vpop.eup %3748  ;;  %v2789_v24 = vmul.f32 1.442695, %v2781_v58 }
 0x76c   : > { %3367 = vmatmul.msk.bf16.gmra.mxu1 %vm692_vm2, %v2254_v5  ;;  %v2529_v39 = vsel %vm692_vm2, %v4716_v12, 0.0 }
 0x76d   : > { %3750 = vpow2.f32 %v2789_v24  ;;  %2530 = vadd.xlane.f32.xlu0 %v2529_v39 }
 0x76e   : > { %3752 = vrcp.f32 %v2510_v47 }
 0x76f   : > { %v4721_v27 = vpop.f32.mrf.mxu3 }
 0x770   : > { %v2762_v56 = vpop.xlane.xlu2 %2761  ;;  %v2513_v16 = vpop.xlane.xlu0 %2512 }
 0x771   : > { %v2782_v50 = vsub.f32 %v4622_v57, %v2762_v56  ;;  %3754 = vrcp.f32 %v2513_v16  ;;  %v2002_v2 = vpop.f32.mrf.mxu1 }
 0x772   : > { %v2008_v30 = vpack.c.bf16 %v2002_v2, %v2000_v26 }
 0x773   : > { %v4724_v52 = vpop.eup %3750  ;;  %v2791_v54 = vmul.f32 1.442695, %v2782_v50 }
 0x774   : > { %3339 = vmatmul.msk.bf16.gmra.mxu3 %vm639_vm1, %v2008_v30  ;;  %v2805_v10 = vsel %vm692_vm2, %v4724_v52, 0.0  ;;  %v3753_v18 = vpop.eup %3752 }
 0x775   : > { %3756 = vpow2.f32 %v2791_v54  ;;  %2806 = vadd.xlane.f32.xlu0 %v2805_v10  ;;  %v2540_v42 = vmul.f32 %v3753_v18, %v4612_v53 }
 0x777   : > { %v3755_v45 = vpop.eup %3754  ;;  %v1751_v51 = vpop.f32.mrf.mxu3 }
 0x778   : > { %v2541_v57 = vmul.f32 %v3755_v45, %v4628_v3  ;;  %v4732_v11 = vadd.f32 %v1751_v51, %v4625_v35  ;;  %v2765_v49 = vpop.xlane.xlu2 %2764  ;;  %v2516_v8 = vpop.xlane.xlu0 %2515 }
 0x779   : > { %v2783_v48 = vsub.f32 %v4635_v28, %v2765_v49  ;;  %v2282_v17 = vpop.f32.mrf.mxu1 }
 0x77a   : > { %v2548_v25 = vpack.c.bf16 %v2541_v57, %v2540_v42 }
 0x77b   : > { %v4735_v46 = vpop.eup %3756  ;;  %v2793_v44 = vmul.f32 1.442695, %v2783_v48 }
 0x77c   : > { %3396 = vmatmul.msk.bf16.vlgmr.msra.gmra.mxu1 %vm692_vm2, %v2548_v25  ;;  %v2808_v21 = vsel %vm692_vm2, %v4735_v46, 0.0 }
 0x77d   : > { %3758 = vpow2.f32 %v2793_v44  ;;  %2809 = vadd.xlane.f32.xlu1 %v2808_v21 }
 0x77e   : > { %3760 = vrcp.f32 %v2516_v8 }
 0x77f   : > { %v4740_v53 = vpop.f32.mrf.mxu3 }
 0x780   : > { %v2519_v35 = vpop.xlane.xlu1 %2518  ;;  %v2768_v3 = vpop.xlane.xlu0 %2767 }
 0x781   : > { %3762 = vrcp.f32 %v2519_v35  ;;  %v2784_v28 = vsub.f32 %v4646_v36, %v2768_v3  ;;  %v2284_v23 = vpop.f32.mrf.mxu1 }
 0x782   : > { %v2302_v29 = vpack.c.bf16 %v2284_v23, %v2282_v17 }
 0x783   : > { %v4743_v14 = vpop.eup %3758  ;;  %v2795_v47 = vmul.f32 1.442695, %v2784_v28 }
 0x784   : > { %3368 = vmatmul.msk.bf16.vlgmr.msrb.gmra.mxu3 %vm639_vm1, %v2302_v29  ;;  %v2811_v58 = vsel %vm692_vm2, %v4743_v14, 0.0  ;;  %v3761_v26 = vpop.eup %3760 }
 0x785   : > { %3764 = vpow2.f32 %v2795_v47  ;;  %2812 = vadd.xlane.f32.xlu2 %v2811_v58  ;;  %v2542_v39 = vmul.f32 %v3761_v26, %v4638_v13  ;;  %v3458_v13 = vld [vmem:[%s3990_s16 + $0x38] sm:$0xff] }
 0x786   : > { %2874 = vmatpush.bf16.msrb.mxu1 %v3458_v13 }
 0x787   : > { %v3763_v5 = vpop.eup %3762  ;;  %v2033_v24 = vpop.f32.mrf.mxu3 }
 0x788   : > { %v2543_v36 = vmul.f32 %v3763_v5, %v4650_v33  ;;  %v4751_v56 = vadd.f32 %v2033_v24, %v4690_v41  ;;  %v2522_v16 = vpop.xlane.xlu1 %2521  ;;  %v2771_v50 = vpop.xlane.xlu0 %2770 }
 0x789   : > { %v2785_v2 = vsub.f32 %v4657_v59, %v2771_v50  ;;  %v2287_v30 = vpop.f32.mrf.mxu1  ;;  %v574_v50 = vld [vmem:[%s4951_s6 + $0xc] sm:$0x3] }
 0x78a   : > { %v2549_v54 = vpack.c.bf16 %v2543_v36, %v2542_v39 }
 0x78b   : > { %v4754_v10 = vpop.eup %3764  ;;  %v2797_v18 = vmul.f32 1.442695, %v2785_v2 }
 0x78c   : > { %3397 = vmatmul.msk.bf16.gmra.mxu1 %vm692_vm2, %v2549_v54  ;;  %v2814_v45 = vsel %vm692_vm2, %v4754_v10, 0.0 }
 0x78d   : > { %3766 = vpow2.f32 %v2797_v18  ;;  %2815 = vadd.xlane.f32.xlu0 %v2814_v45 }
 0x78e   : > { %3768 = vrcp.f32 %v2522_v16 }
 0x78f   : > { %v4783_v24 = vpop.f32.mrf.mxu3 }
 0x790   : > { %v2774_v33 = vpop.xlane.xlu1 %2773  ;;  %v2525_v41 = vpop.xlane.xlu2 %2524 }
 0x791   : > { %v2786_v51 = vsub.f32 %v4666_v9, %v2774_v33  ;;  %3770 = vrcp.f32 %v2525_v41  ;;  %v2289_v59 = vpop.f32.mrf.mxu1 }
 0x792   : > { %v2303_v42 = vpack.c.bf16 %v2289_v59, %v2287_v30  ;;  %v2616_v30 = vsel %vm1093_vm3, %v574_v50, 0 }
 0x793   : > { %v4761_v57 = vpop.eup %3766  ;;  %v2799_v49 = vmul.f32 1.442695, %v2786_v51  ;;  %2625 = vmatpush.bf16.msra.mxu3 %v2616_v30  ;;  %v575_v30 = vld [vmem:[%s4951_s6 + $0xe] sm:$0x3] }
 0x794   : > { %3369 = vmatmul.msk.bf16.gmra.mxu3 %vm639_vm1, %v2303_v42  ;;  %v2817_v8 = vsel %vm692_vm2, %v4761_v57, 0.0  ;;  %v3769_v48 = vpop.eup %3768 }
 0x795   : > { %3772 = vpow2.f32 %v2799_v49  ;;  %2818 = vadd.xlane.f32.xlu1 %v2817_v8  ;;  %v2544_v25 = vmul.f32 %v3769_v48, %v4660_v34 }
 0x797   : > { %v3771_v17 = vpop.eup %3770 }
 0x798   : > { %v2545_v44 = vmul.f32 %v3771_v17, %v4669_v4  ;;  %v2777_v9 = vpop.xlane.xlu1 %2776  ;;  %v2528_v21 = vpop.xlane.xlu2 %2527 }
 0x799   : > { %v2787_v35 = vsub.f32 %v4675_v61, %v2777_v9 }
 0x79a   : > { %v2550_v3 = vpack.c.bf16 %v2545_v44, %v2544_v25 }
 0x79b   : > { %v4769_v28 = vpop.eup %3772  ;;  %v2801_v23 = vmul.f32 1.442695, %v2787_v35 }
 0x79c   : > { %3398 = vmatmul.msk.bf16.gmra.mxu1 %vm692_vm2, %v2550_v3  ;;  %v2820_v29 = vsel %vm692_vm2, %v4769_v28, 0.0 }
 0x79d   : > { %3774 = vpow2.f32 %v2801_v23  ;;  %2821 = vadd.xlane.f32.xlu2 %v2820_v29 }
 0x7a0   : > { %v2780_v47 = vpop.xlane.xlu2 %2779 }
 0x7a1   : > { %v2788_v34 = vsub.f32 %v4683_v37, %v2780_v47 }
 0x7a3   : > { %v4775_v58 = vpop.eup %3774  ;;  %v2803_v4 = vmul.f32 1.442695, %v2788_v34 }
 0x7a4   : > { %v2823_v61 = vsel %vm692_vm2, %v4775_v58, 0.0 }
 0x7a5   : > { %3776 = vpow2.f32 %v2803_v4  ;;  %2824 = vadd.xlane.f32.xlu0 %v2823_v61 }
 0x7a6   : > { %3778 = vrcp.f32 %v2528_v21 }
 0x7ab   : > { %v4779_v26 = vpop.eup %3776 }
 0x7ac   : > { %v2826_v5 = vsel %vm692_vm2, %v4779_v26, 0.0  ;;  %v3779_v45 = vpop.eup %3778 }
 0x7ad   : > { %2827 = vadd.xlane.f32.xlu1 %v2826_v5  ;;  %v2546_v33 = vmul.f32 %v3779_v45, %v4677_v55 }
 0x7d7   : > { %v2038_v39 = vpop.f32.mrf.mxu3 }
 0x7d8   : > { %v4786_v36 = vadd.f32 %v2038_v39, %v4699_v19 }
 0x7d9   : > { %v2292_v37 = vpop.f32.mrf.mxu1 }
 0x7df   : > { %v4788_v16 = vpop.f32.mrf.mxu3 }
 0x7e0   : > { %v2531_v2 = vpop.xlane.xlu0 %2530 }
 0x7e1   : > { %3780 = vrcp.f32 %v2531_v2  ;;  %v2294_v54 = vpop.f32.mrf.mxu1 }
 0x7e2   : > { %v2304_v18 = vpack.c.bf16 %v2294_v54, %v2292_v37  ;;  %v2913_v54 = vsel %vm1093_vm3, %v575_v30, 0 }
 0x7e3   : > { %2922 = vmatpush.bf16.msrb.mxu3 %v2913_v54 }
 0x7e4   : > { %3370 = vmatmul.msk.bf16.gmra.mxu3 %vm639_vm1, %v2304_v18 }
 0x7e7   : > { %v3781_v19 = vpop.eup %3780  ;;  %v2043_v13 = vpop.f32.mrf.mxu3 }
 0x7e8   : > { %v2547_v41 = vmul.f32 %v3781_v19, %v4716_v12  ;;  %v4798_v51 = vadd.f32 %v2043_v13, %v4713_v32  ;;  %v2807_v49 = vpop.xlane.xlu0 %2806 }
 0x7e9   : > { %v2297_v59 = vpop.f32.mrf.mxu1  ;;  %3782 = vrcp.f32 %v2807_v49 }
 0x7ea   : > { %v2551_v42 = vpack.c.bf16 %v2547_v41, %v2546_v33 }
 0x7ec   : > { %3399 = vmatmul.msk.bf16.gmra.mxu1 %vm692_vm2, %v2551_v42 }
 0x7ef   : > { %v4801_v8 = vpop.f32.mrf.mxu3  ;;  %v3783_v55 = vpop.eup %3782 }
 0x7f0   : > { %v2810_v48 = vpop.xlane.xlu1 %2809  ;;  %v2837_v32 = vmul.f32 %v3783_v55, %v4724_v52 }
 0x7f1   : > { %3784 = vrcp.f32 %v2810_v48  ;;  %v2299_v17 = vpop.f32.mrf.mxu1 }
 0x7f2   : > { %v2305_v25 = vpack.c.bf16 %v2299_v17, %v2297_v59 }
 0x7f4   : > { %3371 = vmatmul.msk.bf16.gmra.mxu3 %vm639_vm1, %v2305_v25 }
 0x7f7   : > { %v3785_v44 = vpop.eup %3784  ;;  %v2048_v12 = vpop.f32.mrf.mxu3 }
 0x7f8   : > { %v2838_v9 = vmul.f32 %v3785_v44, %v4735_v46  ;;  %v4807_v21 = vadd.f32 %v2048_v12, %v4732_v11  ;;  %v2813_v23 = vpop.xlane.xlu2 %2812 }
 0x7f9   : > { %v2579_v35 = vpop.f32.mrf.mxu1  ;;  %3786 = vrcp.f32 %v2813_v23 }
 0x7fa   : > { %v2845_v3 = vpack.c.bf16 %v2838_v9, %v2837_v32 }
 0x7fc   : > { %3428 = vmatmul.msk.bf16.vlgmr.msrb.gmra.mxu1 %vm692_vm2, %v2845_v3 }
 0x7ff   : > { %v4810_v29 = vpop.f32.mrf.mxu3  ;;  %v3787_v52 = vpop.eup %3786 }
 0x800   : > { %v2816_v47 = vpop.xlane.xlu0 %2815  ;;  %v2839_v11 = vmul.f32 %v3787_v52, %v4743_v14  ;;  %v3822_v52 = vmov 0  }
 0x801   : > { %3788 = vrcp.f32 %v2816_v47  ;;  %v2581_v34 = vpop.f32.mrf.mxu1  ;;  %3539 = vset.pattern.permute.xlu0 %v3822_v52  ;;  %3540 = vset.pattern.permute.xlu1 %v3822_v52 }
 0x802   : > { %v2599_v4 = vpack.c.bf16 %v2581_v34, %v2579_v35  ;;  %3538 = vset.pattern.permute.xlu2 %v3822_v52 }
 0x804   : > { %3400 = vmatmul.msk.bf16.vlgmr.msra.gmra.mxu3 %vm639_vm1, %v2599_v4  ;;  %v489_v4 = vld [vmem:[%s4848_s26 + $0x8] sm:$0xff] }
 0x805   : > { %vm497_vm4 = vcmp.gt.f32.partialorder %v489_v4, 0.5  ;;  %v1153_v4 = vadd.f32 %v4510_v6, %v4376_v40 }
 0x807   : > { %v3789_v61 = vpop.eup %3788  ;;  %v2330_v46 = vpop.f32.mrf.mxu3 }
 0x808   : > { %v2840_v5 = vmul.f32 %v3789_v61, %v4754_v10  ;;  %v4816_v39 = vadd.f32 %v2330_v46, %v4751_v56  ;;  %v2819_v2 = vpop.xlane.xlu1 %2818  ;;  %v2953_v61 = vsel %vm497_vm4, 1, %v3822_v52 }
 0x809   : > { %v2584_v37 = vpop.f32.mrf.mxu1  ;;  %3790 = vrcp.f32 %v2819_v2  ;;  %2964 = vperm.xlu0 %3539, %v2953_v61   ;;  %v1460_v61 = vadd.f32 %v4563_v63, %v1153_v4 }
 0x80a   : > { %v2846_v50 = vpack.c.bf16 %v2840_v5, %v2839_v11  ;;  %v490_v5 = vld [vmem:[%s4848_s26 + $0x10] sm:$0xff] }
 0x80b   : > { %vm498_vm5 = vcmp.gt.f32.partialorder %v490_v5, 0.5  ;;  %v4878_v5 = vld [vmem:[%s4952_s7] ss:$0 sm:$0xff] }
 0x80c   : > { %3429 = vmatmul.msk.bf16.gmra.mxu1 %vm692_vm2, %v2846_v50  ;;  %v488_v50 = vld [vmem:[%s4848_s26] sm:$0xff] }
 0x80d   : > { %vm496_vm6 = vcmp.gt.f32.partialorder %v488_v50, 0.5 }
 0x80e   : > { %v2952_v2 = vsel %vm496_vm6, 1, %v3822_v52 }
 0x80f   : > { %v4823_v18 = vpop.f32.mrf.mxu3  ;;  %v3791_v45 = vpop.eup %3790  ;;  %2961 = vperm.xlu2 %3538, %v2952_v2  }
 0x810   : > { %v2822_v14 = vpop.xlane.xlu2 %2821  ;;  %v2841_v33 = vmul.f32 %v3791_v45, %v4761_v57  ;;  %v495_v45 = vld [vmem:[%s4848_s26 + $0x38] sm:$0xff] }
 0x811   : > { %3792 = vrcp.f32 %v2822_v14  ;;  %v2586_v10 = vpop.f32.mrf.mxu1  ;;  %v493_v14 = vld [vmem:[%s4848_s26 + $0x28] sm:$0xff]  ;;  %vm503_vm9 = vcmp.gt.f32.partialorder %v495_v45, 0.5 }
 0x812   : > { %v2600_v56 = vpack.c.bf16 %v2586_v10, %v2584_v37  ;;  %vm501_vm7 = vcmp.gt.f32.partialorder %v493_v14, 0.5  ;;  %v491_v10 = vld [vmem:[%s4848_s26 + $0x18] sm:$0xff]  ;;  %v1158_v14 = vadd.f32 %v4533_v31, %v4399_v60 }
 0x813   : > { %vm499_vm8 = vcmp.gt.f32.partialorder %v491_v10, 0.5 }
 0x814   : > { %3401 = vmatmul.msk.bf16.gmra.mxu3 %vm639_vm1, %v2600_v56  ;;  %v2957_v56 = vsel %vm501_vm7, 1, %v3822_v52 }
 0x817   : > { %v3793_v19 = vpop.eup %3792  ;;  %v2335_v13 = vpop.f32.mrf.mxu3 }
 0x818   : > { %v2842_v41 = vmul.f32 %v3793_v19, %v4769_v28  ;;  %v4829_v59 = vadd.f32 %v2335_v13, %v4786_v36  ;;  %v2825_v48 = vpop.xlane.xlu0 %2824  ;;  %v2955_v19 = vsel %vm499_vm8, 1, %v3822_v52  ;;  %v492_v13 = vld [vmem:[%s4848_s26 + $0x20] sm:$0xff] }
 0x819   : > { %v2589_v42 = vpop.f32.mrf.mxu1  ;;  %3794 = vrcp.f32 %v2825_v48  ;;  %2970 = vperm.xlu2 %3538, %v2955_v19   ;;  %vm500_vm10 = vcmp.gt.f32.partialorder %v492_v13, 0.5 }
 0x81a   : > { %v2847_v49 = vpack.c.bf16 %v2842_v41, %v2841_v33  ;;  %v2959_v41 = vsel %vm503_vm9, 1, %v3822_v52 }
 0x81c   : > { %3430 = vmatmul.msk.bf16.gmra.mxu1 %vm692_vm2, %v2847_v49  ;;  %v494_v49 = vld [vmem:[%s4848_s26 + $0x30] sm:$0xff] }
 0x81d   : > { %vm502_vm11 = vcmp.gt.f32.partialorder %v494_v49, 0.5 }
 0x81f   : > { %v3795_v44 = vpop.eup %3794  ;;  %v4836_v32 = vpop.f32.mrf.mxu3 }
 0x820   : > { %v2828_v17 = vpop.xlane.xlu1 %2827  ;;  %v2843_v28 = vmul.f32 %v3795_v44, %v4775_v58 }
 0x821   : > { %3796 = vrcp.f32 %v2828_v17  ;;  %v2591_v25 = vpop.f32.mrf.mxu1 }
 0x822   : > { %v2601_v55 = vpack.c.bf16 %v2591_v25, %v2589_v42  ;;  %v2956_v42 = vsel %vm500_vm10, 1, %v3822_v52  ;;  %v2958_v25 = vsel %vm502_vm11, 1, %v3822_v52 }
 0x823   : > { %2973 = vperm.xlu2 %3538, %v2956_v42  }
 0x824   : > { %3402 = vmatmul.msk.bf16.gmra.mxu3 %vm639_vm1, %v2601_v55 }
 0x827   : > { %v3797_v57 = vpop.eup %3796 }
 0x828   : > { %v2844_v36 = vmul.f32 %v3797_v57, %v4779_v26 }
 0x82a   : > { %v2848_v12 = vpack.c.bf16 %v2844_v36, %v2843_v28 }
 0x82b   : > { %2979 = vperm.xlu2 %3538, %v2958_v25  }
 0x82c   : > { %3431 = vmatmul.msk.bf16.gmra.mxu1 %vm692_vm2, %v2848_v12 }
 0x867   : > { %v2340_v9 = vpop.f32.mrf.mxu3 }
 0x868   : > { %v4839_v35 = vadd.f32 %v2340_v9, %v4798_v51 }
 0x869   : > { %v2594_v3 = vpop.f32.mrf.mxu1 }
 0x86f   : > { %v4841_v23 = vpop.f32.mrf.mxu3 }
 0x871   : > { %v2596_v47 = vpop.f32.mrf.mxu1 }
 0x872   : > { %v2602_v34 = vpack.c.bf16 %v2596_v47, %v2594_v3 }
 0x874   : > { %3403 = vmatmul.msk.bf16.gmra.mxu3 %vm639_vm1, %v2602_v34 }
 0x877   : > { %v2345_v58 = vpop.f32.mrf.mxu3 }
 0x878   : > { %v4851_v26 = vadd.f32 %v2345_v58, %v4807_v21  ;;  %v2954_v21 = vsel %vm498_vm5, 1, %v3822_v52  ;;  %v2962_v52 = vpop.permute.xlu2 %2961 }
 0x879   : > { %v2876_v51 = vpop.f32.mrf.mxu1  ;;  %2967 = vperm.xlu1 %3540, %v2954_v21   ;;  %vm2984_vm12 = vcmp.eq.s32.totalorder %v2962_v52, 1  ;;  %v1757_v21 = vadd.f32 %v4692_v62, %v1460_v61 }
 0x87b   : > { %v2054_v50 = vadd.f32 %v4783_v24, %v1757_v21 }
 0x87d   : > { %v2351_v63 = vadd.f32 %v4823_v18, %v2054_v50 }
 0x87f   : > { %v4864_v28 = vpop.f32.mrf.mxu3 }
 0x880   : > { %v2971_v31 = vpop.permute.xlu2 %2970 }
 0x881   : > { %v2878_v46 = vpop.f32.mrf.mxu1  ;;  %2976 = vperm.xlu1 %3540, %v2957_v56   ;;  %v1462_v56 = vadd.f32 %v4579_v15, %v1158_v14  ;;  %vm2987_vm15 = vcmp.eq.s32.totalorder %v2971_v31, 1 }
 0x882   : > { %v2896_v11 = vpack.c.bf16 %v2878_v46, %v2876_v51 }
 0x883   : > { %v1759_v19 = vadd.f32 %v4702_v0, %v1462_v56  ;;  %v1163_v0 = vadd.f32 %v4549_v43, %v4412_v1 }
 0x884   : > { %3432 = vmatmul.msk.bf16.vlgmr.msrb.gmra.mxu3 %vm639_vm1, %v2896_v11 }
 0x887   : > { %v2627_v36 = vpop.f32.mrf.mxu3 }
 0x888   : > { %v2647_v46 = vadd.f32 %v2627_v36, %v4816_v39  ;;  %v2965_v39 = vpop.permute.xlu0 %2964  ;;  %v2974_v25 = vpop.permute.xlu2 %2973 }
 0x889   : > { %v2881_v37 = vpop.f32.mrf.mxu1  ;;  %2982 = vperm.xlu1 %3540, %v2959_v41   ;;  %vm2985_vm13 = vcmp.eq.s32.totalorder %v2965_v39, 1 }
 0x88f   : > { %v2629_v12 = vpop.f32.mrf.mxu3 }
 0x890   : > { %v2648_v2 = vadd.f32 %v2629_v12, %v2351_v63  ;;  %v2980_v52 = vpop.permute.xlu2 %2979 }
 0x891   : > { %v2883_v30 = vpop.f32.mrf.mxu1  ;;  %vm2990_vm3 = vcmp.eq.s32.totalorder %v2980_v52, 1 }
 0x892   : > { %v2897_v54 = vpack.c.bf16 %v2883_v30, %v2881_v37 }
 0x894   : > { %3433 = vmatmul.msk.bf16.gmra.mxu3 %vm639_vm1, %v2897_v54 }
 0x897   : > { %v2632_v9 = vpop.f32.mrf.mxu3 }
 0x898   : > { %v2649_v18 = vadd.f32 %v2632_v9, %v4829_v59 }
 0x899   : > { %v2886_v33 = vpop.f32.mrf.mxu1 }
 0x89f   : > { %v2634_v3 = vpop.f32.mrf.mxu3 }
 0x8a1   : > { %v2888_v48 = vpop.f32.mrf.mxu1 }
 0x8a2   : > { %v2898_v17 = vpack.c.bf16 %v2888_v48, %v2886_v33  ;;  %v2056_v33 = vadd.f32 %v4788_v16, %v1759_v19  ;;  %v1464_v16 = vadd.f32 %v4607_v20, %v1163_v0 }
 0x8a4   : > { %3434 = vmatmul.msk.bf16.gmra.mxu3 %vm639_vm1, %v2898_v17  ;;  %v2353_v60 = vadd.f32 %v4836_v32, %v2056_v33 }
 0x8a6   : > { %v2650_v49 = vadd.f32 %v2634_v3, %v2353_v60 }
 0x8a7   : > { %v2637_v47 = vpop.f32.mrf.mxu3 }
 0x8a8   : > { %v2651_v32 = vadd.f32 %v2637_v47, %v4839_v35 }
 0x8a9   : > { %v2891_v55 = vpop.f32.mrf.mxu1 }
 0x8af   : > { %v2639_v34 = vpop.f32.mrf.mxu3 }
 0x8b1   : > { %v2893_v44 = vpop.f32.mrf.mxu1 }
 0x8b2   : > { %v2899_v57 = vpack.c.bf16 %v2893_v44, %v2891_v55  ;;  %v1761_v44 = vadd.f32 %v4721_v27, %v1464_v16  ;;  %v1168_v27 = vadd.f32 %v4553_v22, %v4421_v7 }
 0x8b4   : > { %3435 = vmatmul.msk.bf16.gmra.mxu3 %vm639_vm1, %v2899_v57  ;;  %vm2988_vm1 = vcmp.eq.s32.totalorder %v2974_v25, 1  ;;  %v2058_v36 = vadd.f32 %v4801_v8, %v1761_v44  ;;  %v1466_v8 = vadd.f32 %v4687_v38, %v1168_v27 }
 0x8b6   : > { %v2355_v1 = vadd.f32 %v4841_v23, %v2058_v36  ;;  %v1763_v61 = vadd.f32 %v4740_v53, %v1466_v8 }
 0x8b8   : > { %v2652_v43 = vadd.f32 %v2639_v34, %v2355_v1 }
 0x8eb   : > { %v2968_v10 = vpop.permute.xlu1 %2967 }
 0x8ec   : > { %vm2986_vm14 = vcmp.eq.s32.totalorder %v2968_v10, 1 }
 0x8f3   : > { %v2977_v20 = vpop.permute.xlu1 %2976 }
 0x8f4   : > { %vm2989_vm2 = vcmp.eq.s32.totalorder %v2977_v20, 1 }
 0x8f7   : > { %v4867_v58 = vpop.f32.mrf.mxu3 }
 0x8f8   : > { %v2653_v23 = vadd.f32 %v4867_v58, %v4851_v26 }
 0x8fb   : > { %v2983_v38 = vpop.permute.xlu1 %2982 }
 0x8fc   : > { %vm2991_vm4 = vcmp.eq.s32.totalorder %v2983_v38, 1 }
 0x8ff   : > { %v4869_v51 = vpop.f32.mrf.mxu3 }
 0x907   : > { %v2924_v11 = vpop.f32.mrf.mxu3 }
 0x908   : > { %v2944_v37 = vadd.f32 %v2924_v11, %v2647_v46  ;;  %v2060_v11 = vadd.f32 %v4810_v29, %v1763_v61 }
 0x90a   : > { %v2992_v40 = vsel %vm2984_vm12, 0.0, %v2944_v37  ;;  %v2357_v7 = vadd.f32 %v4864_v28, %v2060_v11 }
 0x90b   : > { %v3004_v6 = vadd.f32 %v4878_v5, %v2992_v40 }
 0x90c   : > { %v2654_v22 = vadd.f32 %v4869_v51, %v2357_v7 }
 0x90d   : > { %3012 = vst.msk [vmem:[%s4886_s13] sm:$0xff] %vm588_vm0, %v3004_v6 }
 0x90f   : > { %v2926_v62 = vpop.f32.mrf.mxu3 }
 0x910   : > { %v2945_v30 = vadd.f32 %v2926_v62, %v2648_v2 }
 0x912   : > { %v2993_v24 = vsel %vm2985_vm13, 0.0, %v2945_v30 }
 0x913   : > { %v3005_v54 = vadd.f32 %v4878_v5, %v2993_v24 }
 0x915   : > { %3013 = vst.msk [vmem:[%s4886_s13 + $0x8] sm:$0xff] %vm588_vm0, %v3005_v54 }
 0x917   : > { %v2929_v45 = vpop.f32.mrf.mxu3 }
 0x918   : > { %v2946_v13 = vadd.f32 %v2929_v45, %v2649_v18 }
 0x91a   : > { %v2994_v41 = vsel %vm2986_vm14, 0.0, %v2946_v13 }
 0x91b   : > { %v3006_v42 = vadd.f32 %v4878_v5, %v2994_v41 }
 0x91d   : > { %3014 = vst.msk [vmem:[%s4886_s13 + $0x10] sm:$0xff] %vm588_vm0, %v3006_v42 }
 0x91f   : > { %v2931_v15 = vpop.f32.mrf.mxu3 }
 0x920   : > { %v2947_v59 = vadd.f32 %v2931_v15, %v2650_v49 }
 0x922   : > { %v2995_v48 = vsel %vm2987_vm15, 0.0, %v2947_v59 }
 0x923   : > { %v3007_v17 = vadd.f32 %v4878_v5, %v2995_v48 }
 0x925   : > { %3015 = vst.msk [vmem:[%s4886_s13 + $0x18] sm:$0xff] %vm588_vm0, %v3007_v17 }
 0x927   : > { %v2934_v55 = vpop.f32.mrf.mxu3 }
 0x928   : > { %v2948_v57 = vadd.f32 %v2934_v55, %v2651_v32 }
 0x92a   : > { %v2996_v12 = vsel %vm2988_vm1, 0.0, %v2948_v57 }
 0x92b   : > { %v3008_v9 = vadd.f32 %v4878_v5, %v2996_v12 }
 0x92d   : > { %3016 = vst.msk [vmem:[%s4886_s13 + $0x20] sm:$0xff] %vm588_vm0, %v3008_v9 }
 0x92f   : > { %v2936_v35 = vpop.f32.mrf.mxu3 }
 0x930   : > { %v2949_v3 = vadd.f32 %v2936_v35, %v2652_v43 }
 0x932   : > { %v2997_v47 = vsel %vm2989_vm2, 0.0, %v2949_v3 }
 0x933   : > { %v3009_v4 = vadd.f32 %v4878_v5, %v2997_v47 }
 0x935   : > { %3017 = vst.msk [vmem:[%s4886_s13 + $0x28] sm:$0xff] %vm588_vm0, %v3009_v4 }
 0x937   : > { %v2939_v34 = vpop.f32.mrf.mxu3 }
 0x938   : > { %v2950_v46 = vadd.f32 %v2939_v34, %v2653_v23 }
 0x93a   : > { %v2998_v21 = vsel %vm2990_vm3, 0.0, %v2950_v46 }
 0x93b   : > { %v3010_v37 = vadd.f32 %v4878_v5, %v2998_v21 }
 0x93d   : > { %3018 = vst.msk [vmem:[%s4886_s13 + $0x30] sm:$0xff] %vm588_vm0, %v3010_v37 }
 0x93f   : > { %v2941_v26 = vpop.f32.mrf.mxu3 }
 0x940   : > { %v2951_v58 = vadd.f32 %v2941_v26, %v2654_v22 }
 0x942   : > { %v2999_v50 = vsel %vm2991_vm4, 0.0, %v2951_v58 }
 0x943   : > { %v3011_v53 = vadd.f32 %v4878_v5, %v2999_v50 }
 0x945   : > { %3019 = vst.msk [vmem:[%s4886_s13 + $0x38] sm:$0xff] %vm588_vm0, %v3011_v53 }
 0x946 PF: > { %s18_s29 = sadd.s32 1, %s3820_s29   ;;  %s4954_s27 = smov %s3816_s28 }
 0x947   : > { %p15_p5 = scmp.ge.s32.totalorder %s18_s29, 4   ;;  %s4955_s28 = smov %s4957_s30 }
 0x949   :  { %17 = sbr.rel (!%p15_p5) target bundleno = 2 (0x2), region = 94 }

</bundles_post_ra>
